<compile_context>
chip_gen: v7x
topology: tpu7x:2x2x1
jax: 0.10.0
libtpu: 0.0.40
codegen_flags: <defaults>
</compile_context>

<pallas_src>
import jax
import jax.numpy as jnp
import numpy as np
from jax.experimental import pallas as pl
from jax.experimental.pallas import tpu as pltpu

N_NODES = 14   # hardcoded in GCNLayer.forward (range(14))
N_EDGES = 44   # hardcoded in GCNLayer.forward (range(44))
E_PAD = 48     # edges padded to a multiple of 8 so per-graph reshapes are free


def _leaky_relu(x, slope=0.01):
    return jnp.where(x >= 0, x, slope * x)


def _round8(n):
    return ((n + 7) // 8) * 8


def _pack_offsets(f, two_h):
    """Row offsets of each packed tensor inside the [rows, two_h] weight pack.

    All offsets are multiples of 8 so in-kernel ref slices are aligned views.
    """
    r_w1 = 0                       # block-diag(w11, w21)        [f, 2H]
    r_b1 = r_w1 + _round8(f)       # concat(b11, b21)            [1, 2H]
    r_w2 = r_b1 + 8                # block-diag(w12, w22)        [2H, 2H]
    r_b2 = r_w2 + _round8(two_h)   # concat(b12, b22)            [1, 2H]
    r_w3 = r_b2 + 8                # stack(w3a, w3b)             [2H, 2H] (col-padded)
    r_b3 = r_w3 + _round8(two_h)   # b3                          [1, 2H]  (col-padded)
    rows = r_b3 + 8
    return r_w1, r_b1, r_w2, r_b2, r_w3, r_b3, rows


# ----------------------------- Pallas kernel --------------------------------
def net_kernel(p_ref, mpool_ref, x_ref, w_ref, o_ref):
    tb, e_pad, f = x_ref.shape          # batch tile, padded edges, s1+s2
    two_h = w_ref.shape[1]              # 2 * hidden (== pack width == out width)
    r_w1, r_b1, r_w2, r_b2, r_w3, r_b3, _ = _pack_offsets(f, two_h)

    # Static, 8-aligned ref-view slices of the packed weights (zero-cost views).
    w1 = w_ref[r_w1:r_w1 + f, :]
    b1 = w_ref[r_b1:r_b1 + 1, :]
    w2 = w_ref[r_w2:r_w2 + two_h, :]
    b2 = w_ref[r_b2:r_b2 + 1, :]
    w3 = w_ref[r_w3:r_w3 + two_h, :]    # full pack width (lane-dense final matmul/store)
    b3 = w_ref[r_b3:r_b3 + 1, :]

    # Broadcast the small [E_PAD, E_PAD] propagation matrix across the batch
    # tile ONCE (hoisted; reused by both propagation einsums).  Pad rows/cols
    # of P are zero, so padded edge rows never leak into real rows.
    p3 = jnp.broadcast_to(p_ref[...][None, :, :], (tb, e_pad, e_pad))

    # GCN layer 1: per-graph propagation (batched matmul, no kron blow-up),
    # then the lane-fused block-diagonal dense of both branches + LeakyReLU.
    h3 = jnp.einsum('bef,bfc->bec', p3, x_ref[...],
                    preferred_element_type=jnp.float32)
    h = h3.reshape(tb * e_pad, f)                       # free view: e_pad % 8 == 0
    h = _leaky_relu(jnp.dot(h, w1, preferred_element_type=jnp.float32) + b1)

    # GCN layer 2.
    h3 = jnp.einsum('bef,bfc->bec', p3, h.reshape(tb, e_pad, two_h),
                    preferred_element_type=jnp.float32)
    h = _leaky_relu(jnp.dot(h3.reshape(tb * e_pad, two_h), w2,
                            preferred_element_type=jnp.float32) + b2)

    # Mean over each graph's 44 real edges as a single MXU matmul (padded edge
    # rows have pooling weight 0, real rows 1/44), chained into a3.
    pooled = jnp.dot(mpool_ref[...], h, preferred_element_type=jnp.float32)   # [tb, 2H]
    o_ref[...] = jnp.dot(pooled, w3, preferred_element_type=jnp.float32) + b3


# ------------------------------- wrapper -------------------------------------
def build_pool_matrix(tb, n_edges, e_pad):
    """Per-tile block-diagonal mean-pool matrix [tb, tb*e_pad] (exact 1/n_edges)."""
    row = np.zeros((1, e_pad), np.float32)
    row[0, :n_edges] = 1.0 / n_edges
    return jnp.asarray(np.kron(np.eye(tb, dtype=np.float32), row))


def net_forward(w_pack, p_pad, x1, x2, out_dim, *, tb=None):
    """Batched Net.forward. x1: [B,E,s1], x2: [B,E,s2] -> [B, out_dim]."""
    B, E, s1 = x1.shape
    _, _, s2 = x2.shape
    f = s1 + s2
    e_pad = p_pad.shape[0]
    two_h = w_pack.shape[1]

    # Collapse the grid for small batches (the kernel is launch/overhead-bound);
    # larger batches tile the batch axis with an 8-aligned tile.
    if tb is None:
        tb = B if B <= 64 else 32
    nb = (B + tb - 1) // tb
    Bp = nb * tb

    X = jnp.concatenate([x1, x2], axis=-1)                    # fuse branches on lanes
    X = jnp.pad(X, ((0, Bp - B), (0, e_pad - E), (0, 0)))     # pad batch + edge rows

    m_pool = build_pool_matrix(tb, E, e_pad)

    out = pl.pallas_call(
        net_kernel,
        out_shape=jax.ShapeDtypeStruct((Bp, two_h), jnp.float32),
        grid_spec=pltpu.PrefetchScalarGridSpec(
            num_scalar_prefetch=0,
            grid=(nb,),
            in_specs=[
                pl.BlockSpec((e_pad, e_pad), lambda i: (0, 0)),      # P (grid-invariant)
                pl.BlockSpec((tb, tb * e_pad), lambda i: (0, 0)),    # pooling matrix
                pl.BlockSpec((tb, e_pad, f), lambda i: (i, 0, 0)),   # batch tile of inputs
                pl.BlockSpec(w_pack.shape, lambda i: (0, 0)),        # packed weights
            ],
            out_specs=pl.BlockSpec((tb, two_h), lambda i: (i, 0)),   # lane-dense output
        ),
        compiler_params=pltpu.CompilerParams(
            dimension_semantics=("parallel",)),
    )(p_pad, m_pool, X, w_pack)
    return out[:B, :out_dim]


# ------------------------- host-side graph / params -------------------------
def build_edge_list():
    # Deterministic 44-edge graph on 14 nodes; every node has >= 1 in-edge,
    # no self-loops, no duplicate edges (edge_list is a global in the original code).
    return [(i % N_NODES, (i + 1 + i // N_NODES) % N_NODES) for i in range(N_EDGES)]


def propagation_matrix(edge_list):
    E, N = len(edge_list), N_NODES
    S = np.zeros((E, N), np.float32)   # one-hot src per edge
    D = np.zeros((E, N), np.float32)   # one-hot dst per edge
    for e, (s, d) in enumerate(edge_list):
        S[e, s] = 1.0
        D[e, d] = 1.0
    indeg = D.sum(axis=0)                       # [N], all > 0 by construction
    Min = (D / indeg[None, :]).T                # [N, E]  mean over in-edges
    Adj = D.T @ S                               # [N, N]  Adj[v,u] = #edges u->v
    P = 0.5 * (S + D) @ Adj @ Adj @ Min         # [E, E]
    return np.asarray(P, dtype=np.float32)


def pad_propagation(P, e_pad):
    e = P.shape[0]
    out = np.zeros((e_pad, e_pad), np.float32)
    out[:e, :e] = P
    return jnp.asarray(out)


def init_params(key, s_dim_1, s_dim_2, hidden, out_dim):
    ks = jax.random.split(key, 5)
    # nn.Linear init per weigth_init: weight ~ N(0, 0.01), bias = 0
    lin = lambda k, fi, fo: (0.01 * jax.random.normal(k, (fi, fo), jnp.float32))
    params = {
        "w11": lin(ks[0], s_dim_1, hidden), "b11": jnp.zeros((1, hidden), jnp.float32),
        "w12": lin(ks[1], hidden, hidden),  "b12": jnp.zeros((1, hidden), jnp.float32),
        "w21": lin(ks[2], s_dim_2, hidden), "b21": jnp.zeros((1, hidden), jnp.float32),
        "w22": lin(ks[3], hidden, hidden),  "b22": jnp.zeros((1, hidden), jnp.float32),
    }
    w3 = 0.01 * jax.random.normal(ks[4], (2 * hidden, out_dim), jnp.float32)
    params["w3a"] = w3[:hidden]
    params["w3b"] = w3[hidden:]
    params["b3"] = jnp.zeros((1, out_dim), jnp.float32)
    return params


def pack_params(params, out_dim):
    """Pack all weights/biases into one [rows, 2H] f32 array (single DMA)."""
    w11 = np.asarray(params["w11"]); w21 = np.asarray(params["w21"])
    w12 = np.asarray(params["w12"]); w22 = np.asarray(params["w22"])
    s1, h = w11.shape
    s2 = w21.shape[0]
    f, two_h = s1 + s2, 2 * h
    assert out_dim <= two_h

    w1 = np.zeros((f, two_h), np.float32)
    w1[:s1, :h] = w11
    w1[s1:, h:] = w21
    w2 = np.zeros((two_h, two_h), np.float32)
    w2[:h, :h] = w12
    w2[h:, h:] = w22
    b1 = np.concatenate([np.asarray(params["b11"]), np.asarray(params["b21"])], axis=1)[0]
    b2 = np.concatenate([np.asarray(params["b12"]), np.asarray(params["b22"])], axis=1)[0]
    w3 = np.concatenate([np.asarray(params["w3a"]), np.asarray(params["w3b"])], axis=0)
    b3 = np.asarray(params["b3"])[0]

    r_w1, r_b1, r_w2, r_b2, r_w3, r_b3, rows = _pack_offsets(f, two_h)
    pack = np.zeros((rows, two_h), np.float32)
    pack[r_w1:r_w1 + f] = w1
    pack[r_b1] = b1
    pack[r_w2:r_w2 + two_h] = w2
    pack[r_b2] = b2
    pack[r_w3:r_w3 + two_h, :out_dim] = w3     # columns >= out_dim stay exactly 0
    pack[r_b3, :out_dim] = b3
    return jnp.asarray(pack)


# ------------------------------- reference -----------------------------------
def ref_forward_single(params, p, x1, x2):
    """Faithful per-state (unfused) reference of Net.forward."""
    def branch(x, wA, bA, wB, bB):
        h = _leaky_relu(p @ x @ wA + bA)
        h = _leaky_relu(p @ h @ wB + bB)
        return jnp.mean(h, axis=0, keepdims=True)
    h1 = branch(x1, params["w11"], params["b11"], params["w12"], params["b12"])
    h2 = branch(x2, params["w21"], params["b21"], params["w22"], params["b22"])
    return (h1 @ params["w3a"] + h2 @ params["w3b"] + params["b3"])[0]


if __name__ == "__main__":
    s_dim_1, s_dim_2, hidden, out_dim = 16, 8, 32, 4
    B = 16

    key = jax.random.PRNGKey(0)
    kp, k1, k2 = jax.random.split(key, 3)

    params = init_params(kp, s_dim_1, s_dim_2, hidden, out_dim)
    edge_list = build_edge_list()
    P = propagation_matrix(edge_list)             # same topology for g1 and g2
    p_pad = pad_propagation(P, E_PAD)
    w_pack = pack_params(params, out_dim)

    x1 = jax.random.normal(k1, (B, N_EDGES, s_dim_1), jnp.float32)
    x2 = jax.random.normal(k2, (B, N_EDGES, s_dim_2), jnp.float32)

    out = net_forward(w_pack, p_pad, x1, x2, out_dim)
    out = jax.block_until_ready(out)

    Pj = jnp.asarray(P)
    ref = jax.vmap(lambda a, b: ref_forward_single(params, Pj, a, b))(x1, x2)
    ref = jax.block_until_ready(ref)

    # Tolerance accounts for default (bf16-pass) MXU precision: the fused kernel
    # and the unfused reference group the matmuls differently, so results match
    # only to ~MXU rounding level, not bitwise.
    np.testing.assert_allclose(np.asarray(out), np.asarray(ref), rtol=1e-2, atol=1e-3)

    print("KERNEL_OK")
</pallas_src>

<mosaic_0001>
module attributes {stable_mosaic.version = 11 : i64} {
  func.func @net_kernel(%arg0: i32, %arg1: memref<48x48xf32, #tpu.memory_space<vmem>>, %arg2: memref<16x768xf32, #tpu.memory_space<vmem>>, %arg3: memref<16x48x24xf32, #tpu.memory_space<vmem>>, %arg4: memref<176x64xf32, #tpu.memory_space<vmem>>, %arg5: memref<16x64xf32, #tpu.memory_space<vmem>>) attributes {dimension_semantics = [#tpu.dimension_semantics<parallel>], iteration_bounds = array<i64: 1>, scalar_prefetch = 0 : i64, scratch_operands = 0 : i64, tpu.core_type = #tpu.core_type<tc>, window_params = [{pipeline_mode = #tpu.pipeline_mode<synchronous>, transform_indices = @transform_0, window_bounds = array<i64: 48, 48>}, {pipeline_mode = #tpu.pipeline_mode<synchronous>, transform_indices = @transform_1, window_bounds = array<i64: 16, 768>}, {transform_indices = @transform_2, window_bounds = array<i64: 16, 48, 24>}, {pipeline_mode = #tpu.pipeline_mode<synchronous>, transform_indices = @transform_3, window_bounds = array<i64: 176, 64>}, {transform_indices = @transform_4, window_bounds = array<i64: 16, 64>}]} {
    %c0 = arith.constant 0 : index
    %c0_0 = arith.constant 0 : index
    %0 = vector.load %arg4[%c0, %c0_0] : memref<176x64xf32, #tpu.memory_space<vmem>>, vector<24x64xf32>
    %c24 = arith.constant 24 : index
    %c0_1 = arith.constant 0 : index
    %1 = vector.load %arg4[%c24, %c0_1] : memref<176x64xf32, #tpu.memory_space<vmem>>, vector<1x64xf32>
    %c32 = arith.constant 32 : index
    %c0_2 = arith.constant 0 : index
    %2 = vector.load %arg4[%c32, %c0_2] : memref<176x64xf32, #tpu.memory_space<vmem>>, vector<64x64xf32>
    %c96 = arith.constant 96 : index
    %c0_3 = arith.constant 0 : index
    %3 = vector.load %arg4[%c96, %c0_3] : memref<176x64xf32, #tpu.memory_space<vmem>>, vector<1x64xf32>
    %c104 = arith.constant 104 : index
    %c0_4 = arith.constant 0 : index
    %4 = vector.load %arg4[%c104, %c0_4] : memref<176x64xf32, #tpu.memory_space<vmem>>, vector<64x64xf32>
    %c168 = arith.constant 168 : index
    %c0_5 = arith.constant 0 : index
    %5 = vector.load %arg4[%c168, %c0_5] : memref<176x64xf32, #tpu.memory_space<vmem>>, vector<1x64xf32>
    %c0_6 = arith.constant 0 : index
    %c0_7 = arith.constant 0 : index
    %6 = vector.load %arg1[%c0_6, %c0_7] : memref<48x48xf32, #tpu.memory_space<vmem>>, vector<48x48xf32>
    %7 = vector.shape_cast %6 : vector<48x48xf32> to vector<1x48x48xf32>
    %8 = vector.shape_cast %7 : vector<1x48x48xf32> to vector<1x48x48xf32>
    %9 = vector.broadcast %8 : vector<1x48x48xf32> to vector<16x48x48xf32>
    %c0_8 = arith.constant 0 : index
    %c0_9 = arith.constant 0 : index
    %c0_10 = arith.constant 0 : index
    %10 = vector.load %arg3[%c0_8, %c0_9, %c0_10] : memref<16x48x24xf32, #tpu.memory_space<vmem>>, vector<16x48x24xf32>
    "tpu.trace_start"() <{level = 10 : i32, message = "bef,bfc->bec"}> : () -> ()
    %cst = arith.constant dense<0.000000e+00> : vector<16x48x24xf32>
    %11 = tpu.matmul %9, %10, %cst {dimension_numbers = #tpu.dot_dimension_numbers<[2], [1], [1], [2], [0, 0, 0, 1, 1, 2], [0], [0]>} : vector<16x48x48xf32>, vector<16x48x24xf32>, vector<16x48x24xf32> -> vector<16x48x24xf32>
    "tpu.trace_stop"() : () -> ()
    %12 = vector.shape_cast %11 : vector<16x48x24xf32> to vector<768x24xf32>
    %cst_11 = arith.constant dense<0.000000e+00> : vector<768x64xf32>
    %13 = tpu.matmul %12, %0, %cst_11 {dimension_numbers = #tpu.dot_dimension_numbers<[1], [0], [0], [1], [0, 0, 1, 1], [], []>} : vector<768x24xf32>, vector<24x64xf32>, vector<768x64xf32> -> vector<768x64xf32>
    %14 = vector.broadcast %1 : vector<1x64xf32> to vector<768x64xf32>
    %15 = arith.addf %13, %14 : vector<768x64xf32>
    %cst_12 = arith.constant 0.000000e+00 : f32
    %16 = vector.broadcast %cst_12 : f32 to vector<768x64xf32>
    %17 = arith.cmpf oge, %15, %16 : vector<768x64xf32>
    %cst_13 = arith.constant 0.00999999977 : f32
    %18 = vector.broadcast %cst_13 : f32 to vector<768x64xf32>
    %19 = arith.mulf %18, %15 : vector<768x64xf32>
    %20 = arith.select %17, %15, %19 : vector<768x64xi1>, vector<768x64xf32>
    %21 = vector.shape_cast %20 : vector<768x64xf32> to vector<16x48x64xf32>
    "tpu.trace_start"() <{level = 10 : i32, message = "bef,bfc->bec"}> : () -> ()
    %cst_14 = arith.constant dense<0.000000e+00> : vector<16x48x64xf32>
    %22 = tpu.matmul %9, %21, %cst_14 {dimension_numbers = #tpu.dot_dimension_numbers<[2], [1], [1], [2], [0, 0, 0, 1, 1, 2], [0], [0]>} : vector<16x48x48xf32>, vector<16x48x64xf32>, vector<16x48x64xf32> -> vector<16x48x64xf32>
    "tpu.trace_stop"() : () -> ()
    %23 = vector.shape_cast %22 : vector<16x48x64xf32> to vector<768x64xf32>
    %cst_15 = arith.constant dense<0.000000e+00> : vector<768x64xf32>
    %24 = tpu.matmul %23, %2, %cst_15 {dimension_numbers = #tpu.dot_dimension_numbers<[1], [0], [0], [1], [0, 0, 1, 1], [], []>} : vector<768x64xf32>, vector<64x64xf32>, vector<768x64xf32> -> vector<768x64xf32>
    %25 = vector.broadcast %3 : vector<1x64xf32> to vector<768x64xf32>
    %26 = arith.addf %24, %25 : vector<768x64xf32>
    %cst_16 = arith.constant 0.000000e+00 : f32
    %27 = vector.broadcast %cst_16 : f32 to vector<768x64xf32>
    %28 = arith.cmpf oge, %26, %27 : vector<768x64xf32>
    %cst_17 = arith.constant 0.00999999977 : f32
    %29 = vector.broadcast %cst_17 : f32 to vector<768x64xf32>
    %30 = arith.mulf %29, %26 : vector<768x64xf32>
    %31 = arith.select %28, %26, %30 : vector<768x64xi1>, vector<768x64xf32>
    %c0_18 = arith.constant 0 : index
    %c0_19 = arith.constant 0 : index
    %32 = vector.load %arg2[%c0_18, %c0_19] : memref<16x768xf32, #tpu.memory_space<vmem>>, vector<16x768xf32>
    %cst_20 = arith.constant dense<0.000000e+00> : vector<16x64xf32>
    %33 = tpu.matmul %32, %31, %cst_20 {dimension_numbers = #tpu.dot_dimension_numbers<[1], [0], [0], [1], [0, 0, 1, 1], [], []>} : vector<16x768xf32>, vector<768x64xf32>, vector<16x64xf32> -> vector<16x64xf32>
    %cst_21 = arith.constant dense<0.000000e+00> : vector<16x64xf32>
    %34 = tpu.matmul %33, %4, %cst_21 {dimension_numbers = #tpu.dot_dimension_numbers<[1], [0], [0], [1], [0, 0, 1, 1], [], []>} : vector<16x64xf32>, vector<64x64xf32>, vector<16x64xf32> -> vector<16x64xf32>
    %35 = vector.broadcast %5 : vector<1x64xf32> to vector<16x64xf32>
    %36 = arith.addf %34, %35 : vector<16x64xf32>
    %c0_22 = arith.constant 0 : index
    %c0_23 = arith.constant 0 : index
    %37 = vector.load %arg5[%c0_22, %c0_23] : memref<16x64xf32, #tpu.memory_space<vmem>>, vector<16x64xf32>
    tpu.vector_store %arg5[%c0_22, %c0_23], %36 {strides = array<i32>} : memref<16x64xf32, #tpu.memory_space<vmem>>, vector<16x64xf32>,
    return
  }
  func.func @transform_0(%arg0: i32) -> (i32, i32) {
    %c0_i32 = arith.constant 0 : i32
    %c0_i32_0 = arith.constant 0 : i32
    %c0_i32_1 = arith.constant 0 : i32
    return %c0_i32, %c0_i32_0 : i32, i32
  }
  func.func @transform_1(%arg0: i32) -> (i32, i32) {
    %c0_i32 = arith.constant 0 : i32
    %c0_i32_0 = arith.constant 0 : i32
    %c0_i32_1 = arith.constant 0 : i32
    return %c0_i32, %c0_i32_0 : i32, i32
  }
  func.func @transform_2(%arg0: i32) -> (i32, i32, i32) {
    %c0_i32 = arith.constant 0 : i32
    %c0_i32_0 = arith.constant 0 : i32
    %c0_i32_1 = arith.constant 0 : i32
    return %arg0, %c0_i32, %c0_i32_0 : i32, i32, i32
  }
  func.func @transform_3(%arg0: i32) -> (i32, i32) {
    %c0_i32 = arith.constant 0 : i32
    %c0_i32_0 = arith.constant 0 : i32
    %c0_i32_1 = arith.constant 0 : i32
    return %c0_i32, %c0_i32_0 : i32, i32
  }
  func.func @transform_4(%arg0: i32) -> (i32, i32) {
    %c0_i32 = arith.constant 0 : i32
    %c0_i32_0 = arith.constant 0 : i32
    return %arg0, %c0_i32 : i32, i32
  }
}

</mosaic_0001>

<bundles_post_ra>
// kernel: tpu_custom_call.1
= control target key start
LH: loop header
LB: loop body
LE: loop exit
PB: predicated region body
PF: predicated region fallthrough
CT: control target
= control target key end

     0   :  { %vm142_vm0 = vcmask 392192   ;;  %s10080_s0 = inlined_call_operand.vmem [shape: f32[48,48], index: 0, kind: input, shape index: {}]   ;;  %s10081_s1 = inlined_call_operand.vmem [shape: f32[16,768], index: 1, kind: input, shape index: {}]   ;;  %s10082_s2 = inlined_call_operand.vmem [shape: f32[16,48,24], index: 2, kind: input, shape index: {}]   ;;  %s10083_s3 = inlined_call_operand.vmem [shape: f32[176,64], index: 3, kind: input, shape index: {}]   ;;  %s10084_s4 = inlined_call_operand.hbm [shape: f32[16,64], index: 4, kind: output, shape index: {}]  }
   0x1   :  { %v46_v0 = vld [vmem:[%s10082_s2] sm:$0xff]  ;;  %v47_v1 = vld [vmem:[%s10082_s2 + $0x8] sm:$0xff]  ;;  %v48_v2 = vld [vmem:[%s10082_s2 + $0x10] sm:$0xff] }
   0x2   :  { %v7894_v3 = vpack.c.bf16 %v47_v1, %v46_v0  ;;  %v49_v4 = vld [vmem:[%s10082_s2 + $0x18] sm:$0xff]  ;;  %v50_v5 = vld [vmem:[%s10082_s2 + $0x20] sm:$0xff]  ;;  %v51_v6 = vld [vmem:[%s10082_s2 + $0x28] sm:$0xff] }
   0x3   :  { %v7898_v7 = vpack.c.bf16 %v49_v4, %v48_v2  ;;  %v8508_v8 = vld [vmem:[%s10080_s0] sm:$0xff]  ;;  %v52_v9 = vld [vmem:[%s10082_s2 + $0x30] sm:$0xff]  ;;  %v53_v10 = vld [vmem:[%s10082_s2 + $0x38] sm:$0xff]  ;;  %v7902_v14 = vpack.c.bf16 %v51_v6, %v50_v5 }
   0x4   :  { %7895 = vmatprep.subr.bf16.mxu0 %v7894_v3  ;;  %6905 = vmatprep.mubr.msk.f32.mxu0 %vm142_vm0, %v8508_v8  ;;  %v7906_v11 = vpack.c.bf16 %v53_v10, %v52_v9  ;;  %v54_v12 = vld [vmem:[%s10082_s2 + $0x40] sm:$0xff]  ;;  %v55_v13 = vld [vmem:[%s10082_s2 + $0x48] sm:$0xff]  ;;  %v56_v16 = vld [vmem:[%s10082_s2 + $0x50] sm:$0xff] }
   0x5   :  { %7897 = vmatpush3.bf16.msra.mxu0 %v7894_v3  ;;  %6926 = vmatprep.mubr.msk.f32.mxu1 %vm142_vm0, %v8508_v8  ;;  %v7910_v15 = vpack.c.bf16 %v55_v13, %v54_v12  ;;  %v57_v17 = vld [vmem:[%s10082_s2 + $0x58] sm:$0xff]  ;;  %v58_v18 = vld [vmem:[%s10082_s2 + $0x60] sm:$0xff]  ;;  %v59_v19 = vld [vmem:[%s10082_s2 + $0x68] sm:$0xff] }
   0x6   :  { %7899 = vmatprep.subr.bf16.mxu0 %v7898_v7  ;;  %7907 = vmatprep.subr.bf16.mxu1 %v7906_v11  ;;  %v7914_v20 = vpack.c.bf16 %v57_v17, %v56_v16  ;;  %v64_v21 = vld [vmem:[%s10082_s2 + $0x90] sm:$0xff]  ;;  %v65_v22 = vld [vmem:[%s10082_s2 + $0x98] sm:$0xff]  ;;  %v7918_v23 = vpack.c.bf16 %v59_v19, %v58_v18  ;;  %v8553_v27 = vld [vmem:[%s10080_s0 + $0x8] sm:$0xff] }
   0x7   :  { %7909 = vmatpush3.bf16.msra.mxu1 %v7906_v11  ;;  %v60_v24 = vld [vmem:[%s10082_s2 + $0x70] sm:$0xff]  ;;  %v61_v25 = vld [vmem:[%s10082_s2 + $0x78] sm:$0xff]  ;;  %v7930_v26 = vpack.c.bf16 %v65_v22, %v64_v21  ;;  %v66_v28 = vld [vmem:[%s10082_s2 + $0xa0] sm:$0xff] }
   0x8   :  { %7911 = vmatprep.subr.bf16.mxu1 %v7910_v15  ;;  %v67_v29 = vld [vmem:[%s10082_s2 + $0xa8] sm:$0xff]  ;;  %v8564_v30 = vld [vmem:[%s10080_s0 + $0x10] sm:$0xff]  ;;  %v7922_v31 = vpack.c.bf16 %v61_v25, %v60_v24  ;;  %v62_v32 = vld [vmem:[%s10082_s2 + $0x80] sm:$0xff] }
   0x9   :  { %7901 = vmatpush3.bf16.msra.mxu0 %v7898_v7  ;;  %v63_v33 = vld [vmem:[%s10082_s2 + $0x88] sm:$0xff]  ;;  %v7934_v34 = vpack.c.bf16 %v67_v29, %v66_v28  ;;  %v8579_v35 = vld [vmem:[%s10080_s0 + $0x18] sm:$0xff]  ;;  %v68_v36 = vld [vmem:[%s10082_s2 + $0xb0] sm:$0xff] }
   0xa   :  { %7903 = vmatprep.subr.bf16.mxu0 %v7902_v14  ;;  %v69_v37 = vld [vmem:[%s10082_s2 + $0xb8] sm:$0xff]  ;;  %v8590_v38 = vld [vmem:[%s10080_s0 + $0x20] sm:$0xff]  ;;  %v7926_v39 = vpack.c.bf16 %v63_v33, %v62_v32  ;;  %v71_v41 = vld [vmem:[%s10082_s2 + $0xc8] sm:$0xff] }
   0xb   :  { %7913 = vmatpush3.bf16.msra.mxu1 %v7910_v15  ;;  %v70_v40 = vld [vmem:[%s10082_s2 + $0xc0] sm:$0xff]  ;;  %v7938_v42 = vpack.c.bf16 %v69_v37, %v68_v36  ;;  %v8609_v43 = vld [vmem:[%s10080_s0 + $0x28] sm:$0xff]  ;;  %v76_v44 = vld [vmem:[%s10082_s2 + $0xf0] sm:$0xff] }
   0xc   :  { %7915 = vmatprep.subr.bf16.mxu1 %v7914_v20  ;;  %v77_v45 = vld [vmem:[%s10082_s2 + $0xf8] sm:$0xff]  ;;  %v7942_v46 = vpack.c.bf16 %v71_v41, %v70_v40  ;;  %v72_v47 = vld [vmem:[%s10082_s2 + $0xd0] sm:$0xff]  ;;  %v78_v50 = vld [vmem:[%s10082_s2 + $0x100] sm:$0xff] }
   0xd   :  { %7905 = vmatpush3.bf16.msra.mxu0 %v7902_v14  ;;  %v73_v48 = vld [vmem:[%s10082_s2 + $0xd8] sm:$0xff]  ;;  %v7954_v49 = vpack.c.bf16 %v77_v45, %v76_v44  ;;  %v79_v51 = vld [vmem:[%s10082_s2 + $0x108] sm:$0xff]  ;;  %v74_v53 = vld [vmem:[%s10082_s2 + $0xe0] sm:$0xff] }
   0xe   :  { %7919 = vmatprep.subr.bf16.mxu0 %v7918_v23  ;;  %v7946_v52 = vpack.c.bf16 %v73_v48, %v72_v47  ;;  %v75_v54 = vld [vmem:[%s10082_s2 + $0xe8] sm:$0xff]  ;;  %v7958_v55 = vpack.c.bf16 %v79_v51, %v78_v50  ;;  %v80_v56 = vld [vmem:[%s10082_s2 + $0x110] sm:$0xff]  ;;  %v81_v57 = vld [vmem:[%s10082_s2 + $0x118] sm:$0xff] }
   0xf   :  { %7917 = vmatpush3.bf16.msra.mxu1 %v7914_v20  ;;  %v7950_v58 = vpack.c.bf16 %v75_v54, %v74_v53  ;;  %v82_v59 = vld [vmem:[%s10082_s2 + $0x120] sm:$0xff]  ;;  %v83_v60 = vld [vmem:[%s10082_s2 + $0x128] sm:$0xff]  ;;  %v7962_v61 = vpack.c.bf16 %v81_v57, %v80_v56  ;;  %v88_v62 = vld [vmem:[%s10082_s2 + $0x150] sm:$0xff] }
  0x10   :  { %6906 = vmatmul.mubr.msk.f32.vlgmr.msra.gmra.mrb[0].mxu0 %vm142_vm0, %v8553_v27  ;;  %7931 = vmatprep.subr.bf16.mxu1 %v7930_v26  ;;  %v89_v63 = vld [vmem:[%s10082_s2 + $0x158] sm:$0xff]  ;;  %v7966_v0 = vpack.c.bf16 %v83_v60, %v82_v59  ;;  %v84_v1 = vld [vmem:[%s10082_s2 + $0x130] sm:$0xff] }
  0x11   :  { %6908 = vmatprep.mubr.msk.f32.mxu0 %vm142_vm0, %v8564_v30  ;;  %7921 = vmatpush3.bf16.msra.mxu0 %v7918_v23  ;;  %v85_v2 = vld [vmem:[%s10082_s2 + $0x138] sm:$0xff]  ;;  %v7978_v3 = vpack.c.bf16 %v89_v63, %v88_v62 }
  0x12   :  { %6927 = vmatmul.mubr.msk.f32.vlgmr.msra.gmra.mrb[0].mxu1 %vm142_vm0, %v8553_v27  ;;  %7923 = vmatprep.subr.bf16.mxu0 %v7922_v31 }
  0x13   :  { %6929 = vmatprep.mubr.msk.f32.mxu1 %vm142_vm0, %v8564_v30  ;;  %7933 = vmatpush3.bf16.msra.mxu1 %v7930_v26 }
  0x14   :  { %6909 = vmatmul.mubr.msk.f32.gmra.mrb[2].mxu0 %vm142_vm0, %v8579_v35  ;;  %7935 = vmatprep.subr.bf16.mxu1 %v7934_v34 }
  0x15   :  { %6911 = vmatprep.mubr.msk.f32.mxu0 %vm142_vm0, %v8590_v38  ;;  %7925 = vmatpush3.bf16.msra.mxu0 %v7922_v31 }
  0x16   :  { %6930 = vmatmul.mubr.msk.f32.gmra.mrb[2].mxu1 %vm142_vm0, %v8579_v35  ;;  %7927 = vmatprep.subr.bf16.mxu0 %v7926_v39 }
  0x17   :  { %6932 = vmatprep.mubr.msk.f32.mxu1 %vm142_vm0, %v8590_v38  ;;  %7937 = vmatpush3.bf16.msra.mxu1 %v7934_v34 }
  0x18   :  { %6912 = vmatmul.mubr.msk.f32.gmra.mrb[4].mxu0 %vm142_vm0, %v8609_v43  ;;  %7939 = vmatprep.subr.bf16.mxu1 %v7938_v42 }
  0x19   :  { %7929 = vmatpush3.bf16.msra.mxu0 %v7926_v39  ;;  %6947 = vmatprep.mubr.msk.f32.mxu0 %vm142_vm0, %v8508_v8 }
  0x1a   :  { %6933 = vmatmul.mubr.msk.f32.gmra.mrb[4].mxu1 %vm142_vm0, %v8609_v43  ;;  %7943 = vmatprep.subr.bf16.mxu0 %v7942_v46 }
  0x1b   :  { %7941 = vmatpush3.bf16.msra.mxu1 %v7938_v42  ;;  %6968 = vmatprep.mubr.msk.f32.mxu1 %vm142_vm0, %v8508_v8 }
  0x1c   :  { %6948 = vmatmul.mubr.msk.f32.vlgmr.msra.gmra.mrb[6].mxu0 %vm142_vm0, %v8553_v27  ;;  %7955 = vmatprep.subr.bf16.mxu1 %v7954_v49 }
  0x1d   :  { %6950 = vmatprep.mubr.msk.f32.mxu0 %vm142_vm0, %v8564_v30  ;;  %7945 = vmatpush3.bf16.msra.mxu0 %v7942_v46 }
  0x1e   :  { %6969 = vmatmul.mubr.msk.f32.vlgmr.msra.gmra.mrb[6].mxu1 %vm142_vm0, %v8553_v27  ;;  %7947 = vmatprep.subr.bf16.mxu0 %v7946_v52 }
  0x1f   :  { %6971 = vmatprep.mubr.msk.f32.mxu1 %vm142_vm0, %v8564_v30  ;;  %7957 = vmatpush3.bf16.msra.mxu1 %v7954_v49 }
  0x20   :  { %6951 = vmatmul.mubr.msk.f32.gmra.mrb[8].mxu0 %vm142_vm0, %v8579_v35  ;;  %7959 = vmatprep.subr.bf16.mxu1 %v7958_v55 }
  0x21   :  { %6953 = vmatprep.mubr.msk.f32.mxu0 %vm142_vm0, %v8590_v38  ;;  %7949 = vmatpush3.bf16.msra.mxu0 %v7946_v52 }
  0x22   :  { %6972 = vmatmul.mubr.msk.f32.gmra.mrb[8].mxu1 %vm142_vm0, %v8579_v35  ;;  %7951 = vmatprep.subr.bf16.mxu0 %v7950_v58 }
  0x23   :  { %6974 = vmatprep.mubr.msk.f32.mxu1 %vm142_vm0, %v8590_v38  ;;  %7961 = vmatpush3.bf16.msra.mxu1 %v7958_v55 }
  0x24   :  { %6954 = vmatmul.mubr.msk.f32.gmra.mrb[10].mxu0 %vm142_vm0, %v8609_v43  ;;  %7963 = vmatprep.subr.bf16.mxu1 %v7962_v61 }
  0x25   :  { %9 = vsyncpa [#allocation3], 0  ;;  %7953 = vmatpush3.bf16.msra.mxu0 %v7950_v58  ;;  %6989 = vmatprep.mubr.msk.f32.mxu0 %vm142_vm0, %v8508_v8  ;;  %v90_v4 = vld [vmem:[%s10082_s2 + $0x160] sm:$0xff]  ;;  %v91_v5 = vld [vmem:[%s10082_s2 + $0x168] sm:$0xff]  ;;  %v7970_v6 = vpack.c.bf16 %v85_v2, %v84_v1  ;;  %vm1685_vm1 = vcmask 195584   ;;  %s8459_s22 = smov [#allocation2]  }
  0x26   :  { %6975 = vmatmul.mubr.msk.f32.gmra.mrb[10].mxu1 %vm142_vm0, %v8609_v43  ;;  %7967 = vmatprep.subr.bf16.mxu0 %v7966_v0  ;;  %v86_v7 = vld [vmem:[%s10082_s2 + $0x140] sm:$0xff]  ;;  %v87_v9 = vld [vmem:[%s10082_s2 + $0x148] sm:$0xff]  ;;  %v7982_v10 = vpack.c.bf16 %v91_v5, %v90_v4  ;;  %v92_v11 = vld [vmem:[%s10082_s2 + $0x170] sm:$0xff]  ;;  %s5782_s23 = sshll.u32 %s8459_s22, 4  ;;  %s5783_s23 = int_to_ptr.vmem [resolvable:$true] %s5782_s23 }
  0x27   :  { %7965 = vmatpush3.bf16.msra.mxu1 %v7962_v61  ;;  %7010 = vmatprep.mubr.msk.f32.mxu1 %vm142_vm0, %v8508_v8  ;;  %v93_v12 = vld [vmem:[%s10082_s2 + $0x178] sm:$0xff]  ;;  %v7974_v13 = vpack.c.bf16 %v87_v9, %v86_v7  ;;  %v94_v14 = vld [vmem:[%s10082_s2 + $0x180] sm:$0xff]  ;;  %v95_v15 = vld [vmem:[%s10082_s2 + $0x188] sm:$0xff]  ;;  %s8435_s24 = scalar_lea.vmem %s5783_s23, 256  ;;  %p8440_p1 = scmp.lt.s32.totalorder %s5783_s23, %s5783_s23 }
  0x28   :  { %6990 = vmatmul.mubr.msk.f32.vlgmr.msra.gmra.mrb[12].mxu0 %vm142_vm0, %v8553_v27  ;;  %7979 = vmatprep.subr.bf16.mxu1 %v7978_v3  ;;  %v7986_v16 = vpack.c.bf16 %v93_v12, %v92_v11  ;;  %v100_v17 = vld [vmem:[%s10082_s2 + $0x1b0] sm:$0xff]  ;;  %v101_v18 = vld [vmem:[%s10082_s2 + $0x1b8] sm:$0xff]  ;;  %v7990_v19 = vpack.c.bf16 %v95_v15, %v94_v14  ;;  %v102_v23 = vld [vmem:[%s10082_s2 + $0x1c0] sm:$0xff]  ;;  %p8436_p0 = scmp.ne.s32.totalorder %s5783_s23, %s8435_s24  ;;  %p8441_p2 = scmp.lt.s32.totalorder %s8435_s24, %s8435_s24 }
  0x29   :  { %6992 = vmatprep.mubr.msk.f32.mxu0 %vm142_vm0, %v8564_v30  ;;  %7969 = vmatpush3.bf16.msra.mxu0 %v7966_v0  ;;  %v96_v20 = vld [vmem:[%s10082_s2 + $0x190] sm:$0xff]  ;;  %v97_v21 = vld [vmem:[%s10082_s2 + $0x198] sm:$0xff]  ;;  %v8002_v22 = vpack.c.bf16 %v101_v18, %v100_v17  ;;  %v103_v24 = vld [vmem:[%s10082_s2 + $0x1c8] sm:$0xff] }
  0x2a   :  { %7011 = vmatmul.mubr.msk.f32.vlgmr.msra.gmra.mrb[12].mxu1 %vm142_vm0, %v8553_v27  ;;  %7971 = vmatprep.subr.bf16.mxu0 %v7970_v6  ;;  %v7994_v25 = vpack.c.bf16 %v97_v21, %v96_v20  ;;  %v98_v26 = vld [vmem:[%s10082_s2 + $0x1a0] sm:$0xff]  ;;  %v99_v28 = vld [vmem:[%s10082_s2 + $0x1a8] sm:$0xff]  ;;  %v8006_v29 = vpack.c.bf16 %v103_v24, %v102_v23  ;;  %v104_v31 = vld [vmem:[%s10082_s2 + $0x1d0] sm:$0xff]  ;;  %p8442_p3 = por %p8441_p2, %p8440_p1 }
  0x2b   :  { %7013 = vmatprep.mubr.msk.f32.mxu1 %vm142_vm0, %v8564_v30  ;;  %7981 = vmatpush3.bf16.msra.mxu1 %v7978_v3  ;;  %v105_v32 = vld [vmem:[%s10082_s2 + $0x1d8] sm:$0xff]  ;;  %v7998_v33 = vpack.c.bf16 %v99_v28, %v98_v26  ;;  %v106_v34 = vld [vmem:[%s10082_s2 + $0x1e0] sm:$0xff]  ;;  %v107_v36 = vld [vmem:[%s10082_s2 + $0x1e8] sm:$0xff] }
  0x2c   :  { %6993 = vmatmul.mubr.msk.f32.gmra.mrb[14].mxu0 %vm142_vm0, %v8579_v35  ;;  %7983 = vmatprep.subr.bf16.mxu1 %v7982_v10  ;;  %v8010_v37 = vpack.c.bf16 %v105_v32, %v104_v31  ;;  %v112_v39 = vld [vmem:[%s10082_s2 + $0x210] sm:$0xff]  ;;  %v113_v40 = vld [vmem:[%s10082_s2 + $0x218] sm:$0xff]  ;;  %v8014_v41 = vpack.c.bf16 %v107_v36, %v106_v34  ;;  %v114_v46 = vld [vmem:[%s10082_s2 + $0x220] sm:$0xff]  ;;  %p8443_p4 = pnand %p8442_p3, %p8436_p0 }
  0x2d   :  { %6995 = vmatprep.mubr.msk.f32.mxu0 %vm142_vm0, %v8590_v38  ;;  %7973 = vmatpush3.bf16.msra.mxu0 %v7970_v6  ;;  %v108_v42 = vld [vmem:[%s10082_s2 + $0x1f0] sm:$0xff]  ;;  %v109_v44 = vld [vmem:[%s10082_s2 + $0x1f8] sm:$0xff]  ;;  %v8026_v45 = vpack.c.bf16 %v113_v40, %v112_v39  ;;  %v115_v47 = vld [vmem:[%s10082_s2 + $0x228] sm:$0xff] }
  0x2e   :  { %7014 = vmatmul.mubr.msk.f32.gmra.mrb[14].mxu1 %vm142_vm0, %v8579_v35  ;;  %7975 = vmatprep.subr.bf16.mxu0 %v7974_v13  ;;  %v8018_v48 = vpack.c.bf16 %v109_v44, %v108_v42  ;;  %v110_v49 = vld [vmem:[%s10082_s2 + $0x200] sm:$0xff]  ;;  %v111_v50 = vld [vmem:[%s10082_s2 + $0x208] sm:$0xff]  ;;  %v8030_v51 = vpack.c.bf16 %v115_v47, %v114_v46  ;;  %v116_v52 = vld [vmem:[%s10082_s2 + $0x230] sm:$0xff] }
  0x2f   :  { %7016 = vmatprep.mubr.msk.f32.mxu1 %vm142_vm0, %v8590_v38  ;;  %7985 = vmatpush3.bf16.msra.mxu1 %v7982_v10  ;;  %v117_v53 = vld [vmem:[%s10082_s2 + $0x238] sm:$0xff]  ;;  %v8022_v54 = vpack.c.bf16 %v111_v50, %v110_v49  ;;  %v118_v55 = vld [vmem:[%s10082_s2 + $0x240] sm:$0xff]  ;;  %v119_v56 = vld [vmem:[%s10082_s2 + $0x248] sm:$0xff] }
  0x30   :  { %6996 = vmatmul.mubr.msk.f32.gmra.mrb[16].mxu0 %vm142_vm0, %v8609_v43  ;;  %7987 = vmatprep.subr.bf16.mxu1 %v7986_v16  ;;  %v8034_v57 = vpack.c.bf16 %v117_v53, %v116_v52  ;;  %v124_v58 = vld [vmem:[%s10082_s2 + $0x270] sm:$0xff]  ;;  %v125_v59 = vld [vmem:[%s10082_s2 + $0x278] sm:$0xff]  ;;  %v8038_v60 = vpack.c.bf16 %v119_v56, %v118_v55  ;;  %v126_v0 = vld [vmem:[%s10082_s2 + $0x280] sm:$0xff] }
  0x31   :  { %7977 = vmatpush3.bf16.msra.mxu0 %v7974_v13  ;;  %7031 = vmatprep.mubr.msk.f32.mxu0 %vm142_vm0, %v8508_v8  ;;  %v120_v61 = vld [vmem:[%s10082_s2 + $0x250] sm:$0xff]  ;;  %v121_v62 = vld [vmem:[%s10082_s2 + $0x258] sm:$0xff]  ;;  %v8050_v63 = vpack.c.bf16 %v125_v59, %v124_v58  ;;  %v127_v1 = vld [vmem:[%s10082_s2 + $0x288] sm:$0xff] }
  0x32   :  { %7017 = vmatmul.mubr.msk.f32.gmra.mrb[16].mxu1 %vm142_vm0, %v8609_v43  ;;  %7991 = vmatprep.subr.bf16.mxu0 %v7990_v19  ;;  %v8042_v2 = vpack.c.bf16 %v121_v62, %v120_v61  ;;  %v122_v3 = vld [vmem:[%s10082_s2 + $0x260] sm:$0xff]  ;;  %v123_v4 = vld [vmem:[%s10082_s2 + $0x268] sm:$0xff]  ;;  %v8054_v5 = vpack.c.bf16 %v127_v1, %v126_v0  ;;  %v128_v6 = vld [vmem:[%s10082_s2 + $0x290] sm:$0xff] }
  0x33   :  { %7989 = vmatpush3.bf16.msra.mxu1 %v7986_v16  ;;  %7052 = vmatprep.mubr.msk.f32.mxu1 %vm142_vm0, %v8508_v8  ;;  %v129_v7 = vld [vmem:[%s10082_s2 + $0x298] sm:$0xff]  ;;  %v8046_v9 = vpack.c.bf16 %v123_v4, %v122_v3  ;;  %v130_v10 = vld [vmem:[%s10082_s2 + $0x2a0] sm:$0xff]  ;;  %v131_v11 = vld [vmem:[%s10082_s2 + $0x2a8] sm:$0xff] }
  0x34   :  { %7032 = vmatmul.mubr.msk.f32.vlgmr.msra.gmra.mrb[18].mxu0 %vm142_vm0, %v8553_v27  ;;  %8003 = vmatprep.subr.bf16.mxu1 %v8002_v22  ;;  %v8058_v12 = vpack.c.bf16 %v129_v7, %v128_v6  ;;  %v136_v13 = vld [vmem:[%s10082_s2 + $0x2d0] sm:$0xff]  ;;  %v137_v14 = vld [vmem:[%s10082_s2 + $0x2d8] sm:$0xff]  ;;  %v8062_v15 = vpack.c.bf16 %v131_v11, %v130_v10  ;;  %v139_v20 = vld [vmem:[%s10082_s2 + $0x2e8] sm:$0xff] }
  0x35   :  { %7034 = vmatprep.mubr.msk.f32.mxu0 %vm142_vm0, %v8564_v30  ;;  %7993 = vmatpush3.bf16.msra.mxu0 %v7990_v19  ;;  %v132_v16 = vld [vmem:[%s10082_s2 + $0x2b0] sm:$0xff]  ;;  %v133_v17 = vld [vmem:[%s10082_s2 + $0x2b8] sm:$0xff]  ;;  %v8074_v18 = vpack.c.bf16 %v137_v14, %v136_v13  ;;  %v138_v19 = vld [vmem:[%s10082_s2 + $0x2e0] sm:$0xff] }
  0x36   :  { %7053 = vmatmul.mubr.msk.f32.vlgmr.msra.gmra.mrb[18].mxu1 %vm142_vm0, %v8553_v27  ;;  %7995 = vmatprep.subr.bf16.mxu0 %v7994_v25  ;;  %v8066_v21 = vpack.c.bf16 %v133_v17, %v132_v16  ;;  %v135_v23 = vld [vmem:[%s10082_s2 + $0x2c8] sm:$0xff]  ;;  %v8078_v24 = vpack.c.bf16 %v139_v20, %v138_v19  ;;  %v141_v26 = vld [vmem:[%s10082_s2 + $0x2f8] sm:$0xff]  ;;  %v20_v34 = vld [vmem:[%s10083_s3 + $0x10] sm:$0xff] }
  0x37   :  { %7055 = vmatprep.mubr.msk.f32.mxu1 %vm142_vm0, %v8564_v30  ;;  %8005 = vmatpush3.bf16.msra.mxu1 %v8002_v22  ;;  %v134_v22 = vld [vmem:[%s10082_s2 + $0x2c0] sm:$0xff]  ;;  %v19_v31 = vld [vmem:[%s10083_s3 + $0x8] sm:$0xff] }
  0x38   :  { %7035 = vmatmul.mubr.msk.f32.gmra.mrb[20].mxu0 %vm142_vm0, %v8579_v35  ;;  %8007 = vmatprep.subr.bf16.mxu1 %v8006_v29  ;;  %v8070_v28 = vpack.c.bf16 %v135_v23, %v134_v22 }
  0x39   :  { %7037 = vmatprep.mubr.msk.f32.mxu0 %vm142_vm0, %v8590_v38  ;;  %7997 = vmatpush3.bf16.msra.mxu0 %v7994_v25  ;;  %v140_v25 = vld [vmem:[%s10082_s2 + $0x2f0] sm:$0xff] }
  0x3a   :  { %7056 = vmatmul.mubr.msk.f32.gmra.mrb[20].mxu1 %vm142_vm0, %v8579_v35  ;;  %7999 = vmatprep.subr.bf16.mxu0 %v7998_v33  ;;  %v8082_v32 = vpack.c.bf16 %v141_v26, %v140_v25 }
  0x3b   :  { %7058 = vmatprep.mubr.msk.f32.mxu1 %vm142_vm0, %v8590_v38  ;;  %8009 = vmatpush3.bf16.msra.mxu1 %v8006_v29  ;;  %v18_v29 = vld [vmem:[%s10083_s3] sm:$0xff] }
  0x3c   :  { %7038 = vmatmul.mubr.msk.f32.gmra.mrb[22].mxu0 %vm142_vm0, %v8609_v43  ;;  %8011 = vmatprep.subr.bf16.mxu1 %v8010_v37 }
  0x3d   :  { %8001 = vmatpush3.bf16.msra.mxu0 %v7998_v33  ;;  %7073 = vmatprep.mubr.msk.f32.mxu0 %vm142_vm0, %v8508_v8  ;;  %v8086_v33 = vpack.c.bf16 %v19_v31, %v18_v29 }
  0x3e   :  { %7059 = vmatmul.mubr.msk.f32.gmra.mrb[22].mxu1 %vm142_vm0, %v8609_v43  ;;  %8015 = vmatprep.subr.bf16.mxu0 %v8014_v41 }
  0x3f   :  { %8013 = vmatpush3.bf16.msra.mxu1 %v8010_v37  ;;  %7094 = vmatprep.mubr.msk.f32.mxu1 %vm142_vm0, %v8508_v8 }
  0x40   :  { %7074 = vmatmul.mubr.msk.f32.vlgmr.msra.gmra.mrb[24].mxu0 %vm142_vm0, %v8553_v27  ;;  %8027 = vmatprep.subr.bf16.mxu1 %v8026_v45 }
  0x41   :  { %7076 = vmatprep.mubr.msk.f32.mxu0 %vm142_vm0, %v8564_v30  ;;  %8017 = vmatpush3.bf16.msra.mxu0 %v8014_v41 }
  0x42   :  { %7095 = vmatmul.mubr.msk.f32.vlgmr.msra.gmra.mrb[24].mxu1 %vm142_vm0, %v8553_v27  ;;  %8019 = vmatprep.subr.bf16.mxu0 %v8018_v48 }
  0x43   :  { %7097 = vmatprep.mubr.msk.f32.mxu1 %vm142_vm0, %v8564_v30  ;;  %8029 = vmatpush3.bf16.msra.mxu1 %v8026_v45 }
  0x44   :  { %7077 = vmatmul.mubr.msk.f32.gmra.mrb[26].mxu0 %vm142_vm0, %v8579_v35  ;;  %8031 = vmatprep.subr.bf16.mxu1 %v8030_v51 }
  0x45   :  { %7079 = vmatprep.mubr.msk.f32.mxu0 %vm142_vm0, %v8590_v38  ;;  %8021 = vmatpush3.bf16.msra.mxu0 %v8018_v48 }
  0x46   :  { %7098 = vmatmul.mubr.msk.f32.gmra.mrb[26].mxu1 %vm142_vm0, %v8579_v35  ;;  %8023 = vmatprep.subr.bf16.mxu0 %v8022_v54 }
  0x47   :  { %7100 = vmatprep.mubr.msk.f32.mxu1 %vm142_vm0, %v8590_v38  ;;  %8033 = vmatpush3.bf16.msra.mxu1 %v8030_v51 }
  0x48   :  { %7080 = vmatmul.mubr.msk.f32.gmra.mrb[28].mxu0 %vm142_vm0, %v8609_v43  ;;  %8035 = vmatprep.subr.bf16.mxu1 %v8034_v57 }
  0x49   :  { %8025 = vmatpush3.bf16.msra.mxu0 %v8022_v54  ;;  %7115 = vmatprep.mubr.msk.f32.mxu0 %vm142_vm0, %v8508_v8 }
  0x4a   :  { %7101 = vmatmul.mubr.msk.f32.gmra.mrb[28].mxu1 %vm142_vm0, %v8609_v43  ;;  %8039 = vmatprep.subr.bf16.mxu0 %v8038_v60 }
  0x4b   :  { %8037 = vmatpush3.bf16.msra.mxu1 %v8034_v57  ;;  %7136 = vmatprep.mubr.msk.f32.mxu1 %vm142_vm0, %v8508_v8 }
  0x4c   :  { %7116 = vmatmul.mubr.msk.f32.vlgmr.msra.gmra.mrb[30].mxu0 %vm142_vm0, %v8553_v27  ;;  %8051 = vmatprep.subr.bf16.mxu1 %v8050_v63 }
  0x4d   :  { %7118 = vmatprep.mubr.msk.f32.mxu0 %vm142_vm0, %v8564_v30  ;;  %8041 = vmatpush3.bf16.msra.mxu0 %v8038_v60 }
  0x4e   :  { %7137 = vmatmul.mubr.msk.f32.vlgmr.msra.gmra.mrb[30].mxu1 %vm142_vm0, %v8553_v27  ;;  %8043 = vmatprep.subr.bf16.mxu0 %v8042_v2 }
  0x4f   :  { %7139 = vmatprep.mubr.msk.f32.mxu1 %vm142_vm0, %v8564_v30  ;;  %8053 = vmatpush3.bf16.msra.mxu1 %v8050_v63 }
  0x50   :  { %7119 = vmatmul.mubr.msk.f32.gmra.mrb[32].mxu0 %vm142_vm0, %v8579_v35  ;;  %8055 = vmatprep.subr.bf16.mxu1 %v8054_v5 }
  0x51   :  { %7121 = vmatprep.mubr.msk.f32.mxu0 %vm142_vm0, %v8590_v38  ;;  %8045 = vmatpush3.bf16.msra.mxu0 %v8042_v2 }
  0x52   :  { %7140 = vmatmul.mubr.msk.f32.gmra.mrb[32].mxu1 %vm142_vm0, %v8579_v35  ;;  %8047 = vmatprep.subr.bf16.mxu0 %v8046_v9 }
  0x53   :  { %7142 = vmatprep.mubr.msk.f32.mxu1 %vm142_vm0, %v8590_v38  ;;  %8057 = vmatpush3.bf16.msra.mxu1 %v8054_v5 }
  0x54   :  { %7122 = vmatmul.mubr.msk.f32.gmra.mrb[34].mxu0 %vm142_vm0, %v8609_v43  ;;  %8059 = vmatprep.subr.bf16.mxu1 %v8058_v12 }
  0x55   :  { %8049 = vmatpush3.bf16.msra.mxu0 %v8046_v9  ;;  %7157 = vmatprep.mubr.msk.f32.mxu0 %vm142_vm0, %v8508_v8 }
  0x56   :  { %7143 = vmatmul.mubr.msk.f32.gmra.mrb[34].mxu1 %vm142_vm0, %v8609_v43  ;;  %8063 = vmatprep.subr.bf16.mxu0 %v8062_v15 }
  0x57   :  { %8061 = vmatpush3.bf16.msra.mxu1 %v8058_v12  ;;  %7178 = vmatprep.mubr.msk.f32.mxu1 %vm142_vm0, %v8508_v8 }
  0x58   :  { %7158 = vmatmul.mubr.msk.f32.vlgmr.msra.gmra.mrb[36].mxu0 %vm142_vm0, %v8553_v27  ;;  %8075 = vmatprep.subr.bf16.mxu1 %v8074_v18 }
  0x59   :  { %7160 = vmatprep.mubr.msk.f32.mxu0 %vm142_vm0, %v8564_v30  ;;  %8065 = vmatpush3.bf16.msra.mxu0 %v8062_v15 }
  0x5a   :  { %7179 = vmatmul.mubr.msk.f32.vlgmr.msra.gmra.mrb[36].mxu1 %vm142_vm0, %v8553_v27  ;;  %8067 = vmatprep.subr.bf16.mxu0 %v8066_v21 }
  0x5b   :  { %7181 = vmatprep.mubr.msk.f32.mxu1 %vm142_vm0, %v8564_v30  ;;  %8077 = vmatpush3.bf16.msra.mxu1 %v8074_v18 }
  0x5c   :  { %7161 = vmatmul.mubr.msk.f32.gmra.mrb[38].mxu0 %vm142_vm0, %v8579_v35  ;;  %8079 = vmatprep.subr.bf16.mxu1 %v8078_v24 }
  0x5d   :  { %7163 = vmatprep.mubr.msk.f32.mxu0 %vm142_vm0, %v8590_v38  ;;  %8069 = vmatpush3.bf16.msra.mxu0 %v8066_v21 }
  0x5e   :  { %7182 = vmatmul.mubr.msk.f32.gmra.mrb[38].mxu1 %vm142_vm0, %v8579_v35  ;;  %8071 = vmatprep.subr.bf16.mxu0 %v8070_v28 }
  0x5f   :  { %7184 = vmatprep.mubr.msk.f32.mxu1 %vm142_vm0, %v8590_v38  ;;  %8081 = vmatpush3.bf16.msra.mxu1 %v8078_v24 }
  0x60   :  { %7164 = vmatmul.mubr.msk.f32.gmra.mrb[40].mxu0 %vm142_vm0, %v8609_v43  ;;  %8083 = vmatprep.subr.bf16.mxu1 %v8082_v32 }
  0x61   :  { %8073 = vmatpush3.bf16.msra.mxu0 %v8070_v28  ;;  %7199 = vmatprep.mubr.msk.f32.mxu0 %vm142_vm0, %v8508_v8 }
  0x62   :  { %7185 = vmatmul.mubr.msk.f32.gmra.mrb[40].mxu1 %vm142_vm0, %v8609_v43  ;;  %8087 = vmatprep.subr.bf16.mxu0 %v8086_v33 }
  0x63   :  { %8085 = vmatpush3.bf16.msra.mxu1 %v8082_v32  ;;  %7220 = vmatprep.mubr.msk.f32.mxu1 %vm142_vm0, %v8508_v8 }
  0x64   :  { %7200 = vmatmul.mubr.msk.f32.vlgmr.msra.gmra.mrb[42].mxu0 %vm142_vm0, %v8553_v27 }
  0x65   :  { %7202 = vmatprep.mubr.msk.f32.mxu0 %vm142_vm0, %v8564_v30  ;;  %8089 = vmatpush3.bf16.msra.mxu0 %v8086_v33 }
  0x66   :  { %7221 = vmatmul.mubr.msk.f32.vlgmr.msra.gmra.mrb[42].mxu1 %vm142_vm0, %v8553_v27  ;;  %7233 = vmatprep.subr.mxu0 %v20_v34 }
  0x67   :  { %7223 = vmatprep.mubr.msk.f32.mxu1 %vm142_vm0, %v8564_v30 }
  0x68   :  { %7203 = vmatmul.mubr.msk.f32.gmra.mrb[44].mxu0 %vm142_vm0, %v8579_v35 }
  0x69   :  { %7205 = vmatprep.mubr.msk.f32.mxu0 %vm142_vm0, %v8590_v38  ;;  %7234 = vmatpush3.msra.mxu0 %v20_v34 }
  0x6a   :  { %7224 = vmatmul.mubr.msk.f32.gmra.mrb[44].mxu1 %vm142_vm0, %v8579_v35 }
  0x6b   :  { %7226 = vmatprep.mubr.msk.f32.mxu1 %vm142_vm0, %v8590_v38 }
  0x6c   :  { %7206 = vmatmul.mubr.msk.f32.gmra.mrb[46].mxu0 %vm142_vm0, %v8609_v43 }
  0x6e   :  { %7227 = vmatmul.mubr.msk.f32.gmra.mrb[46].mxu1 %vm142_vm0, %v8609_v43 }
  0x6f   :  { %7391 = vmatprep.mubr.msk.f32.mxu1 %vm142_vm0, %v8508_v8 }
  0xe3   :  { %v6907_v27 = vpop.f32.mrb[0].mxu0 }
  0xe4   :  { %v227_v30 = vpop.f32.mrb[1].mxu0 }
  0xe5   :  { %7235 = vmatprep.mubr.msk.f32.mxu0 %vm1685_vm1, %v227_v30  ;;  %v6928_v36 = vpop.f32.mrb[0].mxu1 }
  0xe6   :  { %7236 = vmatmul.mubr.msk.f32.vlgmr.msra.gmra.mrb[48].mxu0 %vm1685_vm1, %v6907_v27  ;;  %v322_v35 = vpop.f32.mrb[1].mxu1 }
  0xe7   :  { %v6910_v37 = vpop.f32.mrb[2].mxu0 }
  0xe8   :  { %v237_v38 = vpop.f32.mrb[3].mxu0 }
  0xe9   :  { %7238 = vmatprep.mubr.msk.f32.mxu0 %vm1685_vm1, %v237_v38  ;;  %v6931_v39 = vpop.f32.mrb[2].mxu1 }
  0xea   :  { %7239 = vmatmul.mubr.msk.f32.gmra.mrb[50].mxu0 %vm1685_vm1, %v6910_v37  ;;  %v332_v43 = vpop.f32.mrb[3].mxu1 }
  0xeb   :  { %v6913_v40 = vpop.f32.mrb[4].mxu0 }
  0xec   :  { %v247_v41 = vpop.f32.mrb[5].mxu0 }
  0xed   :  { %7241 = vmatprep.mubr.msk.f32.mxu0 %vm1685_vm1, %v247_v41  ;;  %v6934_v8 = vpop.f32.mrb[4].mxu1 }
  0xee   :  { %7242 = vmatmul.mubr.msk.f32.gmra.mrb[52].mxu0 %vm1685_vm1, %v6913_v40  ;;  %v342_v42 = vpop.f32.mrb[5].mxu1 }
  0xef   :  { %7244 = vmatprep.mubr.msk.f32.mxu0 %vm1685_vm1, %v322_v35  ;;  %v6949_v44 = vpop.f32.mrb[6].mxu0 }
  0xf0   :  { %v417_v45 = vpop.f32.mrb[7].mxu0 }
  0xf1   :  { %v6970_v46 = vpop.f32.mrb[6].mxu1 }
  0xf2   :  { %7245 = vmatmul.mubr.msk.f32.gmra.mrb[54].mxu0 %vm1685_vm1, %v6928_v36  ;;  %v512_v47 = vpop.f32.mrb[7].mxu1 }
  0xf3   :  { %7247 = vmatprep.mubr.msk.f32.mxu0 %vm1685_vm1, %v332_v43  ;;  %v6952_v48 = vpop.f32.mrb[8].mxu0 }
  0xf4   :  { %v427_v49 = vpop.f32.mrb[9].mxu0 }
  0xf5   :  { %v6973_v50 = vpop.f32.mrb[8].mxu1 }
  0xf6   :  { %7248 = vmatmul.mubr.msk.f32.gmra.mrb[56].mxu0 %vm1685_vm1, %v6931_v39  ;;  %v522_v51 = vpop.f32.mrb[9].mxu1 }
  0xf7   :  { %7250 = vmatprep.mubr.msk.f32.mxu0 %vm1685_vm1, %v342_v42  ;;  %v6955_v52 = vpop.f32.mrb[10].mxu0 }
  0xf8   :  { %v437_v53 = vpop.f32.mrb[11].mxu0 }
  0xf9   :  { %v6976_v54 = vpop.f32.mrb[10].mxu1 }
  0xfa   :  { %7251 = vmatmul.mubr.msk.f32.gmra.mrb[58].mxu0 %vm1685_vm1, %v6934_v8  ;;  %v532_v55 = vpop.f32.mrb[11].mxu1 }
  0xfb   :  { %7253 = vmatprep.mubr.msk.f32.mxu0 %vm1685_vm1, %v417_v45  ;;  %v6991_v56 = vpop.f32.mrb[12].mxu0 }
  0xfc   :  { %v607_v57 = vpop.f32.mrb[13].mxu0 }
  0xfd   :  { %v7012_v58 = vpop.f32.mrb[12].mxu1 }
  0xfe   :  { %7254 = vmatmul.mubr.msk.f32.gmra.mrb[60].mxu0 %vm1685_vm1, %v6949_v44  ;;  %v702_v59 = vpop.f32.mrb[13].mxu1 }
  0xff   :  { %7256 = vmatprep.mubr.msk.f32.mxu0 %vm1685_vm1, %v427_v49  ;;  %v6994_v60 = vpop.f32.mrb[14].mxu0 }
 0x100   :  { %v617_v61 = vpop.f32.mrb[15].mxu0 }
 0x101   :  { %v7015_v62 = vpop.f32.mrb[14].mxu1 }
 0x102   :  { %7257 = vmatmul.mubr.msk.f32.gmra.mrb[62].mxu0 %vm1685_vm1, %v6952_v48  ;;  %v712_v63 = vpop.f32.mrb[15].mxu1 }
 0x103   :  { %7259 = vmatprep.mubr.msk.f32.mxu0 %vm1685_vm1, %v437_v53  ;;  %v6997_v0 = vpop.f32.mrb[16].mxu0 }
 0x104   :  { %v627_v1 = vpop.f32.mrb[17].mxu0 }
 0x105   :  { %v7018_v2 = vpop.f32.mrb[16].mxu1 }
 0x106   :  { %7260 = vmatmul.mubr.msk.f32.gmra.mrb[64].mxu0 %vm1685_vm1, %v6955_v52  ;;  %v722_v3 = vpop.f32.mrb[17].mxu1 }
 0x107   :  { %7262 = vmatprep.mubr.msk.f32.mxu0 %vm1685_vm1, %v512_v47  ;;  %v7033_v4 = vpop.f32.mrb[18].mxu0 }
 0x108   :  { %v797_v5 = vpop.f32.mrb[19].mxu0 }
 0x109   :  { %v9027_v6 = vpop.f32.mrb[18].mxu1 }
 0x10a   :  { %7263 = vmatmul.mubr.msk.f32.gmra.mrb[66].mxu0 %vm1685_vm1, %v6970_v46  ;;  %v9030_v7 = vpop.f32.mrb[19].mxu1 }
 0x10b   :  { %7265 = vmatprep.mubr.msk.f32.mxu0 %vm1685_vm1, %v522_v51  ;;  %v7036_v9 = vpop.f32.mrb[20].mxu0 }
 0x10c   :  { %v807_v10 = vpop.f32.mrb[21].mxu0 }
 0x10d   :  { %v9033_v11 = vpop.f32.mrb[20].mxu1 }
 0x10e   :  { %7266 = vmatmul.mubr.msk.f32.gmra.mrb[68].mxu0 %vm1685_vm1, %v6973_v50  ;;  %v9036_v12 = vpop.f32.mrb[21].mxu1 }
 0x10f   :  { %7268 = vmatprep.mubr.msk.f32.mxu0 %vm1685_vm1, %v532_v55  ;;  %v7039_v13 = vpop.f32.mrb[22].mxu0 }
 0x110   :  { %v817_v14 = vpop.f32.mrb[23].mxu0 }
 0x111   :  { %v9039_v15 = vpop.f32.mrb[22].mxu1 }
 0x112   :  { %7269 = vmatmul.mubr.msk.f32.gmra.mrb[70].mxu0 %vm1685_vm1, %v6976_v54  ;;  %v9042_v16 = vpop.f32.mrb[23].mxu1 }
 0x113   :  { %7271 = vmatprep.mubr.msk.f32.mxu0 %vm1685_vm1, %v607_v57  ;;  %v9045_v17 = vpop.f32.mrb[24].mxu0 }
 0x114   :  { %v9047_v18 = vpop.f32.mrb[25].mxu0 }
 0x115   :  { %v9049_v19 = vpop.f32.mrb[24].mxu1 }
 0x116   :  { %7272 = vmatmul.mubr.msk.f32.gmra.mrb[72].mxu0 %vm1685_vm1, %v6991_v56  ;;  %v9052_v20 = vpop.f32.mrb[25].mxu1 }
 0x117   :  { %7274 = vmatprep.mubr.msk.f32.mxu0 %vm1685_vm1, %v617_v61  ;;  %v9055_v21 = vpop.f32.mrb[26].mxu0 }
 0x118   :  { %v9057_v22 = vpop.f32.mrb[27].mxu0 }
 0x119   :  { %v9059_v23 = vpop.f32.mrb[26].mxu1 }
 0x11a   :  { %7275 = vmatmul.mubr.msk.f32.gmra.mrb[74].mxu0 %vm1685_vm1, %v6994_v60  ;;  %v9062_v24 = vpop.f32.mrb[27].mxu1 }
 0x11b   :  { %7277 = vmatprep.mubr.msk.f32.mxu0 %vm1685_vm1, %v627_v1  ;;  %v9065_v25 = vpop.f32.mrb[28].mxu0  ;;  %v23_v1 = vld [vmem:[%s10083_s3 + $0x28] sm:$0xff] }
 0x11c   :  { %v1007_v26 = vpop.f32.mrb[29].mxu0 }
 0x11d   :  { %v9067_v28 = vpop.f32.mrb[28].mxu1 }
 0x11e   :  { %7278 = vmatmul.mubr.msk.f32.gmra.mrb[76].mxu0 %vm1685_vm1, %v6997_v0  ;;  %v9070_v29 = vpop.f32.mrb[29].mxu1  ;;  %v22_v0 = vld [vmem:[%s10083_s3 + $0x20] sm:$0xff] }
 0x11f   :  { %7280 = vmatprep.mubr.msk.f32.mxu0 %vm1685_vm1, %v702_v59  ;;  %v9073_v31 = vpop.f32.mrb[30].mxu0 }
 0x120   :  { %v9075_v32 = vpop.f32.mrb[31].mxu0 }
 0x121   :  { %v9077_v33 = vpop.f32.mrb[30].mxu1 }
 0x122   :  { %7281 = vmatmul.mubr.msk.f32.gmra.mrb[78].mxu0 %vm1685_vm1, %v7012_v58  ;;  %v9080_v34 = vpop.f32.mrb[31].mxu1 }
 0x123   :  { %7283 = vmatprep.mubr.msk.f32.mxu0 %vm1685_vm1, %v712_v63  ;;  %v7120_v27 = vpop.f32.mrb[32].mxu0 }
 0x124   :  { %v1187_v30 = vpop.f32.mrb[33].mxu0 }
 0x125   :  { %v9083_v36 = vpop.f32.mrb[32].mxu1 }
 0x126   :  { %7284 = vmatmul.mubr.msk.f32.gmra.mrb[80].mxu0 %vm1685_vm1, %v7015_v62  ;;  %v9086_v35 = vpop.f32.mrb[33].mxu1 }
 0x127   :  { %7286 = vmatprep.mubr.msk.f32.mxu0 %vm1685_vm1, %v722_v3  ;;  %v7123_v37 = vpop.f32.mrb[34].mxu0  ;;  %v24_v3 = vld [vmem:[%s10083_s3 + $0x30] sm:$0xff] }
 0x128   :  { %v1197_v38 = vpop.f32.mrb[35].mxu0 }
 0x129   :  { %v7144_v39 = vpop.f32.mrb[34].mxu1 }
 0x12a   :  { %7287 = vmatmul.mubr.msk.f32.gmra.mrb[82].mxu0 %vm1685_vm1, %v7018_v2  ;;  %v1292_v43 = vpop.f32.mrb[35].mxu1  ;;  %v9170_v2 = vpack.c.bf16 %v23_v1, %v22_v0 }
 0x12b   :  { %7289 = vmatprep.mubr.msk.f32.mxu0 %vm1685_vm1, %v797_v5  ;;  %v7159_v40 = vpop.f32.mrb[36].mxu0 }
 0x12c   :  { %v1367_v41 = vpop.f32.mrb[37].mxu0  ;;  %8283 = vmatprep.subr.bf16.mxu0 %v9170_v2 }
 0x12d   :  { %v9091_v8 = vpop.f32.mrb[36].mxu1  ;;  %8285 = vmatpush3.bf16.msra.mxu0 %v9170_v2 }
 0x12e   :  { %7290 = vmatmul.mubr.msk.f32.gmra.mrb[84].mxu0 %vm1685_vm1, %v7033_v4  ;;  %v1462_v42 = vpop.f32.mrb[37].mxu1  ;;  %v25_v4 = vld [vmem:[%s10083_s3 + $0x38] sm:$0xff] }
 0x12f   :  { %7292 = vmatprep.mubr.msk.f32.mxu0 %vm1685_vm1, %v807_v10  ;;  %v7162_v44 = vpop.f32.mrb[38].mxu0  ;;  %v9195_v5 = vpack.c.bf16 %v25_v4, %v24_v3  ;;  %v9242_v3 = vld [vmem:[%s10080_s0 + $0x20] sm:$0xff] }
 0x130   :  { %v1377_v45 = vpop.f32.mrb[39].mxu0 }
 0x131   :  { %v7183_v46 = vpop.f32.mrb[38].mxu1  ;;  %8287 = vmatprep.subr.bf16.mxu0 %v9195_v5 }
 0x132   :  { %7293 = vmatmul.mubr.msk.f32.gmra.mrb[86].mxu0 %vm1685_vm1, %v7036_v9  ;;  %v1472_v47 = vpop.f32.mrb[39].mxu1 }
 0x133   :  { %7295 = vmatprep.mubr.msk.f32.mxu0 %vm1685_vm1, %v817_v14  ;;  %v7165_v48 = vpop.f32.mrb[40].mxu0  ;;  %8289 = vmatpush3.bf16.msra.mxu0 %v9195_v5 }
 0x134   :  { %v1387_v49 = vpop.f32.mrb[41].mxu0 }
 0x135   :  { %v7186_v50 = vpop.f32.mrb[40].mxu1 }
 0x136   :  { %7296 = vmatmul.mubr.msk.f32.gmra.mrb[88].mxu0 %vm1685_vm1, %v7039_v13  ;;  %v1482_v51 = vpop.f32.mrb[41].mxu1 }
 0x137   :  { %7298 = vmatprep.mubr.msk.f32.mxu0 %vm1685_vm1, %v9030_v7  ;;  %v7201_v52 = vpop.f32.mrb[42].mxu0 }
 0x138   :  { %v1557_v53 = vpop.f32.mrb[43].mxu0 }
 0x139   :  { %v9100_v54 = vpop.f32.mrb[42].mxu1 }
 0x13a   :  { %7299 = vmatmul.mubr.msk.f32.gmra.mrb[90].mxu0 %vm1685_vm1, %v9027_v6  ;;  %v1652_v55 = vpop.f32.mrb[43].mxu1  ;;  %v9200_v6 = vld [vmem:[%s10083_s3 + $0x18] ss:$0 sm:$0xff] }
 0x13b   :  { %7301 = vmatprep.mubr.msk.f32.mxu0 %vm1685_vm1, %v9036_v12  ;;  %v7204_v56 = vpop.f32.mrb[44].mxu0 }
 0x13c   :  { %v1567_v57 = vpop.f32.mrb[45].mxu0 }
 0x13d   :  { %v7225_v58 = vpop.f32.mrb[44].mxu1 }
 0x13e   :  { %7302 = vmatmul.mubr.msk.f32.gmra.mrb[92].mxu0 %vm1685_vm1, %v9033_v11  ;;  %v1662_v59 = vpop.f32.mrb[45].mxu1 }
 0x13f   :  { %7304 = vmatprep.mubr.msk.f32.mxu0 %vm1685_vm1, %v9042_v16  ;;  %v7207_v60 = vpop.f32.mrb[46].mxu0 }
 0x140   :  { %v1577_v61 = vpop.f32.mrb[47].mxu0 }
 0x141   :  { %v7228_v62 = vpop.f32.mrb[46].mxu1 }
 0x142   :  { %7305 = vmatmul.mubr.msk.f32.gmra.mrb[94].mxu0 %vm1685_vm1, %v9039_v15  ;;  %v1672_v63 = vpop.f32.mrb[47].mxu1 }
 0x143   :  { %7307 = vmatprep.mubr.msk.f32.mxu0 %vm1685_vm1, %v9047_v18 }
 0x146   :  { %7308 = vmatmul.mubr.msk.f32.gmra.mrb[96].mxu0 %vm1685_vm1, %v9045_v17 }
 0x147   :  { %7310 = vmatprep.mubr.msk.f32.mxu0 %vm1685_vm1, %v9057_v22 }
 0x14a   :  { %7311 = vmatmul.mubr.msk.f32.gmra.mrb[98].mxu0 %vm1685_vm1, %v9055_v21 }
 0x14b   :  { %7313 = vmatprep.mubr.msk.f32.mxu0 %vm1685_vm1, %v1007_v26 }
 0x14e   :  { %7314 = vmatmul.mubr.msk.f32.gmra.mrb[100].mxu0 %vm1685_vm1, %v9065_v25 }
 0x14f   :  { %7316 = vmatprep.mubr.msk.f32.mxu0 %vm1685_vm1, %v9052_v20 }
 0x152   :  { %7317 = vmatmul.mubr.msk.f32.gmra.mrb[102].mxu0 %vm1685_vm1, %v9049_v19 }
 0x153   :  { %7319 = vmatprep.mubr.msk.f32.mxu0 %vm1685_vm1, %v9062_v24 }
 0x156   :  { %7320 = vmatmul.mubr.msk.f32.gmra.mrb[104].mxu0 %vm1685_vm1, %v9059_v23 }
 0x157   :  { %7322 = vmatprep.mubr.msk.f32.mxu0 %vm1685_vm1, %v9070_v29 }
 0x15a   :  { %7323 = vmatmul.mubr.msk.f32.gmra.mrb[106].mxu0 %vm1685_vm1, %v9067_v28 }
 0x15b   :  { %7325 = vmatprep.mubr.msk.f32.mxu0 %vm1685_vm1, %v9075_v32 }
 0x15e   :  { %7326 = vmatmul.mubr.msk.f32.gmra.mrb[108].mxu0 %vm1685_vm1, %v9073_v31 }
 0x15f   :  { %7328 = vmatprep.mubr.msk.f32.mxu0 %vm1685_vm1, %v1187_v30 }
 0x162   :  { %7329 = vmatmul.mubr.msk.f32.gmra.mrb[110].mxu0 %vm1685_vm1, %v7120_v27 }
 0x163   :  { %7331 = vmatprep.mubr.msk.f32.mxu0 %vm1685_vm1, %v1197_v38 }
 0x166   :  { %7332 = vmatmul.mubr.msk.f32.gmra.mrb[112].mxu0 %vm1685_vm1, %v7123_v37 }
 0x167   :  { %7334 = vmatprep.mubr.msk.f32.mxu0 %vm1685_vm1, %v9080_v34 }
 0x16a   :  { %7335 = vmatmul.mubr.msk.f32.gmra.mrb[114].mxu0 %vm1685_vm1, %v9077_v33 }
 0x16b   :  { %7337 = vmatprep.mubr.msk.f32.mxu0 %vm1685_vm1, %v9086_v35 }
 0x16e   :  { %7338 = vmatmul.mubr.msk.f32.gmra.mrb[116].mxu0 %vm1685_vm1, %v9083_v36 }
 0x16f   :  { %7340 = vmatprep.mubr.msk.f32.mxu0 %vm1685_vm1, %v1292_v43 }
 0x172   :  { %7341 = vmatmul.mubr.msk.f32.gmra.mrb[118].mxu0 %vm1685_vm1, %v7144_v39 }
 0x173   :  { %7343 = vmatprep.mubr.msk.f32.mxu0 %vm1685_vm1, %v1367_v41 }
 0x176   :  { %7344 = vmatmul.mubr.msk.f32.gmra.mrb[120].mxu0 %vm1685_vm1, %v7159_v40 }
 0x177   :  { %7346 = vmatprep.mubr.msk.f32.mxu0 %vm1685_vm1, %v1377_v45 }
 0x17a   :  { %7347 = vmatmul.mubr.msk.f32.gmra.mrb[122].mxu0 %vm1685_vm1, %v7162_v44 }
 0x17b   :  { %7349 = vmatprep.mubr.msk.f32.mxu0 %vm1685_vm1, %v1387_v49 }
 0x17e   :  { %7350 = vmatmul.mubr.msk.f32.gmra.mrb[124].mxu0 %vm1685_vm1, %v7165_v48 }
 0x17f   :  { %7352 = vmatprep.mubr.msk.f32.mxu0 %vm1685_vm1, %v1462_v42 }
 0x182   :  { %7353 = vmatmul.mubr.msk.f32.gmra.mrb[126].mxu0 %vm1685_vm1, %v9091_v8 }
 0x183   :  { %7355 = vmatprep.mubr.msk.f32.mxu0 %vm1685_vm1, %v1472_v47 }
 0x186   :  { %7356 = vmatmul.mubr.msk.f32.gmra.mrb[128].mxu0 %vm1685_vm1, %v7183_v46 }
 0x187   :  { %7358 = vmatprep.mubr.msk.f32.mxu0 %vm1685_vm1, %v1482_v51 }
 0x18a   :  { %7359 = vmatmul.mubr.msk.f32.gmra.mrb[130].mxu0 %vm1685_vm1, %v7186_v50 }
 0x18b   :  { %7361 = vmatprep.mubr.msk.f32.mxu0 %vm1685_vm1, %v1557_v53 }
 0x18e   :  { %7362 = vmatmul.mubr.msk.f32.gmra.mrb[132].mxu0 %vm1685_vm1, %v7201_v52  ;;  %v9218_v52 = vld [vmem:[%s10080_s0 + $0x8] sm:$0xff] }
 0x18f   :  { %7364 = vmatprep.mubr.msk.f32.mxu0 %vm1685_vm1, %v1567_v57 }
 0x192   :  { %7365 = vmatmul.mubr.msk.f32.gmra.mrb[134].mxu0 %vm1685_vm1, %v7204_v56 }
 0x193   :  { %7367 = vmatprep.mubr.msk.f32.mxu0 %vm1685_vm1, %v1577_v61 }
 0x196   :  { %7368 = vmatmul.mubr.msk.f32.gmra.mrb[136].mxu0 %vm1685_vm1, %v7207_v60 }
 0x197   :  { %7370 = vmatprep.mubr.msk.f32.mxu0 %vm1685_vm1, %v1652_v55  ;;  %v9226_v55 = vld [vmem:[%s10080_s0 + $0x10] sm:$0xff] }
 0x19a   :  { %7371 = vmatmul.mubr.msk.f32.gmra.mrb[138].mxu0 %vm1685_vm1, %v9100_v54 }
 0x19b   :  { %7373 = vmatprep.mubr.msk.f32.mxu0 %vm1685_vm1, %v1662_v59 }
 0x19e   :  { %7374 = vmatmul.mubr.msk.f32.gmra.mrb[140].mxu0 %vm1685_vm1, %v7225_v58 }
 0x19f   :  { %7376 = vmatprep.mubr.msk.f32.mxu0 %vm1685_vm1, %v1672_v63  ;;  %v9234_v63 = vld [vmem:[%s10080_s0 + $0x18] sm:$0xff] }
 0x1a2   :  { %7377 = vmatmul.mubr.msk.f32.gmra.mrb[142].mxu0 %vm1685_vm1, %v7228_v62 }
 0x1b9   :  { %v7237_v7 = vpop.f32.mrb[48].mxu0 }
 0x1ba   :  { %v2046_v9 = vadd.f32 %v7237_v7, %v9200_v6  ;;  %v2040_v10 = vpop.f32.mrb[49].mxu0 }
 0x1bb   :  { %v2041_v11 = vadd.f32 %v9200_v6, %v2040_v10 }
 0x1bc   :  { %vm2520_vm2 = vcmp.ge.f32.partialorder %v2046_v9, 0.0  ;;  %v2616_v12 = vmul.f32 0.01, %v2046_v9 }
 0x1bd   :  { %vm2519_vm3 = vcmp.ge.f32.partialorder %v2041_v11, 0.0  ;;  %v2615_v13 = vmul.f32 0.01, %v2041_v11  ;;  %v7240_v14 = vpop.f32.mrb[50].mxu0 }
 0x1be   :  { %v2056_v15 = vadd.f32 %v7240_v14, %v9200_v6  ;;  %v2050_v16 = vpop.f32.mrb[51].mxu0  ;;  %v2712_v17 = vsel %vm2520_vm2, %v2046_v9, %v2616_v12  ;;  %v9250_v14 = vld [vmem:[%s10080_s0 + $0x28] sm:$0xff] }
 0x1bf   :  { %v2051_v18 = vadd.f32 %v9200_v6, %v2050_v16  ;;  %v2711_v19 = vsel %vm2519_vm3, %v2041_v11, %v2615_v13 }
 0x1c0   :  { %vm2522_vm4 = vcmp.ge.f32.partialorder %v2056_v15, 0.0  ;;  %v2618_v20 = vmul.f32 0.01, %v2056_v15  ;;  %v8090_v21 = vpack.c.bf16 %v2712_v17, %v2711_v19  ;;  %v9258_v17 = vld [vmem:[%s10080_s0] sm:$0xff] }
 0x1c1   :  { %vm2521_vm5 = vcmp.ge.f32.partialorder %v2051_v18, 0.0  ;;  %v2617_v22 = vmul.f32 0.01, %v2051_v18  ;;  %v7243_v23 = vpop.f32.mrb[52].mxu0 }
 0x1c2   :  { %v2066_v24 = vadd.f32 %v7243_v23, %v9200_v6  ;;  %v2060_v25 = vpop.f32.mrb[53].mxu0  ;;  %8091 = vmatprep.subr.bf16.mxu1 %v8090_v21  ;;  %v2714_v26 = vsel %vm2522_vm4, %v2056_v15, %v2618_v20 }
 0x1c3   :  { %v2061_v28 = vadd.f32 %v9200_v6, %v2060_v25  ;;  %8093 = vmatpush3.bf16.msra.mxu1 %v8090_v21  ;;  %v2713_v29 = vsel %vm2521_vm5, %v2051_v18, %v2617_v22 }
 0x1c4   :  { %vm2524_vm6 = vcmp.ge.f32.partialorder %v2066_v24, 0.0  ;;  %v2620_v31 = vmul.f32 0.01, %v2066_v24  ;;  %v8094_v32 = vpack.c.bf16 %v2714_v26, %v2713_v29 }
 0x1c5   :  { %vm2523_vm7 = vcmp.ge.f32.partialorder %v2061_v28, 0.0  ;;  %v2619_v33 = vmul.f32 0.01, %v2061_v28  ;;  %v7246_v34 = vpop.f32.mrb[54].mxu0 }
 0x1c6   :  { %v2076_v27 = vadd.f32 %v7246_v34, %v9200_v6  ;;  %v2070_v30 = vpop.f32.mrb[55].mxu0  ;;  %8095 = vmatprep.subr.bf16.mxu1 %v8094_v32  ;;  %v2716_v36 = vsel %vm2524_vm6, %v2066_v24, %v2620_v31 }
 0x1c7   :  { %v2071_v35 = vadd.f32 %v9200_v6, %v2070_v30  ;;  %8097 = vmatpush3.bf16.msra.mxu1 %v8094_v32  ;;  %v2715_v37 = vsel %vm2523_vm7, %v2061_v28, %v2619_v33 }
 0x1c8   :  { %vm2526_vm8 = vcmp.ge.f32.partialorder %v2076_v27, 0.0  ;;  %v2622_v38 = vmul.f32 0.01, %v2076_v27  ;;  %v8098_v39 = vpack.c.bf16 %v2716_v36, %v2715_v37 }
 0x1c9   :  { %vm2525_vm9 = vcmp.ge.f32.partialorder %v2071_v35, 0.0  ;;  %v2621_v43 = vmul.f32 0.01, %v2071_v35  ;;  %v7249_v40 = vpop.f32.mrb[56].mxu0 }
 0x1ca   :  { %v2086_v41 = vadd.f32 %v7249_v40, %v9200_v6  ;;  %v2080_v8 = vpop.f32.mrb[57].mxu0  ;;  %8099 = vmatprep.subr.bf16.mxu1 %v8098_v39  ;;  %v2718_v42 = vsel %vm2526_vm8, %v2076_v27, %v2622_v38 }
 0x1cb   :  { %v2081_v44 = vadd.f32 %v9200_v6, %v2080_v8  ;;  %8101 = vmatpush3.bf16.msra.mxu1 %v8098_v39  ;;  %v2717_v45 = vsel %vm2525_vm9, %v2071_v35, %v2621_v43 }
 0x1cc   :  { %vm2528_vm10 = vcmp.ge.f32.partialorder %v2086_v41, 0.0  ;;  %v2624_v46 = vmul.f32 0.01, %v2086_v41  ;;  %v8102_v47 = vpack.c.bf16 %v2718_v42, %v2717_v45 }
 0x1cd   :  { %vm2527_vm11 = vcmp.ge.f32.partialorder %v2081_v44, 0.0  ;;  %v2623_v48 = vmul.f32 0.01, %v2081_v44  ;;  %v7252_v49 = vpop.f32.mrb[58].mxu0 }
 0x1ce   :  { %v2096_v50 = vadd.f32 %v7252_v49, %v9200_v6  ;;  %v2090_v51 = vpop.f32.mrb[59].mxu0  ;;  %7392 = vmatmul.mubr.msk.f32.vlgmr.msra.gmra.mrb[48].mxu1 %vm142_vm0, %v9218_v52  ;;  %8103 = vmatprep.subr.bf16.mxu1 %v8102_v47  ;;  %v2720_v53 = vsel %vm2528_vm10, %v2086_v41, %v2624_v46  ;;  %v26_v49 = vld [vmem:[%s10083_s3 + $0x40] sm:$0xff] }
 0x1cf   :  { %v2091_v54 = vadd.f32 %v9200_v6, %v2090_v51  ;;  %8105 = vmatpush3.bf16.msra.mxu1 %v8102_v47  ;;  %7394 = vmatprep.mubr.msk.f32.mxu1 %vm142_vm0, %v9226_v55  ;;  %v2719_v56 = vsel %vm2527_vm11, %v2081_v44, %v2623_v48 }
 0x1d0   :  { %vm2530_vm12 = vcmp.ge.f32.partialorder %v2096_v50, 0.0  ;;  %v2626_v57 = vmul.f32 0.01, %v2096_v50  ;;  %v8106_v58 = vpack.c.bf16 %v2720_v53, %v2719_v56 }
 0x1d1   :  { %vm2529_vm13 = vcmp.ge.f32.partialorder %v2091_v54, 0.0  ;;  %v2625_v59 = vmul.f32 0.01, %v2091_v54  ;;  %v7255_v60 = vpop.f32.mrb[60].mxu0 }
 0x1d2   :  { %v2106_v61 = vadd.f32 %v7255_v60, %v9200_v6  ;;  %v2100_v62 = vpop.f32.mrb[61].mxu0  ;;  %7395 = vmatmul.mubr.msk.f32.gmra.mrb[50].mxu1 %vm142_vm0, %v9234_v63  ;;  %8107 = vmatprep.subr.bf16.mxu1 %v8106_v58  ;;  %v2722_v0 = vsel %vm2530_vm12, %v2096_v50, %v2626_v57  ;;  %v27_v50 = vld [vmem:[%s10083_s3 + $0x48] sm:$0xff] }
 0x1d3   :  { %v2101_v1 = vadd.f32 %v9200_v6, %v2100_v62  ;;  %8109 = vmatpush3.bf16.msra.mxu1 %v8106_v58  ;;  %7397 = vmatprep.mubr.msk.f32.mxu1 %vm142_vm0, %v9242_v3  ;;  %v2721_v4 = vsel %vm2529_vm13, %v2091_v54, %v2625_v59  ;;  %v9289_v56 = vpack.c.bf16 %v27_v50, %v26_v49 }
 0x1d4   :  { %vm2532_vm14 = vcmp.ge.f32.partialorder %v2106_v61, 0.0  ;;  %v2628_v7 = vmul.f32 0.01, %v2106_v61  ;;  %v8110_v9 = vpack.c.bf16 %v2722_v0, %v2721_v4 }
 0x1d5   :  { %vm2531_vm15 = vcmp.ge.f32.partialorder %v2101_v1, 0.0  ;;  %v2627_v10 = vmul.f32 0.01, %v2101_v1  ;;  %v7258_v11 = vpop.f32.mrb[62].mxu0  ;;  %8291 = vmatprep.subr.bf16.mxu0 %v9289_v56 }
 0x1d6   :  { %v2116_v12 = vadd.f32 %v7258_v11, %v9200_v6  ;;  %v2110_v13 = vpop.f32.mrb[63].mxu0  ;;  %7398 = vmatmul.mubr.msk.f32.gmra.mrb[52].mxu1 %vm142_vm0, %v9250_v14  ;;  %8111 = vmatprep.subr.bf16.mxu1 %v8110_v9  ;;  %v2724_v15 = vsel %vm2532_vm14, %v2106_v61, %v2628_v7 }
 0x1d7   :  { %v2111_v16 = vadd.f32 %v9200_v6, %v2110_v13  ;;  %8113 = vmatpush3.bf16.msra.mxu1 %v8110_v9  ;;  %7412 = vmatprep.mubr.msk.f32.mxu1 %vm142_vm0, %v9258_v17  ;;  %v2723_v18 = vsel %vm2531_vm15, %v2101_v1, %v2627_v10 }
 0x1d8   :  { %vm2534_vm1 = vcmp.ge.f32.partialorder %v2116_v12, 0.0  ;;  %v2630_v19 = vmul.f32 0.01, %v2116_v12  ;;  %v8114_v20 = vpack.c.bf16 %v2724_v15, %v2723_v18  ;;  %8293 = vmatpush3.bf16.msra.mxu0 %v9289_v56 }
 0x1d9   :  { %vm2533_vm2 = vcmp.ge.f32.partialorder %v2111_v16, 0.0  ;;  %v2629_v21 = vmul.f32 0.01, %v2111_v16  ;;  %v7261_v22 = vpop.f32.mrb[64].mxu0 }
 0x1da   :  { %v2126_v23 = vadd.f32 %v7261_v22, %v9200_v6  ;;  %v2120_v24 = vpop.f32.mrb[65].mxu0  ;;  %7413 = vmatmul.mubr.msk.f32.vlgmr.msra.gmra.mrb[54].mxu1 %vm142_vm0, %v9218_v52  ;;  %8115 = vmatprep.subr.bf16.mxu1 %v8114_v20  ;;  %v2726_v25 = vsel %vm2534_vm1, %v2116_v12, %v2630_v19 }
 0x1db   :  { %v2121_v26 = vadd.f32 %v9200_v6, %v2120_v24  ;;  %8117 = vmatpush3.bf16.msra.mxu1 %v8114_v20  ;;  %7415 = vmatprep.mubr.msk.f32.mxu1 %vm142_vm0, %v9226_v55  ;;  %v2725_v28 = vsel %vm2533_vm2, %v2111_v16, %v2629_v21 }
 0x1dc   :  { %vm2536_vm3 = vcmp.ge.f32.partialorder %v2126_v23, 0.0  ;;  %v2632_v29 = vmul.f32 0.01, %v2126_v23  ;;  %v8118_v31 = vpack.c.bf16 %v2726_v25, %v2725_v28 }
 0x1dd   :  { %vm2535_vm4 = vcmp.ge.f32.partialorder %v2121_v26, 0.0  ;;  %v2631_v32 = vmul.f32 0.01, %v2121_v26  ;;  %v7264_v33 = vpop.f32.mrb[66].mxu0 }
 0x1de   :  { %v2136_v34 = vadd.f32 %v7264_v33, %v9200_v6  ;;  %v2130_v27 = vpop.f32.mrb[67].mxu0  ;;  %7416 = vmatmul.mubr.msk.f32.gmra.mrb[56].mxu1 %vm142_vm0, %v9234_v63  ;;  %8119 = vmatprep.subr.bf16.mxu1 %v8118_v31  ;;  %v2728_v30 = vsel %vm2536_vm3, %v2126_v23, %v2632_v29 }
 0x1df   :  { %v2131_v36 = vadd.f32 %v9200_v6, %v2130_v27  ;;  %8121 = vmatpush3.bf16.msra.mxu1 %v8118_v31  ;;  %7418 = vmatprep.mubr.msk.f32.mxu1 %vm142_vm0, %v9242_v3  ;;  %v2727_v35 = vsel %vm2535_vm4, %v2121_v26, %v2631_v32 }
 0x1e0   :  { %vm2538_vm5 = vcmp.ge.f32.partialorder %v2136_v34, 0.0  ;;  %v2634_v37 = vmul.f32 0.01, %v2136_v34  ;;  %v8122_v38 = vpack.c.bf16 %v2728_v30, %v2727_v35 }
 0x1e1   :  { %vm2537_vm6 = vcmp.ge.f32.partialorder %v2131_v36, 0.0  ;;  %v2633_v39 = vmul.f32 0.01, %v2131_v36  ;;  %v7267_v43 = vpop.f32.mrb[68].mxu0 }
 0x1e2   :  { %v2146_v40 = vadd.f32 %v7267_v43, %v9200_v6  ;;  %v2140_v41 = vpop.f32.mrb[69].mxu0  ;;  %7419 = vmatmul.mubr.msk.f32.gmra.mrb[58].mxu1 %vm142_vm0, %v9250_v14  ;;  %8123 = vmatprep.subr.bf16.mxu1 %v8122_v38  ;;  %v2730_v8 = vsel %vm2538_vm5, %v2136_v34, %v2634_v37 }
 0x1e3   :  { %v2141_v42 = vadd.f32 %v9200_v6, %v2140_v41  ;;  %8125 = vmatpush3.bf16.msra.mxu1 %v8122_v38  ;;  %7433 = vmatprep.mubr.msk.f32.mxu1 %vm142_vm0, %v9258_v17  ;;  %v2729_v44 = vsel %vm2537_vm6, %v2131_v36, %v2633_v39 }
 0x1e4   :  { %vm2540_vm7 = vcmp.ge.f32.partialorder %v2146_v40, 0.0  ;;  %v2636_v45 = vmul.f32 0.01, %v2146_v40  ;;  %v8126_v46 = vpack.c.bf16 %v2730_v8, %v2729_v44 }
 0x1e5   :  { %vm2539_vm8 = vcmp.ge.f32.partialorder %v2141_v42, 0.0  ;;  %v2635_v47 = vmul.f32 0.01, %v2141_v42  ;;  %v7270_v48 = vpop.f32.mrb[70].mxu0 }
 0x1e6   :  { %v2156_v51 = vadd.f32 %v7270_v48, %v9200_v6  ;;  %v2150_v53 = vpop.f32.mrb[71].mxu0  ;;  %7434 = vmatmul.mubr.msk.f32.vlgmr.msra.gmra.mrb[60].mxu1 %vm142_vm0, %v9218_v52  ;;  %8127 = vmatprep.subr.bf16.mxu1 %v8126_v46  ;;  %v2732_v54 = vsel %vm2540_vm7, %v2146_v40, %v2636_v45 }
 0x1e7   :  { %v2151_v57 = vadd.f32 %v9200_v6, %v2150_v53  ;;  %8129 = vmatpush3.bf16.msra.mxu1 %v8126_v46  ;;  %7436 = vmatprep.mubr.msk.f32.mxu1 %vm142_vm0, %v9226_v55  ;;  %v2731_v58 = vsel %vm2539_vm8, %v2141_v42, %v2635_v47 }
 0x1e8   :  { %vm2542_vm9 = vcmp.ge.f32.partialorder %v2156_v51, 0.0  ;;  %v2638_v59 = vmul.f32 0.01, %v2156_v51  ;;  %v8130_v60 = vpack.c.bf16 %v2732_v54, %v2731_v58 }
 0x1e9   :  { %vm2541_vm10 = vcmp.ge.f32.partialorder %v2151_v57, 0.0  ;;  %v2637_v61 = vmul.f32 0.01, %v2151_v57  ;;  %v7273_v62 = vpop.f32.mrb[72].mxu0 }
 0x1ea   :  { %v2166_v0 = vadd.f32 %v7273_v62, %v9200_v6  ;;  %v2160_v1 = vpop.f32.mrb[73].mxu0  ;;  %7437 = vmatmul.mubr.msk.f32.gmra.mrb[62].mxu1 %vm142_vm0, %v9234_v63  ;;  %8131 = vmatprep.subr.bf16.mxu1 %v8130_v60  ;;  %v2734_v4 = vsel %vm2542_vm9, %v2156_v51, %v2638_v59 }
 0x1eb   :  { %v2161_v7 = vadd.f32 %v9200_v6, %v2160_v1  ;;  %8133 = vmatpush3.bf16.msra.mxu1 %v8130_v60  ;;  %7439 = vmatprep.mubr.msk.f32.mxu1 %vm142_vm0, %v9242_v3  ;;  %v2733_v9 = vsel %vm2541_vm10, %v2151_v57, %v2637_v61 }
 0x1ec   :  { %vm2544_vm11 = vcmp.ge.f32.partialorder %v2166_v0, 0.0  ;;  %v2640_v10 = vmul.f32 0.01, %v2166_v0  ;;  %v8134_v11 = vpack.c.bf16 %v2734_v4, %v2733_v9 }
 0x1ed   :  { %vm2543_vm12 = vcmp.ge.f32.partialorder %v2161_v7, 0.0  ;;  %v2639_v12 = vmul.f32 0.01, %v2161_v7  ;;  %v7276_v13 = vpop.f32.mrb[74].mxu0 }
 0x1ee   :  { %v2176_v15 = vadd.f32 %v7276_v13, %v9200_v6  ;;  %v2170_v16 = vpop.f32.mrb[75].mxu0  ;;  %7440 = vmatmul.mubr.msk.f32.gmra.mrb[64].mxu1 %vm142_vm0, %v9250_v14  ;;  %8135 = vmatprep.subr.bf16.mxu1 %v8134_v11  ;;  %v2736_v18 = vsel %vm2544_vm11, %v2166_v0, %v2640_v10 }
 0x1ef   :  { %v2171_v19 = vadd.f32 %v9200_v6, %v2170_v16  ;;  %8137 = vmatpush3.bf16.msra.mxu1 %v8134_v11  ;;  %7454 = vmatprep.mubr.msk.f32.mxu1 %vm142_vm0, %v9258_v17  ;;  %v2735_v20 = vsel %vm2543_vm12, %v2161_v7, %v2639_v12 }
 0x1f0   :  { %vm2546_vm13 = vcmp.ge.f32.partialorder %v2176_v15, 0.0  ;;  %v2642_v21 = vmul.f32 0.01, %v2176_v15  ;;  %v8138_v22 = vpack.c.bf16 %v2736_v18, %v2735_v20 }
 0x1f1   :  { %vm2545_vm14 = vcmp.ge.f32.partialorder %v2171_v19, 0.0  ;;  %v2641_v23 = vmul.f32 0.01, %v2171_v19  ;;  %v7279_v24 = vpop.f32.mrb[76].mxu0 }
 0x1f2   :  { %v2186_v25 = vadd.f32 %v7279_v24, %v9200_v6  ;;  %v2180_v26 = vpop.f32.mrb[77].mxu0  ;;  %7455 = vmatmul.mubr.msk.f32.vlgmr.msra.gmra.mrb[66].mxu1 %vm142_vm0, %v9218_v52  ;;  %8139 = vmatprep.subr.bf16.mxu1 %v8138_v22  ;;  %v2738_v28 = vsel %vm2546_vm13, %v2176_v15, %v2642_v21 }
 0x1f3   :  { %v2181_v29 = vadd.f32 %v9200_v6, %v2180_v26  ;;  %8141 = vmatpush3.bf16.msra.mxu1 %v8138_v22  ;;  %7457 = vmatprep.mubr.msk.f32.mxu1 %vm142_vm0, %v9226_v55  ;;  %v2737_v31 = vsel %vm2545_vm14, %v2171_v19, %v2641_v23 }
 0x1f4   :  { %vm2548_vm15 = vcmp.ge.f32.partialorder %v2186_v25, 0.0  ;;  %v2644_v32 = vmul.f32 0.01, %v2186_v25  ;;  %v8142_v33 = vpack.c.bf16 %v2738_v28, %v2737_v31  ;;  %v29_v31 = vld [vmem:[%s10083_s3 + $0x58] sm:$0xff] }
 0x1f5   :  { %vm2547_vm1 = vcmp.ge.f32.partialorder %v2181_v29, 0.0  ;;  %v2643_v34 = vmul.f32 0.01, %v2181_v29  ;;  %v7282_v27 = vpop.f32.mrb[78].mxu0 }
 0x1f6   :  { %v2196_v30 = vadd.f32 %v7282_v27, %v9200_v6  ;;  %v2190_v36 = vpop.f32.mrb[79].mxu0  ;;  %7458 = vmatmul.mubr.msk.f32.gmra.mrb[68].mxu1 %vm142_vm0, %v9234_v63  ;;  %8143 = vmatprep.subr.bf16.mxu1 %v8142_v33  ;;  %v2740_v35 = vsel %vm2548_vm15, %v2186_v25, %v2644_v32 }
 0x1f7   :  { %v2191_v37 = vadd.f32 %v9200_v6, %v2190_v36  ;;  %8145 = vmatpush3.bf16.msra.mxu1 %v8142_v33  ;;  %7460 = vmatprep.mubr.msk.f32.mxu1 %vm142_vm0, %v9242_v3  ;;  %v2739_v38 = vsel %vm2547_vm1, %v2181_v29, %v2643_v34  ;;  %v28_v29 = vld [vmem:[%s10083_s3 + $0x50] sm:$0xff] }
 0x1f8   :  { %vm2550_vm2 = vcmp.ge.f32.partialorder %v2196_v30, 0.0  ;;  %v2646_v39 = vmul.f32 0.01, %v2196_v30  ;;  %v8146_v43 = vpack.c.bf16 %v2740_v35, %v2739_v38  ;;  %v9356_v34 = vpack.c.bf16 %v29_v31, %v28_v29 }
 0x1f9   :  { %vm2549_vm3 = vcmp.ge.f32.partialorder %v2191_v37, 0.0  ;;  %v2645_v40 = vmul.f32 0.01, %v2191_v37  ;;  %v7285_v41 = vpop.f32.mrb[80].mxu0 }
 0x1fa   :  { %v2206_v8 = vadd.f32 %v7285_v41, %v9200_v6  ;;  %v2200_v42 = vpop.f32.mrb[81].mxu0  ;;  %7461 = vmatmul.mubr.msk.f32.gmra.mrb[70].mxu1 %vm142_vm0, %v9250_v14  ;;  %8147 = vmatprep.subr.bf16.mxu1 %v8146_v43  ;;  %v2742_v44 = vsel %vm2550_vm2, %v2196_v30, %v2646_v39 }
 0x1fb   :  { %v2201_v45 = vadd.f32 %v9200_v6, %v2200_v42  ;;  %8149 = vmatpush3.bf16.msra.mxu1 %v8146_v43  ;;  %7475 = vmatprep.mubr.msk.f32.mxu1 %vm142_vm0, %v9258_v17  ;;  %v2741_v46 = vsel %vm2549_vm3, %v2191_v37, %v2645_v40 }
 0x1fc   :  { %vm2552_vm4 = vcmp.ge.f32.partialorder %v2206_v8, 0.0  ;;  %v2648_v47 = vmul.f32 0.01, %v2206_v8  ;;  %v8150_v48 = vpack.c.bf16 %v2742_v44, %v2741_v46  ;;  %8295 = vmatprep.subr.bf16.mxu0 %v9356_v34 }
 0x1fd   :  { %vm2551_vm5 = vcmp.ge.f32.partialorder %v2201_v45, 0.0  ;;  %v2647_v49 = vmul.f32 0.01, %v2201_v45  ;;  %v7288_v50 = vpop.f32.mrb[82].mxu0  ;;  %8297 = vmatpush3.bf16.msra.mxu0 %v9356_v34 }
 0x1fe   :  { %v2216_v51 = vadd.f32 %v7288_v50, %v9200_v6  ;;  %v2210_v53 = vpop.f32.mrb[83].mxu0  ;;  %7476 = vmatmul.mubr.msk.f32.vlgmr.msra.gmra.mrb[72].mxu1 %vm142_vm0, %v9218_v52  ;;  %8151 = vmatprep.subr.bf16.mxu1 %v8150_v48  ;;  %v2744_v54 = vsel %vm2552_vm4, %v2206_v8, %v2648_v47 }
 0x1ff   :  { %v2211_v57 = vadd.f32 %v9200_v6, %v2210_v53  ;;  %8153 = vmatpush3.bf16.msra.mxu1 %v8150_v48  ;;  %7478 = vmatprep.mubr.msk.f32.mxu1 %vm142_vm0, %v9226_v55  ;;  %v2743_v58 = vsel %vm2551_vm5, %v2201_v45, %v2647_v49 }
 0x200   :  { %vm2554_vm6 = vcmp.ge.f32.partialorder %v2216_v51, 0.0  ;;  %v2650_v59 = vmul.f32 0.01, %v2216_v51  ;;  %v8154_v60 = vpack.c.bf16 %v2744_v54, %v2743_v58 }
 0x201   :  { %vm2553_vm7 = vcmp.ge.f32.partialorder %v2211_v57, 0.0  ;;  %v2649_v61 = vmul.f32 0.01, %v2211_v57  ;;  %v7291_v62 = vpop.f32.mrb[84].mxu0 }
 0x202   :  { %v2226_v0 = vadd.f32 %v7291_v62, %v9200_v6  ;;  %v2220_v1 = vpop.f32.mrb[85].mxu0  ;;  %7479 = vmatmul.mubr.msk.f32.gmra.mrb[74].mxu1 %vm142_vm0, %v9234_v63  ;;  %8155 = vmatprep.subr.bf16.mxu1 %v8154_v60  ;;  %v2746_v4 = vsel %vm2554_vm6, %v2216_v51, %v2650_v59 }
 0x203   :  { %v2221_v7 = vadd.f32 %v9200_v6, %v2220_v1  ;;  %8157 = vmatpush3.bf16.msra.mxu1 %v8154_v60  ;;  %7481 = vmatprep.mubr.msk.f32.mxu1 %vm142_vm0, %v9242_v3  ;;  %v2745_v9 = vsel %vm2553_vm7, %v2211_v57, %v2649_v61 }
 0x204   :  { %vm2556_vm8 = vcmp.ge.f32.partialorder %v2226_v0, 0.0  ;;  %v2652_v10 = vmul.f32 0.01, %v2226_v0  ;;  %v8158_v11 = vpack.c.bf16 %v2746_v4, %v2745_v9 }
 0x205   :  { %vm2555_vm9 = vcmp.ge.f32.partialorder %v2221_v7, 0.0  ;;  %v2651_v12 = vmul.f32 0.01, %v2221_v7  ;;  %v7294_v13 = vpop.f32.mrb[86].mxu0 }
 0x206   :  { %v2236_v15 = vadd.f32 %v7294_v13, %v9200_v6  ;;  %v2230_v16 = vpop.f32.mrb[87].mxu0  ;;  %7482 = vmatmul.mubr.msk.f32.gmra.mrb[76].mxu1 %vm142_vm0, %v9250_v14  ;;  %8159 = vmatprep.subr.bf16.mxu1 %v8158_v11  ;;  %v2748_v18 = vsel %vm2556_vm8, %v2226_v0, %v2652_v10 }
 0x207   :  { %v2231_v19 = vadd.f32 %v9200_v6, %v2230_v16  ;;  %8161 = vmatpush3.bf16.msra.mxu1 %v8158_v11  ;;  %7496 = vmatprep.mubr.msk.f32.mxu1 %vm142_vm0, %v9258_v17  ;;  %v2747_v20 = vsel %vm2555_vm9, %v2221_v7, %v2651_v12 }
 0x208   :  { %vm2558_vm10 = vcmp.ge.f32.partialorder %v2236_v15, 0.0  ;;  %v2654_v21 = vmul.f32 0.01, %v2236_v15  ;;  %v8162_v22 = vpack.c.bf16 %v2748_v18, %v2747_v20 }
 0x209   :  { %vm2557_vm11 = vcmp.ge.f32.partialorder %v2231_v19, 0.0  ;;  %v2653_v23 = vmul.f32 0.01, %v2231_v19  ;;  %v7297_v24 = vpop.f32.mrb[88].mxu0 }
 0x20a   :  { %v2246_v25 = vadd.f32 %v7297_v24, %v9200_v6  ;;  %v2240_v26 = vpop.f32.mrb[89].mxu0  ;;  %7497 = vmatmul.mubr.msk.f32.vlgmr.msra.gmra.mrb[78].mxu1 %vm142_vm0, %v9218_v52  ;;  %8163 = vmatprep.subr.bf16.mxu1 %v8162_v22  ;;  %v2750_v28 = vsel %vm2558_vm10, %v2236_v15, %v2654_v21 }
 0x20b   :  { %v2241_v32 = vadd.f32 %v9200_v6, %v2240_v26  ;;  %8165 = vmatpush3.bf16.msra.mxu1 %v8162_v22  ;;  %7499 = vmatprep.mubr.msk.f32.mxu1 %vm142_vm0, %v9226_v55  ;;  %v2749_v33 = vsel %vm2557_vm11, %v2231_v19, %v2653_v23 }
 0x20c   :  { %vm2560_vm12 = vcmp.ge.f32.partialorder %v2246_v25, 0.0  ;;  %v2656_v27 = vmul.f32 0.01, %v2246_v25  ;;  %v8166_v30 = vpack.c.bf16 %v2750_v28, %v2749_v33 }
 0x20d   :  { %vm2559_vm13 = vcmp.ge.f32.partialorder %v2241_v32, 0.0  ;;  %v2655_v36 = vmul.f32 0.01, %v2241_v32  ;;  %v7300_v35 = vpop.f32.mrb[90].mxu0 }
 0x20e   :  { %v2256_v37 = vadd.f32 %v7300_v35, %v9200_v6  ;;  %v2250_v38 = vpop.f32.mrb[91].mxu0  ;;  %7500 = vmatmul.mubr.msk.f32.gmra.mrb[80].mxu1 %vm142_vm0, %v9234_v63  ;;  %8167 = vmatprep.subr.bf16.mxu1 %v8166_v30  ;;  %v2752_v39 = vsel %vm2560_vm12, %v2246_v25, %v2656_v27 }
 0x20f   :  { %v2251_v43 = vadd.f32 %v9200_v6, %v2250_v38  ;;  %8169 = vmatpush3.bf16.msra.mxu1 %v8166_v30  ;;  %7502 = vmatprep.mubr.msk.f32.mxu1 %vm142_vm0, %v9242_v3  ;;  %v2751_v40 = vsel %vm2559_vm13, %v2241_v32, %v2655_v36 }
 0x210   :  { %vm2562_vm14 = vcmp.ge.f32.partialorder %v2256_v37, 0.0  ;;  %v2658_v41 = vmul.f32 0.01, %v2256_v37  ;;  %v8170_v8 = vpack.c.bf16 %v2752_v39, %v2751_v40 }
 0x211   :  { %vm2561_vm15 = vcmp.ge.f32.partialorder %v2251_v43, 0.0  ;;  %v2657_v42 = vmul.f32 0.01, %v2251_v43  ;;  %v7303_v44 = vpop.f32.mrb[92].mxu0 }
 0x212   :  { %v2266_v45 = vadd.f32 %v7303_v44, %v9200_v6  ;;  %v2260_v46 = vpop.f32.mrb[93].mxu0  ;;  %7503 = vmatmul.mubr.msk.f32.gmra.mrb[82].mxu1 %vm142_vm0, %v9250_v14  ;;  %8171 = vmatprep.subr.bf16.mxu1 %v8170_v8  ;;  %v2754_v47 = vsel %vm2562_vm14, %v2256_v37, %v2658_v41 }
 0x213   :  { %v2261_v48 = vadd.f32 %v9200_v6, %v2260_v46  ;;  %8173 = vmatpush3.bf16.msra.mxu1 %v8170_v8  ;;  %7517 = vmatprep.mubr.msk.f32.mxu1 %vm142_vm0, %v9258_v17  ;;  %v2753_v49 = vsel %vm2561_vm15, %v2251_v43, %v2657_v42 }
 0x214   :  { %vm2564_vm1 = vcmp.ge.f32.partialorder %v2266_v45, 0.0  ;;  %v2660_v50 = vmul.f32 0.01, %v2266_v45  ;;  %v8174_v51 = vpack.c.bf16 %v2754_v47, %v2753_v49 }
 0x215   :  { %vm2563_vm2 = vcmp.ge.f32.partialorder %v2261_v48, 0.0  ;;  %v2659_v53 = vmul.f32 0.01, %v2261_v48  ;;  %v7306_v54 = vpop.f32.mrb[94].mxu0 }
 0x216   :  { %v2276_v57 = vadd.f32 %v7306_v54, %v9200_v6  ;;  %v2270_v58 = vpop.f32.mrb[95].mxu0  ;;  %7518 = vmatmul.mubr.msk.f32.vlgmr.msra.gmra.mrb[84].mxu1 %vm142_vm0, %v9218_v52  ;;  %8175 = vmatprep.subr.bf16.mxu1 %v8174_v51  ;;  %v2756_v59 = vsel %vm2564_vm1, %v2266_v45, %v2660_v50 }
 0x217   :  { %v2271_v60 = vadd.f32 %v9200_v6, %v2270_v58  ;;  %8177 = vmatpush3.bf16.msra.mxu1 %v8174_v51  ;;  %7520 = vmatprep.mubr.msk.f32.mxu1 %vm142_vm0, %v9226_v55  ;;  %v2755_v61 = vsel %vm2563_vm2, %v2261_v48, %v2659_v53 }
 0x218   :  { %vm2566_vm3 = vcmp.ge.f32.partialorder %v2276_v57, 0.0  ;;  %v2662_v62 = vmul.f32 0.01, %v2276_v57  ;;  %v8178_v0 = vpack.c.bf16 %v2756_v59, %v2755_v61 }
 0x219   :  { %vm2565_vm4 = vcmp.ge.f32.partialorder %v2271_v60, 0.0  ;;  %v2661_v1 = vmul.f32 0.01, %v2271_v60  ;;  %v7309_v4 = vpop.f32.mrb[96].mxu0 }
 0x21a   :  { %v2286_v7 = vadd.f32 %v7309_v4, %v9200_v6  ;;  %v2280_v9 = vpop.f32.mrb[97].mxu0  ;;  %7521 = vmatmul.mubr.msk.f32.gmra.mrb[86].mxu1 %vm142_vm0, %v9234_v63  ;;  %8179 = vmatprep.subr.bf16.mxu1 %v8178_v0  ;;  %v2758_v10 = vsel %vm2566_vm3, %v2276_v57, %v2662_v62 }
 0x21b   :  { %v2281_v11 = vadd.f32 %v9200_v6, %v2280_v9  ;;  %8181 = vmatpush3.bf16.msra.mxu1 %v8178_v0  ;;  %7523 = vmatprep.mubr.msk.f32.mxu1 %vm142_vm0, %v9242_v3  ;;  %v2757_v12 = vsel %vm2565_vm4, %v2271_v60, %v2661_v1 }
 0x21c   :  { %vm2568_vm5 = vcmp.ge.f32.partialorder %v2286_v7, 0.0  ;;  %v2664_v13 = vmul.f32 0.01, %v2286_v7  ;;  %v8182_v15 = vpack.c.bf16 %v2758_v10, %v2757_v12 }
 0x21d   :  { %vm2567_vm6 = vcmp.ge.f32.partialorder %v2281_v11, 0.0  ;;  %v2663_v16 = vmul.f32 0.01, %v2281_v11  ;;  %v7312_v18 = vpop.f32.mrb[98].mxu0 }
 0x21e   :  { %v2296_v19 = vadd.f32 %v7312_v18, %v9200_v6  ;;  %v2290_v20 = vpop.f32.mrb[99].mxu0  ;;  %7524 = vmatmul.mubr.msk.f32.gmra.mrb[88].mxu1 %vm142_vm0, %v9250_v14  ;;  %8183 = vmatprep.subr.bf16.mxu1 %v8182_v15  ;;  %v2760_v21 = vsel %vm2568_vm5, %v2286_v7, %v2664_v13 }
 0x21f   :  { %v2291_v22 = vadd.f32 %v9200_v6, %v2290_v20  ;;  %8185 = vmatpush3.bf16.msra.mxu1 %v8182_v15  ;;  %7538 = vmatprep.mubr.msk.f32.mxu1 %vm142_vm0, %v9258_v17  ;;  %v2759_v23 = vsel %vm2567_vm6, %v2281_v11, %v2663_v16 }
 0x220   :  { %vm2570_vm7 = vcmp.ge.f32.partialorder %v2296_v19, 0.0  ;;  %v2666_v24 = vmul.f32 0.01, %v2296_v19  ;;  %v8186_v25 = vpack.c.bf16 %v2760_v21, %v2759_v23 }
 0x221   :  { %vm2569_vm8 = vcmp.ge.f32.partialorder %v2291_v22, 0.0  ;;  %v2665_v26 = vmul.f32 0.01, %v2291_v22  ;;  %v7315_v28 = vpop.f32.mrb[100].mxu0 }
 0x222   :  { %v2306_v29 = vadd.f32 %v7315_v28, %v9200_v6  ;;  %v2300_v31 = vpop.f32.mrb[101].mxu0  ;;  %7539 = vmatmul.mubr.msk.f32.vlgmr.msra.gmra.mrb[90].mxu1 %vm142_vm0, %v9218_v52  ;;  %8187 = vmatprep.subr.bf16.mxu1 %v8186_v25  ;;  %v2762_v32 = vsel %vm2570_vm7, %v2296_v19, %v2666_v24 }
 0x223   :  { %v2301_v33 = vadd.f32 %v9200_v6, %v2300_v31  ;;  %8189 = vmatpush3.bf16.msra.mxu1 %v8186_v25  ;;  %7541 = vmatprep.mubr.msk.f32.mxu1 %vm142_vm0, %v9226_v55  ;;  %v2761_v27 = vsel %vm2569_vm8, %v2291_v22, %v2665_v26 }
 0x224   :  { %vm2572_vm9 = vcmp.ge.f32.partialorder %v2306_v29, 0.0  ;;  %v2668_v30 = vmul.f32 0.01, %v2306_v29  ;;  %v8190_v36 = vpack.c.bf16 %v2762_v32, %v2761_v27 }
 0x225   :  { %vm2571_vm10 = vcmp.ge.f32.partialorder %v2301_v33, 0.0  ;;  %v2667_v35 = vmul.f32 0.01, %v2301_v33  ;;  %v7318_v37 = vpop.f32.mrb[102].mxu0 }
 0x226   :  { %v2316_v38 = vadd.f32 %v7318_v37, %v9200_v6  ;;  %v2310_v39 = vpop.f32.mrb[103].mxu0  ;;  %7542 = vmatmul.mubr.msk.f32.gmra.mrb[92].mxu1 %vm142_vm0, %v9234_v63  ;;  %8191 = vmatprep.subr.bf16.mxu1 %v8190_v36  ;;  %v2764_v43 = vsel %vm2572_vm9, %v2306_v29, %v2668_v30 }
 0x227   :  { %v2311_v40 = vadd.f32 %v9200_v6, %v2310_v39  ;;  %8193 = vmatpush3.bf16.msra.mxu1 %v8190_v36  ;;  %7544 = vmatprep.mubr.msk.f32.mxu1 %vm142_vm0, %v9242_v3  ;;  %v2763_v41 = vsel %vm2571_vm10, %v2301_v33, %v2667_v35 }
 0x228   :  { %vm2574_vm11 = vcmp.ge.f32.partialorder %v2316_v38, 0.0  ;;  %v2670_v8 = vmul.f32 0.01, %v2316_v38  ;;  %v8194_v42 = vpack.c.bf16 %v2764_v43, %v2763_v41 }
 0x229   :  { %vm2573_vm12 = vcmp.ge.f32.partialorder %v2311_v40, 0.0  ;;  %v2669_v44 = vmul.f32 0.01, %v2311_v40  ;;  %v7321_v45 = vpop.f32.mrb[104].mxu0 }
 0x22a   :  { %v2326_v46 = vadd.f32 %v7321_v45, %v9200_v6  ;;  %v2320_v47 = vpop.f32.mrb[105].mxu0  ;;  %7545 = vmatmul.mubr.msk.f32.gmra.mrb[94].mxu1 %vm142_vm0, %v9250_v14  ;;  %8195 = vmatprep.subr.bf16.mxu1 %v8194_v42  ;;  %v2766_v48 = vsel %vm2574_vm11, %v2316_v38, %v2670_v8 }
 0x22b   :  { %v2321_v49 = vadd.f32 %v9200_v6, %v2320_v47  ;;  %8197 = vmatpush3.bf16.msra.mxu1 %v8194_v42  ;;  %7559 = vmatprep.mubr.msk.f32.mxu1 %vm142_vm0, %v9258_v17  ;;  %v2765_v50 = vsel %vm2573_vm12, %v2311_v40, %v2669_v44 }
 0x22c   :  { %vm2576_vm13 = vcmp.ge.f32.partialorder %v2326_v46, 0.0  ;;  %v2672_v51 = vmul.f32 0.01, %v2326_v46  ;;  %v8198_v53 = vpack.c.bf16 %v2766_v48, %v2765_v50  ;;  %v9444_v50 = vld [vmem:[%s10083_s3 + $0x18] ss:$0 sm:$0xff] }
 0x22d   :  { %vm2575_vm14 = vcmp.ge.f32.partialorder %v2321_v49, 0.0  ;;  %v2671_v54 = vmul.f32 0.01, %v2321_v49  ;;  %v7324_v57 = vpop.f32.mrb[106].mxu0 }
 0x22e   :  { %v2336_v58 = vadd.f32 %v7324_v57, %v9200_v6  ;;  %v2330_v59 = vpop.f32.mrb[107].mxu0  ;;  %7560 = vmatmul.mubr.msk.f32.vlgmr.msra.gmra.mrb[96].mxu1 %vm142_vm0, %v9218_v52  ;;  %8199 = vmatprep.subr.bf16.mxu1 %v8198_v53  ;;  %v2768_v60 = vsel %vm2576_vm13, %v2326_v46, %v2672_v51 }
 0x22f   :  { %v2331_v61 = vadd.f32 %v9200_v6, %v2330_v59  ;;  %8201 = vmatpush3.bf16.msra.mxu1 %v8198_v53  ;;  %7562 = vmatprep.mubr.msk.f32.mxu1 %vm142_vm0, %v9226_v55  ;;  %v2767_v62 = vsel %vm2575_vm14, %v2321_v49, %v2671_v54 }
 0x230   :  { %vm2578_vm15 = vcmp.ge.f32.partialorder %v2336_v58, 0.0  ;;  %v2674_v0 = vmul.f32 0.01, %v2336_v58  ;;  %v8202_v1 = vpack.c.bf16 %v2768_v60, %v2767_v62 }
 0x231   :  { %vm2577_vm1 = vcmp.ge.f32.partialorder %v2331_v61, 0.0  ;;  %v2673_v4 = vmul.f32 0.01, %v2331_v61  ;;  %v7327_v7 = vpop.f32.mrb[108].mxu0 }
 0x232   :  { %v2346_v9 = vadd.f32 %v7327_v7, %v9200_v6  ;;  %v2340_v10 = vpop.f32.mrb[109].mxu0  ;;  %7563 = vmatmul.mubr.msk.f32.gmra.mrb[98].mxu1 %vm142_vm0, %v9234_v63  ;;  %8203 = vmatprep.subr.bf16.mxu1 %v8202_v1  ;;  %v2770_v11 = vsel %vm2578_vm15, %v2336_v58, %v2674_v0 }
 0x233   :  { %v2341_v12 = vadd.f32 %v9200_v6, %v2340_v10  ;;  %8205 = vmatpush3.bf16.msra.mxu1 %v8202_v1  ;;  %7565 = vmatprep.mubr.msk.f32.mxu1 %vm142_vm0, %v9242_v3  ;;  %v2769_v13 = vsel %vm2577_vm1, %v2331_v61, %v2673_v4 }
 0x234   :  { %vm2580_vm2 = vcmp.ge.f32.partialorder %v2346_v9, 0.0  ;;  %v2676_v15 = vmul.f32 0.01, %v2346_v9  ;;  %v8206_v16 = vpack.c.bf16 %v2770_v11, %v2769_v13 }
 0x235   :  { %vm2579_vm3 = vcmp.ge.f32.partialorder %v2341_v12, 0.0  ;;  %v2675_v18 = vmul.f32 0.01, %v2341_v12  ;;  %v7330_v19 = vpop.f32.mrb[110].mxu0 }
 0x236   :  { %v2356_v20 = vadd.f32 %v7330_v19, %v9200_v6  ;;  %v2350_v21 = vpop.f32.mrb[111].mxu0  ;;  %7566 = vmatmul.mubr.msk.f32.gmra.mrb[100].mxu1 %vm142_vm0, %v9250_v14  ;;  %8207 = vmatprep.subr.bf16.mxu1 %v8206_v16  ;;  %v2772_v22 = vsel %vm2580_vm2, %v2346_v9, %v2676_v15 }
 0x237   :  { %v2351_v23 = vadd.f32 %v9200_v6, %v2350_v21  ;;  %8209 = vmatpush3.bf16.msra.mxu1 %v8206_v16  ;;  %7580 = vmatprep.mubr.msk.f32.mxu1 %vm142_vm0, %v9258_v17  ;;  %v2771_v24 = vsel %vm2579_vm3, %v2341_v12, %v2675_v18 }
 0x238   :  { %vm2582_vm4 = vcmp.ge.f32.partialorder %v2356_v20, 0.0  ;;  %v2678_v25 = vmul.f32 0.01, %v2356_v20  ;;  %v8210_v26 = vpack.c.bf16 %v2772_v22, %v2771_v24 }
 0x239   :  { %vm2581_vm5 = vcmp.ge.f32.partialorder %v2351_v23, 0.0  ;;  %v2677_v28 = vmul.f32 0.01, %v2351_v23  ;;  %v7333_v29 = vpop.f32.mrb[112].mxu0 }
 0x23a   :  { %v2366_v31 = vadd.f32 %v7333_v29, %v9200_v6  ;;  %v2360_v32 = vpop.f32.mrb[113].mxu0  ;;  %7581 = vmatmul.mubr.msk.f32.vlgmr.msra.gmra.mrb[102].mxu1 %vm142_vm0, %v9218_v52  ;;  %8211 = vmatprep.subr.bf16.mxu1 %v8210_v26  ;;  %v2774_v33 = vsel %vm2582_vm4, %v2356_v20, %v2678_v25 }
 0x23b   :  { %v2361_v27 = vadd.f32 %v9200_v6, %v2360_v32  ;;  %8213 = vmatpush3.bf16.msra.mxu1 %v8210_v26  ;;  %7583 = vmatprep.mubr.msk.f32.mxu1 %vm142_vm0, %v9226_v55  ;;  %v2773_v30 = vsel %vm2581_vm5, %v2351_v23, %v2677_v28 }
 0x23c   :  { %vm2584_vm6 = vcmp.ge.f32.partialorder %v2366_v31, 0.0  ;;  %v2680_v36 = vmul.f32 0.01, %v2366_v31  ;;  %v8214_v35 = vpack.c.bf16 %v2774_v33, %v2773_v30 }
 0x23d   :  { %vm2583_vm7 = vcmp.ge.f32.partialorder %v2361_v27, 0.0  ;;  %v2679_v37 = vmul.f32 0.01, %v2361_v27  ;;  %v7336_v38 = vpop.f32.mrb[114].mxu0 }
 0x23e   :  { %v2376_v39 = vadd.f32 %v7336_v38, %v9200_v6  ;;  %v2370_v43 = vpop.f32.mrb[115].mxu0  ;;  %7584 = vmatmul.mubr.msk.f32.gmra.mrb[104].mxu1 %vm142_vm0, %v9234_v63  ;;  %8215 = vmatprep.subr.bf16.mxu1 %v8214_v35  ;;  %v2776_v40 = vsel %vm2584_vm6, %v2366_v31, %v2680_v36 }
 0x23f   :  { %v2371_v41 = vadd.f32 %v9200_v6, %v2370_v43  ;;  %8217 = vmatpush3.bf16.msra.mxu1 %v8214_v35  ;;  %7586 = vmatprep.mubr.msk.f32.mxu1 %vm142_vm0, %v9242_v3  ;;  %v2775_v8 = vsel %vm2583_vm7, %v2361_v27, %v2679_v37 }
 0x240   :  { %vm2586_vm8 = vcmp.ge.f32.partialorder %v2376_v39, 0.0  ;;  %v2682_v42 = vmul.f32 0.01, %v2376_v39  ;;  %v8218_v44 = vpack.c.bf16 %v2776_v40, %v2775_v8 }
 0x241   :  { %vm2585_vm9 = vcmp.ge.f32.partialorder %v2371_v41, 0.0  ;;  %v2681_v45 = vmul.f32 0.01, %v2371_v41  ;;  %v7339_v46 = vpop.f32.mrb[116].mxu0 }
 0x242   :  { %v2386_v47 = vadd.f32 %v7339_v46, %v9200_v6  ;;  %v2380_v48 = vpop.f32.mrb[117].mxu0  ;;  %7587 = vmatmul.mubr.msk.f32.gmra.mrb[106].mxu1 %vm142_vm0, %v9250_v14  ;;  %8219 = vmatprep.subr.bf16.mxu1 %v8218_v44  ;;  %v2778_v49 = vsel %vm2586_vm8, %v2376_v39, %v2682_v42 }
 0x243   :  { %v2381_v51 = vadd.f32 %v9444_v50, %v2380_v48  ;;  %8221 = vmatpush3.bf16.msra.mxu1 %v8218_v44  ;;  %7601 = vmatprep.mubr.msk.f32.mxu1 %vm142_vm0, %v9258_v17  ;;  %v2777_v53 = vsel %vm2585_vm9, %v2371_v41, %v2681_v45 }
 0x244   :  { %vm2588_vm10 = vcmp.ge.f32.partialorder %v2386_v47, 0.0  ;;  %v2684_v6 = vmul.f32 0.01, %v2386_v47  ;;  %v8222_v54 = vpack.c.bf16 %v2778_v49, %v2777_v53 }
 0x245   :  { %vm2587_vm11 = vcmp.ge.f32.partialorder %v2381_v51, 0.0  ;;  %v2683_v57 = vmul.f32 0.01, %v2381_v51  ;;  %v7342_v58 = vpop.f32.mrb[118].mxu0 }
 0x246   :  { %v2396_v59 = vadd.f32 %v9444_v50, %v7342_v58  ;;  %v2390_v60 = vpop.f32.mrb[119].mxu0  ;;  %7602 = vmatmul.mubr.msk.f32.vlgmr.msra.gmra.mrb[108].mxu1 %vm142_vm0, %v9218_v52  ;;  %8223 = vmatprep.subr.bf16.mxu1 %v8222_v54  ;;  %v2780_v61 = vsel %vm2588_vm10, %v2386_v47, %v2684_v6 }
 0x247   :  { %v2391_v62 = vadd.f32 %v9444_v50, %v2390_v60  ;;  %8225 = vmatpush3.bf16.msra.mxu1 %v8222_v54  ;;  %7604 = vmatprep.mubr.msk.f32.mxu1 %vm142_vm0, %v9226_v55  ;;  %v2779_v0 = vsel %vm2587_vm11, %v2381_v51, %v2683_v57 }
 0x248   :  { %vm2590_vm12 = vcmp.ge.f32.partialorder %v2396_v59, 0.0  ;;  %v2686_v1 = vmul.f32 0.01, %v2396_v59  ;;  %v8226_v4 = vpack.c.bf16 %v2780_v61, %v2779_v0 }
 0x249   :  { %vm2589_vm13 = vcmp.ge.f32.partialorder %v2391_v62, 0.0  ;;  %v2685_v7 = vmul.f32 0.01, %v2391_v62  ;;  %v7345_v9 = vpop.f32.mrb[120].mxu0 }
 0x24a   :  { %v2406_v10 = vadd.f32 %v9444_v50, %v7345_v9  ;;  %v2400_v11 = vpop.f32.mrb[121].mxu0  ;;  %7605 = vmatmul.mubr.msk.f32.gmra.mrb[110].mxu1 %vm142_vm0, %v9234_v63  ;;  %8227 = vmatprep.subr.bf16.mxu1 %v8226_v4  ;;  %v2782_v12 = vsel %vm2590_vm12, %v2396_v59, %v2686_v1  ;;  %v9497_v59 = vld [vmem:[%s10080_s0 + $0x10] sm:$0xff]  ;;  %v9505_v9 = vld [vmem:[%s10080_s0 + $0x18] sm:$0xff] }
 0x24b   :  { %v2401_v13 = vadd.f32 %v9444_v50, %v2400_v11  ;;  %8229 = vmatpush3.bf16.msra.mxu1 %v8226_v4  ;;  %7607 = vmatprep.mubr.msk.f32.mxu1 %vm142_vm0, %v9242_v3  ;;  %v2781_v15 = vsel %vm2589_vm13, %v2391_v62, %v2685_v7 }
 0x24c   :  { %vm2592_vm14 = vcmp.ge.f32.partialorder %v2406_v10, 0.0  ;;  %v2688_v16 = vmul.f32 0.01, %v2406_v10  ;;  %v8230_v18 = vpack.c.bf16 %v2782_v12, %v2781_v15  ;;  %v9513_v12 = vld [vmem:[%s10080_s0 + $0x20] sm:$0xff] }
 0x24d   :  { %vm2591_vm15 = vcmp.ge.f32.partialorder %v2401_v13, 0.0  ;;  %v2687_v19 = vmul.f32 0.01, %v2401_v13  ;;  %v7348_v20 = vpop.f32.mrb[122].mxu0 }
 0x24e   :  { %v2416_v21 = vadd.f32 %v9444_v50, %v7348_v20  ;;  %v2410_v22 = vpop.f32.mrb[123].mxu0  ;;  %7608 = vmatmul.mubr.msk.f32.gmra.mrb[112].mxu1 %vm142_vm0, %v9250_v14  ;;  %8231 = vmatprep.subr.bf16.mxu1 %v8230_v18  ;;  %v2784_v23 = vsel %vm2592_vm14, %v2406_v10, %v2688_v16 }
 0x24f   :  { %v2411_v24 = vadd.f32 %v9444_v50, %v2410_v22  ;;  %8233 = vmatpush3.bf16.msra.mxu1 %v8230_v18  ;;  %7622 = vmatprep.mubr.msk.f32.mxu1 %vm142_vm0, %v9258_v17  ;;  %v2783_v25 = vsel %vm2591_vm15, %v2401_v13, %v2687_v19  ;;  %v9521_v22 = vld [vmem:[%s10080_s0 + $0x28] sm:$0xff] }
 0x250   :  { %vm2594_vm1 = vcmp.ge.f32.partialorder %v2416_v21, 0.0  ;;  %v2690_v26 = vmul.f32 0.01, %v2416_v21  ;;  %v8234_v28 = vpack.c.bf16 %v2784_v23, %v2783_v25  ;;  %v9529_v25 = vld [vmem:[%s10080_s0] sm:$0xff] }
 0x251   :  { %vm2593_vm2 = vcmp.ge.f32.partialorder %v2411_v24, 0.0  ;;  %v2689_v29 = vmul.f32 0.01, %v2411_v24  ;;  %v7351_v31 = vpop.f32.mrb[124].mxu0 }
 0x252   :  { %v2426_v32 = vadd.f32 %v9444_v50, %v7351_v31  ;;  %v2420_v33 = vpop.f32.mrb[125].mxu0  ;;  %7623 = vmatmul.mubr.msk.f32.vlgmr.msra.gmra.mrb[114].mxu1 %vm142_vm0, %v9218_v52  ;;  %8235 = vmatprep.subr.bf16.mxu1 %v8234_v28  ;;  %v2786_v27 = vsel %vm2594_vm1, %v2416_v21, %v2690_v26 }
 0x253   :  { %v2421_v30 = vadd.f32 %v9444_v50, %v2420_v33  ;;  %8237 = vmatpush3.bf16.msra.mxu1 %v8234_v28  ;;  %7625 = vmatprep.mubr.msk.f32.mxu1 %vm142_vm0, %v9226_v55  ;;  %v2785_v36 = vsel %vm2593_vm2, %v2411_v24, %v2689_v29 }
 0x254   :  { %vm2596_vm3 = vcmp.ge.f32.partialorder %v2426_v32, 0.0  ;;  %v2692_v35 = vmul.f32 0.01, %v2426_v32  ;;  %v8238_v37 = vpack.c.bf16 %v2786_v27, %v2785_v36 }
 0x255   :  { %vm2595_vm4 = vcmp.ge.f32.partialorder %v2421_v30, 0.0  ;;  %v2691_v38 = vmul.f32 0.01, %v2421_v30  ;;  %v7354_v39 = vpop.f32.mrb[126].mxu0 }
 0x256   :  { %v2436_v43 = vadd.f32 %v9444_v50, %v7354_v39  ;;  %v2430_v40 = vpop.f32.mrb[127].mxu0  ;;  %7626 = vmatmul.mubr.msk.f32.gmra.mrb[116].mxu1 %vm142_vm0, %v9234_v63  ;;  %8239 = vmatprep.subr.bf16.mxu1 %v8238_v37  ;;  %v2788_v52 = vsel %vm2596_vm3, %v2426_v32, %v2692_v35 }
 0x257   :  { %v2431_v41 = vadd.f32 %v9444_v50, %v2430_v40  ;;  %8241 = vmatpush3.bf16.msra.mxu1 %v8238_v37  ;;  %7628 = vmatprep.mubr.msk.f32.mxu1 %vm142_vm0, %v9242_v3  ;;  %v2787_v55 = vsel %vm2595_vm4, %v2421_v30, %v2691_v38 }
 0x258   :  { %vm2598_vm5 = vcmp.ge.f32.partialorder %v2436_v43, 0.0  ;;  %v2694_v8 = vmul.f32 0.01, %v2436_v43  ;;  %v8242_v42 = vpack.c.bf16 %v2788_v52, %v2787_v55 }
 0x259   :  { %vm2597_vm6 = vcmp.ge.f32.partialorder %v2431_v41, 0.0  ;;  %v2693_v44 = vmul.f32 0.01, %v2431_v41  ;;  %v7357_v45 = vpop.f32.mrb[128].mxu0 }
 0x25a   :  { %v2446_v46 = vadd.f32 %v9444_v50, %v7357_v45  ;;  %v2440_v47 = vpop.f32.mrb[129].mxu0  ;;  %7629 = vmatmul.mubr.msk.f32.gmra.mrb[118].mxu1 %vm142_vm0, %v9250_v14  ;;  %8243 = vmatprep.subr.bf16.mxu1 %v8242_v42  ;;  %v2790_v63 = vsel %vm2598_vm5, %v2436_v43, %v2694_v8  ;;  %v9489_v14 = vld [vmem:[%s10080_s0 + $0x8] sm:$0xff] }
 0x25b   :  { %v2441_v48 = vadd.f32 %v9444_v50, %v2440_v47  ;;  %8245 = vmatpush3.bf16.msra.mxu1 %v8242_v42  ;;  %7643 = vmatprep.mubr.msk.f32.mxu1 %vm142_vm0, %v9258_v17  ;;  %v2789_v3 = vsel %vm2597_vm6, %v2431_v41, %v2693_v44 }
 0x25c   :  { %vm2600_vm7 = vcmp.ge.f32.partialorder %v2446_v46, 0.0  ;;  %v2696_v49 = vmul.f32 0.01, %v2446_v46  ;;  %v8246_v51 = vpack.c.bf16 %v2790_v63, %v2789_v3 }
 0x25d   :  { %vm2599_vm8 = vcmp.ge.f32.partialorder %v2441_v48, 0.0  ;;  %v2695_v53 = vmul.f32 0.01, %v2441_v48  ;;  %v7360_v6 = vpop.f32.mrb[130].mxu0 }
 0x25e   :  { %v2456_v54 = vadd.f32 %v9444_v50, %v7360_v6  ;;  %v2450_v57 = vpop.f32.mrb[131].mxu0  ;;  %7644 = vmatmul.mubr.msk.f32.vlgmr.msra.gmra.mrb[120].mxu1 %vm142_vm0, %v9489_v14  ;;  %8247 = vmatprep.subr.bf16.mxu1 %v8246_v51  ;;  %v2792_v17 = vsel %vm2600_vm7, %v2446_v46, %v2696_v49 }
 0x25f   :  { %v2451_v58 = vadd.f32 %v9444_v50, %v2450_v57  ;;  %8249 = vmatpush3.bf16.msra.mxu1 %v8246_v51  ;;  %7646 = vmatprep.mubr.msk.f32.mxu1 %vm142_vm0, %v9497_v59  ;;  %v2791_v60 = vsel %vm2599_vm8, %v2441_v48, %v2695_v53  ;;  %vm4331_vm8 = vcmask 523264  }
 0x260   :  { %vm2602_vm9 = vcmp.ge.f32.partialorder %v2456_v54, 0.0  ;;  %v2698_v61 = vmul.f32 0.01, %v2456_v54  ;;  %v8250_v62 = vpack.c.bf16 %v2792_v17, %v2791_v60 }
 0x261   :  { %vm2601_vm10 = vcmp.ge.f32.partialorder %v2451_v58, 0.0  ;;  %v2697_v0 = vmul.f32 0.01, %v2451_v58  ;;  %v7363_v1 = vpop.f32.mrb[132].mxu0 }
 0x262   :  { %v2466_v4 = vadd.f32 %v9444_v50, %v7363_v1  ;;  %v2460_v7 = vpop.f32.mrb[133].mxu0  ;;  %7647 = vmatmul.mubr.msk.f32.gmra.mrb[122].mxu1 %vm142_vm0, %v9505_v9  ;;  %8251 = vmatprep.subr.bf16.mxu1 %v8250_v62  ;;  %v2794_v10 = vsel %vm2602_vm9, %v2456_v54, %v2698_v61 }
 0x263   :  { %v2461_v11 = vadd.f32 %v9444_v50, %v2460_v7  ;;  %8253 = vmatpush3.bf16.msra.mxu1 %v8250_v62  ;;  %7649 = vmatprep.mubr.msk.f32.mxu1 %vm142_vm0, %v9513_v12  ;;  %v2793_v13 = vsel %vm2601_vm10, %v2451_v58, %v2697_v0 }
 0x264   :  { %vm2604_vm11 = vcmp.ge.f32.partialorder %v2466_v4, 0.0  ;;  %v2700_v15 = vmul.f32 0.01, %v2466_v4  ;;  %v8254_v16 = vpack.c.bf16 %v2794_v10, %v2793_v13 }
 0x265   :  { %vm2603_vm12 = vcmp.ge.f32.partialorder %v2461_v11, 0.0  ;;  %v2699_v18 = vmul.f32 0.01, %v2461_v11  ;;  %v7366_v19 = vpop.f32.mrb[134].mxu0 }
 0x266   :  { %v2476_v20 = vadd.f32 %v9444_v50, %v7366_v19  ;;  %v2470_v21 = vpop.f32.mrb[135].mxu0  ;;  %7650 = vmatmul.mubr.msk.f32.gmra.mrb[124].mxu1 %vm142_vm0, %v9521_v22  ;;  %8255 = vmatprep.subr.bf16.mxu1 %v8254_v16  ;;  %v2796_v23 = vsel %vm2604_vm11, %v2466_v4, %v2700_v15 }
 0x267   :  { %v2471_v24 = vadd.f32 %v9444_v50, %v2470_v21  ;;  %8257 = vmatpush3.bf16.msra.mxu1 %v8254_v16  ;;  %7664 = vmatprep.mubr.msk.f32.mxu1 %vm142_vm0, %v9529_v25  ;;  %v2795_v26 = vsel %vm2603_vm12, %v2461_v11, %v2699_v18 }
 0x268   :  { %vm2606_vm13 = vcmp.ge.f32.partialorder %v2476_v20, 0.0  ;;  %v2702_v28 = vmul.f32 0.01, %v2476_v20  ;;  %v8258_v29 = vpack.c.bf16 %v2796_v23, %v2795_v26 }
 0x269   :  { %vm2605_vm14 = vcmp.ge.f32.partialorder %v2471_v24, 0.0  ;;  %v2701_v31 = vmul.f32 0.01, %v2471_v24  ;;  %v7369_v32 = vpop.f32.mrb[136].mxu0 }
 0x26a   :  { %v2486_v33 = vadd.f32 %v9444_v50, %v7369_v32  ;;  %v2480_v27 = vpop.f32.mrb[137].mxu0  ;;  %7665 = vmatmul.mubr.msk.f32.vlgmr.msra.gmra.mrb[126].mxu1 %vm142_vm0, %v9489_v14  ;;  %8259 = vmatprep.subr.bf16.mxu1 %v8258_v29  ;;  %v2798_v30 = vsel %vm2606_vm13, %v2476_v20, %v2702_v28 }
 0x26b   :  { %v2481_v36 = vadd.f32 %v9444_v50, %v2480_v27  ;;  %8261 = vmatpush3.bf16.msra.mxu1 %v8258_v29  ;;  %7667 = vmatprep.mubr.msk.f32.mxu1 %vm142_vm0, %v9497_v59  ;;  %v2797_v35 = vsel %vm2605_vm14, %v2471_v24, %v2701_v31 }
 0x26c   :  { %vm2608_vm15 = vcmp.ge.f32.partialorder %v2486_v33, 0.0  ;;  %v2704_v37 = vmul.f32 0.01, %v2486_v33  ;;  %v8262_v38 = vpack.c.bf16 %v2798_v30, %v2797_v35 }
 0x26d   :  { %vm2607_vm1 = vcmp.ge.f32.partialorder %v2481_v36, 0.0  ;;  %v2703_v39 = vmul.f32 0.01, %v2481_v36  ;;  %v7372_v43 = vpop.f32.mrb[138].mxu0 }
 0x26e   :  { %v2496_v40 = vadd.f32 %v9444_v50, %v7372_v43  ;;  %v2490_v52 = vpop.f32.mrb[139].mxu0  ;;  %7668 = vmatmul.mubr.msk.f32.gmra.mrb[128].mxu1 %vm142_vm0, %v9505_v9  ;;  %8263 = vmatprep.subr.bf16.mxu1 %v8262_v38  ;;  %v2800_v41 = vsel %vm2608_vm15, %v2486_v33, %v2704_v37 }
 0x26f   :  { %v2491_v55 = vadd.f32 %v9444_v50, %v2490_v52  ;;  %8265 = vmatpush3.bf16.msra.mxu1 %v8262_v38  ;;  %7670 = vmatprep.mubr.msk.f32.mxu1 %vm142_vm0, %v9513_v12  ;;  %v2799_v8 = vsel %vm2607_vm1, %v2481_v36, %v2703_v39 }
 0x270   :  { %vm2610_vm2 = vcmp.ge.f32.partialorder %v2496_v40, 0.0  ;;  %v2706_v42 = vmul.f32 0.01, %v2496_v40  ;;  %v8266_v44 = vpack.c.bf16 %v2800_v41, %v2799_v8 }
 0x271   :  { %vm2609_vm3 = vcmp.ge.f32.partialorder %v2491_v55, 0.0  ;;  %v2705_v45 = vmul.f32 0.01, %v2491_v55  ;;  %v7375_v46 = vpop.f32.mrb[140].mxu0 }
 0x272   :  { %v2506_v47 = vadd.f32 %v9444_v50, %v7375_v46  ;;  %v2500_v63 = vpop.f32.mrb[141].mxu0  ;;  %7671 = vmatmul.mubr.msk.f32.gmra.mrb[130].mxu1 %vm142_vm0, %v9521_v22  ;;  %8267 = vmatprep.subr.bf16.mxu1 %v8266_v44  ;;  %v2802_v48 = vsel %vm2610_vm2, %v2496_v40, %v2706_v42 }
 0x273   :  { %v2501_v3 = vadd.f32 %v9444_v50, %v2500_v63  ;;  %8269 = vmatpush3.bf16.msra.mxu1 %v8266_v44  ;;  %7685 = vmatprep.mubr.msk.f32.mxu1 %vm142_vm0, %v9529_v25  ;;  %v2801_v49 = vsel %vm2609_vm3, %v2491_v55, %v2705_v45 }
 0x274   :  { %vm2612_vm4 = vcmp.ge.f32.partialorder %v2506_v47, 0.0  ;;  %v2708_v51 = vmul.f32 0.01, %v2506_v47  ;;  %v8270_v53 = vpack.c.bf16 %v2802_v48, %v2801_v49 }
 0x275   :  { %vm2611_vm5 = vcmp.ge.f32.partialorder %v2501_v3, 0.0  ;;  %v2707_v6 = vmul.f32 0.01, %v2501_v3  ;;  %v7378_v54 = vpop.f32.mrb[142].mxu0 }
 0x276   :  { %v2516_v57 = vadd.f32 %v9444_v50, %v7378_v54  ;;  %v2510_v17 = vpop.f32.mrb[143].mxu0  ;;  %7686 = vmatmul.mubr.msk.f32.vlgmr.msra.gmra.mrb[132].mxu1 %vm142_vm0, %v9489_v14  ;;  %8271 = vmatprep.subr.bf16.mxu1 %v8270_v53  ;;  %v2804_v58 = vsel %vm2612_vm4, %v2506_v47, %v2708_v51 }
 0x277   :  { %v2511_v60 = vadd.f32 %v9444_v50, %v2510_v17  ;;  %8273 = vmatpush3.bf16.msra.mxu1 %v8270_v53  ;;  %7688 = vmatprep.mubr.msk.f32.mxu1 %vm142_vm0, %v9497_v59  ;;  %v2803_v61 = vsel %vm2611_vm5, %v2501_v3, %v2707_v6 }
 0x278   :  { %vm2614_vm6 = vcmp.ge.f32.partialorder %v2516_v57, 0.0  ;;  %v2710_v62 = vmul.f32 0.01, %v2516_v57  ;;  %v8274_v0 = vpack.c.bf16 %v2804_v58, %v2803_v61 }
 0x279   :  { %vm2613_vm7 = vcmp.ge.f32.partialorder %v2511_v60, 0.0  ;;  %v2709_v1 = vmul.f32 0.01, %v2511_v60 }
 0x27a   :  { %7689 = vmatmul.mubr.msk.f32.gmra.mrb[134].mxu1 %vm142_vm0, %v9505_v9  ;;  %8275 = vmatprep.subr.bf16.mxu1 %v8274_v0  ;;  %v2806_v4 = vsel %vm2614_vm6, %v2516_v57, %v2710_v62 }
 0x27b   :  { %8277 = vmatpush3.bf16.msra.mxu1 %v8274_v0  ;;  %7691 = vmatprep.mubr.msk.f32.mxu1 %vm142_vm0, %v9513_v12  ;;  %v2805_v50 = vsel %vm2613_vm7, %v2511_v60, %v2709_v1 }
 0x27c   :  { %v8278_v7 = vpack.c.bf16 %v2806_v4, %v2805_v50 }
 0x27e   :  { %7692 = vmatmul.mubr.msk.f32.gmra.mrb[136].mxu1 %vm142_vm0, %v9521_v22  ;;  %8279 = vmatprep.subr.bf16.mxu1 %v8278_v7 }
 0x27f   :  { %8281 = vmatpush3.bf16.msra.mxu1 %v8278_v7  ;;  %7706 = vmatprep.mubr.msk.f32.mxu1 %vm142_vm0, %v9529_v25 }
 0x280   :  { %8410 = vmatprep.subr.bf16.mxu1 %v9170_v2 }
 0x282   :  { %7707 = vmatmul.mubr.msk.f32.vlgmr.msra.gmra.mrb[138].mxu1 %vm142_vm0, %v9489_v14 }
 0x283   :  { %7709 = vmatprep.mubr.msk.f32.mxu1 %vm142_vm0, %v9497_v59  ;;  %8414 = vmatpush3.bf16.msra.mxu1 %v9170_v2 }
 0x284   :  { %8411 = vmatprep.subr.bf16.mxu1 %v9195_v5 }
 0x286   :  { %7710 = vmatmul.mubr.msk.f32.gmra.mrb[140].mxu1 %vm142_vm0, %v9505_v9 }
 0x287   :  { %7712 = vmatprep.mubr.msk.f32.mxu1 %vm142_vm0, %v9513_v12  ;;  %8415 = vmatpush3.bf16.msra.mxu1 %v9195_v5 }
 0x288   :  { %8412 = vmatprep.subr.bf16.mxu1 %v9289_v56 }
 0x28a   :  { %7713 = vmatmul.mubr.msk.f32.gmra.mrb[142].mxu1 %vm142_vm0, %v9521_v22 }
 0x28b   :  { %8416 = vmatpush3.bf16.msra.mxu1 %v9289_v56 }
 0x28c   :  { %8413 = vmatprep.subr.bf16.mxu1 %v9356_v34 }
 0x28f   :  { %8417 = vmatpush3.bf16.msra.mxu1 %v9356_v34 }
 0x2a1   :  { %v7393_v2 = vpop.f32.mrb[48].mxu1 }
 0x2a2   :  { %v2873_v14 = vpop.f32.mrb[49].mxu1 }
 0x2a3   :  { %7731 = vmatprep.mubr.msk.f32.mxu0 %vm4331_vm8, %v2873_v14 }
 0x2a4   :  { %7732 = vmatmul.mubr.msk.f32.vlgmr.msra.gmra.mrb[144].mxu0 %vm4331_vm8, %v7393_v2 }
 0x2a5   :  { %v7396_v59 = vpop.f32.mrb[50].mxu1 }
 0x2a6   :  { %v2883_v5 = vpop.f32.mrb[51].mxu1 }
 0x2a7   :  { %7734 = vmatprep.mubr.msk.f32.mxu0 %vm4331_vm8, %v2883_v5 }
 0x2a8   :  { %7735 = vmatmul.mubr.msk.f32.gmra.mrb[146].mxu0 %vm4331_vm8, %v7396_v59 }
 0x2a9   :  { %v7399_v9 = vpop.f32.mrb[52].mxu1 }
 0x2aa   :  { %v2893_v10 = vpop.f32.mrb[53].mxu1 }
 0x2ab   :  { %7737 = vmatprep.mubr.msk.f32.mxu0 %vm4331_vm8, %v2893_v10 }
 0x2ac   :  { %7738 = vmatmul.mubr.msk.f32.gmra.mrb[148].mxu0 %vm4331_vm8, %v7399_v9 }
 0x2ad   :  { %v7414_v56 = vpop.f32.mrb[54].mxu1 }
 0x2ae   :  { %v2968_v34 = vpop.f32.mrb[55].mxu1 }
 0x2af   :  { %7740 = vmatprep.mubr.msk.f32.mxu0 %vm4331_vm8, %v2968_v34 }
 0x2b0   :  { %7741 = vmatmul.mubr.msk.f32.gmra.mrb[150].mxu0 %vm4331_vm8, %v7414_v56 }
 0x2b1   :  { %v7417_v11 = vpop.f32.mrb[56].mxu1 }
 0x2b2   :  { %v2978_v12 = vpop.f32.mrb[57].mxu1 }
 0x2b3   :  { %7743 = vmatprep.mubr.msk.f32.mxu0 %vm4331_vm8, %v2978_v12 }
 0x2b4   :  { %7744 = vmatmul.mubr.msk.f32.gmra.mrb[152].mxu0 %vm4331_vm8, %v7417_v11 }
 0x2b5   :  { %v7420_v13 = vpop.f32.mrb[58].mxu1 }
 0x2b6   :  { %v2988_v15 = vpop.f32.mrb[59].mxu1 }
 0x2b7   :  { %7746 = vmatprep.mubr.msk.f32.mxu0 %vm4331_vm8, %v2988_v15 }
 0x2b8   :  { %7747 = vmatmul.mubr.msk.f32.gmra.mrb[154].mxu0 %vm4331_vm8, %v7420_v13 }
 0x2b9   :  { %v7435_v16 = vpop.f32.mrb[60].mxu1 }
 0x2ba   :  { %v3063_v18 = vpop.f32.mrb[61].mxu1 }
 0x2bb   :  { %7749 = vmatprep.mubr.msk.f32.mxu0 %vm4331_vm8, %v3063_v18 }
 0x2bc   :  { %7750 = vmatmul.mubr.msk.f32.gmra.mrb[156].mxu0 %vm4331_vm8, %v7435_v16 }
 0x2bd   :  { %v7438_v19 = vpop.f32.mrb[62].mxu1 }
 0x2be   :  { %v3073_v20 = vpop.f32.mrb[63].mxu1 }
 0x2bf   :  { %7752 = vmatprep.mubr.msk.f32.mxu0 %vm4331_vm8, %v3073_v20 }
 0x2c0   :  { %7753 = vmatmul.mubr.msk.f32.gmra.mrb[158].mxu0 %vm4331_vm8, %v7438_v19 }
 0x2c1   :  { %v7441_v21 = vpop.f32.mrb[64].mxu1 }
 0x2c2   :  { %v3083_v22 = vpop.f32.mrb[65].mxu1 }
 0x2c3   :  { %7755 = vmatprep.mubr.msk.f32.mxu0 %vm4331_vm8, %v3083_v22 }
 0x2c4   :  { %7756 = vmatmul.mubr.msk.f32.gmra.mrb[160].mxu0 %vm4331_vm8, %v7441_v21 }
 0x2c5   :  { %v7456_v23 = vpop.f32.mrb[66].mxu1 }
 0x2c6   :  { %v3158_v24 = vpop.f32.mrb[67].mxu1 }
 0x2c7   :  { %7758 = vmatprep.mubr.msk.f32.mxu0 %vm4331_vm8, %v3158_v24 }
 0x2c8   :  { %7759 = vmatmul.mubr.msk.f32.gmra.mrb[162].mxu0 %vm4331_vm8, %v7456_v23 }
 0x2c9   :  { %v7459_v25 = vpop.f32.mrb[68].mxu1 }
 0x2ca   :  { %v3168_v26 = vpop.f32.mrb[69].mxu1 }
 0x2cb   :  { %7761 = vmatprep.mubr.msk.f32.mxu0 %vm4331_vm8, %v3168_v26 }
 0x2cc   :  { %7762 = vmatmul.mubr.msk.f32.gmra.mrb[164].mxu0 %vm4331_vm8, %v7459_v25 }
 0x2cd   :  { %v7462_v28 = vpop.f32.mrb[70].mxu1 }
 0x2ce   :  { %v3178_v29 = vpop.f32.mrb[71].mxu1 }
 0x2cf   :  { %7764 = vmatprep.mubr.msk.f32.mxu0 %vm4331_vm8, %v3178_v29 }
 0x2d0   :  { %7765 = vmatmul.mubr.msk.f32.gmra.mrb[166].mxu0 %vm4331_vm8, %v7462_v28 }
 0x2d1   :  { %v7477_v31 = vpop.f32.mrb[72].mxu1 }
 0x2d2   :  { %v3253_v32 = vpop.f32.mrb[73].mxu1 }
 0x2d3   :  { %7767 = vmatprep.mubr.msk.f32.mxu0 %vm4331_vm8, %v3253_v32 }
 0x2d4   :  { %7768 = vmatmul.mubr.msk.f32.gmra.mrb[168].mxu0 %vm4331_vm8, %v7477_v31 }
 0x2d5   :  { %v7480_v33 = vpop.f32.mrb[74].mxu1 }
 0x2d6   :  { %v3263_v27 = vpop.f32.mrb[75].mxu1 }
 0x2d7   :  { %7770 = vmatprep.mubr.msk.f32.mxu0 %vm4331_vm8, %v3263_v27 }
 0x2d8   :  { %7771 = vmatmul.mubr.msk.f32.gmra.mrb[170].mxu0 %vm4331_vm8, %v7480_v33 }
 0x2d9   :  { %v7483_v30 = vpop.f32.mrb[76].mxu1 }
 0x2da   :  { %v3273_v36 = vpop.f32.mrb[77].mxu1 }
 0x2db   :  { %7773 = vmatprep.mubr.msk.f32.mxu0 %vm4331_vm8, %v3273_v36 }
 0x2dc   :  { %7774 = vmatmul.mubr.msk.f32.gmra.mrb[172].mxu0 %vm4331_vm8, %v7483_v30 }
 0x2dd   :  { %v7498_v35 = vpop.f32.mrb[78].mxu1 }
 0x2de   :  { %v3348_v37 = vpop.f32.mrb[79].mxu1 }
 0x2df   :  { %7776 = vmatprep.mubr.msk.f32.mxu0 %vm4331_vm8, %v3348_v37 }
 0x2e0   :  { %7777 = vmatmul.mubr.msk.f32.gmra.mrb[174].mxu0 %vm4331_vm8, %v7498_v35 }
 0x2e1   :  { %v7501_v38 = vpop.f32.mrb[80].mxu1 }
 0x2e2   :  { %v3358_v39 = vpop.f32.mrb[81].mxu1 }
 0x2e3   :  { %7779 = vmatprep.mubr.msk.f32.mxu0 %vm4331_vm8, %v3358_v39  ;;  %v9685_v39 = vld [vmem:[%s10083_s3 + $0x60] ss:$0 sm:$0xff] }
 0x2e4   :  { %7780 = vmatmul.mubr.msk.f32.gmra.mrb[176].mxu0 %vm4331_vm8, %v7501_v38  ;;  %v5454_v38 = vld [vmem:[%s10081_s1 + $0x8] sm:$0xff] }
 0x2e5   :  { %v7504_v43 = vpop.f32.mrb[82].mxu1 }
 0x2e6   :  { %v3368_v40 = vpop.f32.mrb[83].mxu1 }
 0x2e7   :  { %7782 = vmatprep.mubr.msk.f32.mxu0 %vm4331_vm8, %v3368_v40 }
 0x2e8   :  { %7783 = vmatmul.mubr.msk.f32.gmra.mrb[178].mxu0 %vm4331_vm8, %v7504_v43 }
 0x2e9   :  { %v7519_v52 = vpop.f32.mrb[84].mxu1 }
 0x2ea   :  { %v3443_v41 = vpop.f32.mrb[85].mxu1 }
 0x2eb   :  { %7785 = vmatprep.mubr.msk.f32.mxu0 %vm4331_vm8, %v3443_v41 }
 0x2ec   :  { %7786 = vmatmul.mubr.msk.f32.gmra.mrb[180].mxu0 %vm4331_vm8, %v7519_v52 }
 0x2ed   :  { %v7522_v55 = vpop.f32.mrb[86].mxu1 }
 0x2ee   :  { %v3453_v8 = vpop.f32.mrb[87].mxu1 }
 0x2ef   :  { %7788 = vmatprep.mubr.msk.f32.mxu0 %vm4331_vm8, %v3453_v8 }
 0x2f0   :  { %7789 = vmatmul.mubr.msk.f32.gmra.mrb[182].mxu0 %vm4331_vm8, %v7522_v55 }
 0x2f1   :  { %v7525_v42 = vpop.f32.mrb[88].mxu1 }
 0x2f2   :  { %v3463_v44 = vpop.f32.mrb[89].mxu1 }
 0x2f3   :  { %7791 = vmatprep.mubr.msk.f32.mxu0 %vm4331_vm8, %v3463_v44 }
 0x2f4   :  { %7792 = vmatmul.mubr.msk.f32.gmra.mrb[184].mxu0 %vm4331_vm8, %v7525_v42 }
 0x2f5   :  { %v7540_v45 = vpop.f32.mrb[90].mxu1 }
 0x2f6   :  { %v3538_v46 = vpop.f32.mrb[91].mxu1 }
 0x2f7   :  { %7794 = vmatprep.mubr.msk.f32.mxu0 %vm4331_vm8, %v3538_v46 }
 0x2f8   :  { %7795 = vmatmul.mubr.msk.f32.gmra.mrb[186].mxu0 %vm4331_vm8, %v7540_v45 }
 0x2f9   :  { %v7543_v47 = vpop.f32.mrb[92].mxu1 }
 0x2fa   :  { %v3548_v63 = vpop.f32.mrb[93].mxu1 }
 0x2fb   :  { %7797 = vmatprep.mubr.msk.f32.mxu0 %vm4331_vm8, %v3548_v63 }
 0x2fc   :  { %7798 = vmatmul.mubr.msk.f32.gmra.mrb[188].mxu0 %vm4331_vm8, %v7543_v47 }
 0x2fd   :  { %v7546_v48 = vpop.f32.mrb[94].mxu1 }
 0x2fe   :  { %v3558_v3 = vpop.f32.mrb[95].mxu1 }
 0x2ff   :  { %7800 = vmatprep.mubr.msk.f32.mxu0 %vm4331_vm8, %v3558_v3 }
 0x300   :  { %7801 = vmatmul.mubr.msk.f32.gmra.mrb[190].mxu0 %vm4331_vm8, %v7546_v48 }
 0x301   :  { %v7561_v49 = vpop.f32.mrb[96].mxu1 }
 0x302   :  { %v3633_v51 = vpop.f32.mrb[97].mxu1 }
 0x303   :  { %7803 = vmatprep.mubr.msk.f32.mxu0 %vm4331_vm8, %v3633_v51 }
 0x304   :  { %7804 = vmatmul.mubr.msk.f32.gmra.mrb[192].mxu0 %vm4331_vm8, %v7561_v49 }
 0x305   :  { %v7564_v53 = vpop.f32.mrb[98].mxu1 }
 0x306   :  { %v3643_v6 = vpop.f32.mrb[99].mxu1 }
 0x307   :  { %7806 = vmatprep.mubr.msk.f32.mxu0 %vm4331_vm8, %v3643_v6 }
 0x308   :  { %7807 = vmatmul.mubr.msk.f32.gmra.mrb[194].mxu0 %vm4331_vm8, %v7564_v53 }
 0x309   :  { %v7567_v54 = vpop.f32.mrb[100].mxu1 }
 0x30a   :  { %v3653_v57 = vpop.f32.mrb[101].mxu1 }
 0x30b   :  { %7809 = vmatprep.mubr.msk.f32.mxu0 %vm4331_vm8, %v3653_v57 }
 0x30c   :  { %7810 = vmatmul.mubr.msk.f32.gmra.mrb[196].mxu0 %vm4331_vm8, %v7567_v54 }
 0x30d   :  { %v7582_v17 = vpop.f32.mrb[102].mxu1 }
 0x30e   :  { %v3728_v58 = vpop.f32.mrb[103].mxu1 }
 0x30f   :  { %7812 = vmatprep.mubr.msk.f32.mxu0 %vm4331_vm8, %v3728_v58 }
 0x310   :  { %7813 = vmatmul.mubr.msk.f32.gmra.mrb[198].mxu0 %vm4331_vm8, %v7582_v17 }
 0x311   :  { %v7585_v60 = vpop.f32.mrb[104].mxu1 }
 0x312   :  { %v3738_v61 = vpop.f32.mrb[105].mxu1 }
 0x313   :  { %7815 = vmatprep.mubr.msk.f32.mxu0 %vm4331_vm8, %v3738_v61 }
 0x314   :  { %7816 = vmatmul.mubr.msk.f32.gmra.mrb[200].mxu0 %vm4331_vm8, %v7585_v60 }
 0x315   :  { %v7588_v62 = vpop.f32.mrb[106].mxu1 }
 0x316   :  { %v3748_v0 = vpop.f32.mrb[107].mxu1 }
 0x317   :  { %7818 = vmatprep.mubr.msk.f32.mxu0 %vm4331_vm8, %v3748_v0 }
 0x318   :  { %7819 = vmatmul.mubr.msk.f32.gmra.mrb[202].mxu0 %vm4331_vm8, %v7588_v62 }
 0x319   :  { %v7603_v1 = vpop.f32.mrb[108].mxu1 }
 0x31a   :  { %v3823_v4 = vpop.f32.mrb[109].mxu1 }
 0x31b   :  { %7821 = vmatprep.mubr.msk.f32.mxu0 %vm4331_vm8, %v3823_v4 }
 0x31c   :  { %7822 = vmatmul.mubr.msk.f32.gmra.mrb[204].mxu0 %vm4331_vm8, %v7603_v1 }
 0x31d   :  { %v7606_v50 = vpop.f32.mrb[110].mxu1 }
 0x31e   :  { %v3833_v7 = vpop.f32.mrb[111].mxu1 }
 0x31f   :  { %7824 = vmatprep.mubr.msk.f32.mxu0 %vm4331_vm8, %v3833_v7 }
 0x320   :  { %7825 = vmatmul.mubr.msk.f32.gmra.mrb[206].mxu0 %vm4331_vm8, %v7606_v50 }
 0x321   :  { %v7609_v2 = vpop.f32.mrb[112].mxu1 }
 0x322   :  { %v3843_v14 = vpop.f32.mrb[113].mxu1 }
 0x323   :  { %7827 = vmatprep.mubr.msk.f32.mxu0 %vm4331_vm8, %v3843_v14 }
 0x324   :  { %7828 = vmatmul.mubr.msk.f32.gmra.mrb[208].mxu0 %vm4331_vm8, %v7609_v2 }
 0x325   :  { %v7624_v59 = vpop.f32.mrb[114].mxu1 }
 0x326   :  { %v3918_v5 = vpop.f32.mrb[115].mxu1 }
 0x327   :  { %7830 = vmatprep.mubr.msk.f32.mxu0 %vm4331_vm8, %v3918_v5 }
 0x328   :  { %7831 = vmatmul.mubr.msk.f32.gmra.mrb[210].mxu0 %vm4331_vm8, %v7624_v59 }
 0x329   :  { %v7627_v9 = vpop.f32.mrb[116].mxu1 }
 0x32a   :  { %v3928_v10 = vpop.f32.mrb[117].mxu1 }
 0x32b   :  { %7833 = vmatprep.mubr.msk.f32.mxu0 %vm4331_vm8, %v3928_v10 }
 0x32c   :  { %7834 = vmatmul.mubr.msk.f32.gmra.mrb[212].mxu0 %vm4331_vm8, %v7627_v9 }
 0x32d   :  { %v7630_v56 = vpop.f32.mrb[118].mxu1 }
 0x32e   :  { %v3938_v34 = vpop.f32.mrb[119].mxu1 }
 0x32f   :  { %7836 = vmatprep.mubr.msk.f32.mxu1 %vm4331_vm8, %v3938_v34 }
 0x330   :  { %7837 = vmatmul.mubr.msk.f32.vlgmr.msra.gmra.mrb[144].mxu1 %vm4331_vm8, %v7630_v56 }
 0x331   :  { %v7645_v11 = vpop.f32.mrb[120].mxu1 }
 0x332   :  { %v4013_v12 = vpop.f32.mrb[121].mxu1 }
 0x333   :  { %7839 = vmatprep.mubr.msk.f32.mxu1 %vm4331_vm8, %v4013_v12 }
 0x334   :  { %7840 = vmatmul.mubr.msk.f32.gmra.mrb[146].mxu1 %vm4331_vm8, %v7645_v11 }
 0x335   :  { %v7648_v13 = vpop.f32.mrb[122].mxu1 }
 0x336   :  { %v4023_v15 = vpop.f32.mrb[123].mxu1 }
 0x337   :  { %7842 = vmatprep.mubr.msk.f32.mxu1 %vm4331_vm8, %v4023_v15 }
 0x338   :  { %7843 = vmatmul.mubr.msk.f32.gmra.mrb[148].mxu1 %vm4331_vm8, %v7648_v13 }
 0x339   :  { %v7651_v16 = vpop.f32.mrb[124].mxu1 }
 0x33a   :  { %v4033_v18 = vpop.f32.mrb[125].mxu1 }
 0x33b   :  { %7845 = vmatprep.mubr.msk.f32.mxu1 %vm4331_vm8, %v4033_v18 }
 0x33c   :  { %7846 = vmatmul.mubr.msk.f32.gmra.mrb[150].mxu1 %vm4331_vm8, %v7651_v16 }
 0x33d   :  { %v7666_v19 = vpop.f32.mrb[126].mxu1 }
 0x33e   :  { %v4108_v20 = vpop.f32.mrb[127].mxu1 }
 0x33f   :  { %7848 = vmatprep.mubr.msk.f32.mxu1 %vm4331_vm8, %v4108_v20 }
 0x340   :  { %7849 = vmatmul.mubr.msk.f32.gmra.mrb[152].mxu1 %vm4331_vm8, %v7666_v19 }
 0x341   :  { %v7669_v21 = vpop.f32.mrb[128].mxu1 }
 0x342   :  { %v4118_v22 = vpop.f32.mrb[129].mxu1 }
 0x343   :  { %7851 = vmatprep.mubr.msk.f32.mxu1 %vm4331_vm8, %v4118_v22 }
 0x344   :  { %7852 = vmatmul.mubr.msk.f32.gmra.mrb[154].mxu1 %vm4331_vm8, %v7669_v21 }
 0x345   :  { %v7672_v23 = vpop.f32.mrb[130].mxu1 }
 0x346   :  { %v4128_v24 = vpop.f32.mrb[131].mxu1 }
 0x347   :  { %7854 = vmatprep.mubr.msk.f32.mxu1 %vm4331_vm8, %v4128_v24 }
 0x348   :  { %7855 = vmatmul.mubr.msk.f32.gmra.mrb[156].mxu1 %vm4331_vm8, %v7672_v23 }
 0x349   :  { %v7687_v25 = vpop.f32.mrb[132].mxu1 }
 0x34a   :  { %v4203_v26 = vpop.f32.mrb[133].mxu1 }
 0x34b   :  { %7857 = vmatprep.mubr.msk.f32.mxu1 %vm4331_vm8, %v4203_v26 }
 0x34c   :  { %7858 = vmatmul.mubr.msk.f32.gmra.mrb[158].mxu1 %vm4331_vm8, %v7687_v25 }
 0x34d   :  { %v7690_v28 = vpop.f32.mrb[134].mxu1 }
 0x34e   :  { %v4213_v29 = vpop.f32.mrb[135].mxu1 }
 0x34f   :  { %7860 = vmatprep.mubr.msk.f32.mxu1 %vm4331_vm8, %v4213_v29 }
 0x350   :  { %7861 = vmatmul.mubr.msk.f32.gmra.mrb[160].mxu1 %vm4331_vm8, %v7690_v28 }
 0x351   :  { %v7693_v31 = vpop.f32.mrb[136].mxu1 }
 0x352   :  { %v4223_v32 = vpop.f32.mrb[137].mxu1 }
 0x353   :  { %7863 = vmatprep.mubr.msk.f32.mxu1 %vm4331_vm8, %v4223_v32 }
 0x354   :  { %7864 = vmatmul.mubr.msk.f32.gmra.mrb[162].mxu1 %vm4331_vm8, %v7693_v31 }
 0x355   :  { %v7708_v33 = vpop.f32.mrb[138].mxu1 }
 0x356   :  { %v4298_v27 = vpop.f32.mrb[139].mxu1 }
 0x357   :  { %7866 = vmatprep.mubr.msk.f32.mxu1 %vm4331_vm8, %v4298_v27 }
 0x358   :  { %7867 = vmatmul.mubr.msk.f32.gmra.mrb[164].mxu1 %vm4331_vm8, %v7708_v33 }
 0x359   :  { %v7711_v30 = vpop.f32.mrb[140].mxu1 }
 0x35a   :  { %v4308_v36 = vpop.f32.mrb[141].mxu1 }
 0x35b   :  { %7869 = vmatprep.mubr.msk.f32.mxu1 %vm4331_vm8, %v4308_v36 }
 0x35c   :  { %7870 = vmatmul.mubr.msk.f32.gmra.mrb[166].mxu1 %vm4331_vm8, %v7711_v30 }
 0x35d   :  { %v7714_v35 = vpop.f32.mrb[142].mxu1 }
 0x35e   :  { %v4318_v37 = vpop.f32.mrb[143].mxu1 }
 0x35f   :  { %7872 = vmatprep.mubr.msk.f32.mxu1 %vm4331_vm8, %v4318_v37 }
 0x360   :  { %7873 = vmatmul.mubr.msk.f32.gmra.mrb[168].mxu1 %vm4331_vm8, %v7714_v35 }
 0x361   :  { %5529 = vmatprep.mubr.f32.mxu1 %v5454_v38 }
 0x377   :  { %v7733_v43 = vpop.f32.mrb[144].mxu0 }
 0x378   :  { %v4692_v40 = vadd.f32 %v7733_v43, %v9685_v39  ;;  %v4686_v52 = vpop.f32.mrb[145].mxu0 }
 0x379   :  { %v4687_v41 = vadd.f32 %v9685_v39, %v4686_v52 }
 0x37a   :  { %vm5166_vm0 = vcmp.ge.f32.partialorder %v4692_v40, 0.0  ;;  %v5262_v55 = vmul.f32 0.01, %v4692_v40 }
 0x37b   :  { %vm5165_vm9 = vcmp.ge.f32.partialorder %v4687_v41, 0.0  ;;  %v5261_v8 = vmul.f32 0.01, %v4687_v41  ;;  %v7736_v42 = vpop.f32.mrb[146].mxu0 }
 0x37c   :  { %v9689_v44 = vsel %vm5166_vm0, %v4692_v40, %v5262_v55  ;;  %v4702_v45 = vadd.f32 %v7736_v42, %v9685_v39  ;;  %v4696_v46 = vpop.f32.mrb[147].mxu0 }
 0x37d   :  { %v9692_v47 = vsel %vm5165_vm9, %v4687_v41, %v5261_v8  ;;  %v4697_v63 = vadd.f32 %v9685_v39, %v4696_v46 }
 0x37e   :  { %v8300_v48 = vpack.c.bf16 %v9689_v44, %v9692_v47  ;;  %vm5168_vm10 = vcmp.ge.f32.partialorder %v4702_v45, 0.0  ;;  %v5264_v3 = vmul.f32 0.01, %v4702_v45 }
 0x37f   :  { %vm5167_vm11 = vcmp.ge.f32.partialorder %v4697_v63, 0.0  ;;  %v5263_v49 = vmul.f32 0.01, %v4697_v63  ;;  %v7739_v51 = vpop.f32.mrb[148].mxu0 }
 0x380   :  { %v9697_v53 = vsel %vm5168_vm10, %v4702_v45, %v5264_v3  ;;  %v4712_v6 = vadd.f32 %v7739_v51, %v9685_v39  ;;  %v4706_v54 = vpop.f32.mrb[149].mxu0 }
 0x381   :  { %v9700_v57 = vsel %vm5167_vm11, %v4697_v63, %v5263_v49  ;;  %v4707_v17 = vadd.f32 %v9685_v39, %v4706_v54 }
 0x382   :  { %v8304_v58 = vpack.c.bf16 %v9697_v53, %v9700_v57  ;;  %vm5170_vm12 = vcmp.ge.f32.partialorder %v4712_v6, 0.0  ;;  %v5266_v60 = vmul.f32 0.01, %v4712_v6 }
 0x383   :  { %vm5169_vm13 = vcmp.ge.f32.partialorder %v4707_v17, 0.0  ;;  %v5265_v61 = vmul.f32 0.01, %v4707_v17  ;;  %v7742_v62 = vpop.f32.mrb[150].mxu0 }
 0x384   :  { %v9705_v0 = vsel %vm5170_vm12, %v4712_v6, %v5266_v60  ;;  %v4722_v1 = vadd.f32 %v7742_v62, %v9685_v39  ;;  %v4716_v4 = vpop.f32.mrb[151].mxu0 }
 0x385   :  { %v9708_v50 = vsel %vm5169_vm13, %v4707_v17, %v5265_v61  ;;  %v4717_v7 = vadd.f32 %v9685_v39, %v4716_v4 }
 0x386   :  { %v8308_v2 = vpack.c.bf16 %v9705_v0, %v9708_v50  ;;  %vm5172_vm14 = vcmp.ge.f32.partialorder %v4722_v1, 0.0  ;;  %v5268_v14 = vmul.f32 0.01, %v4722_v1 }
 0x387   :  { %vm5171_vm15 = vcmp.ge.f32.partialorder %v4717_v7, 0.0  ;;  %v5267_v59 = vmul.f32 0.01, %v4717_v7  ;;  %v7745_v5 = vpop.f32.mrb[152].mxu0 }
 0x388   :  { %v9713_v9 = vsel %vm5172_vm14, %v4722_v1, %v5268_v14  ;;  %v4732_v10 = vadd.f32 %v7745_v5, %v9685_v39  ;;  %v4726_v56 = vpop.f32.mrb[153].mxu0 }
 0x389   :  { %v9716_v34 = vsel %vm5171_vm15, %v4717_v7, %v5267_v59  ;;  %v4727_v11 = vadd.f32 %v9685_v39, %v4726_v56 }
 0x38a   :  { %v8312_v12 = vpack.c.bf16 %v9713_v9, %v9716_v34  ;;  %vm5174_vm1 = vcmp.ge.f32.partialorder %v4732_v10, 0.0  ;;  %v5270_v13 = vmul.f32 0.01, %v4732_v10 }
 0x38b   :  { %vm5173_vm2 = vcmp.ge.f32.partialorder %v4727_v11, 0.0  ;;  %v5269_v15 = vmul.f32 0.01, %v4727_v11  ;;  %v7748_v16 = vpop.f32.mrb[154].mxu0 }
 0x38c   :  { %v9721_v18 = vsel %vm5174_vm1, %v4732_v10, %v5270_v13  ;;  %v4742_v19 = vadd.f32 %v7748_v16, %v9685_v39  ;;  %v4736_v20 = vpop.f32.mrb[155].mxu0 }
 0x38d   :  { %v9724_v21 = vsel %vm5173_vm2, %v4727_v11, %v5269_v15  ;;  %v4737_v22 = vadd.f32 %v9685_v39, %v4736_v20 }
 0x38e   :  { %v8316_v23 = vpack.c.bf16 %v9721_v18, %v9724_v21  ;;  %vm5176_vm3 = vcmp.ge.f32.partialorder %v4742_v19, 0.0  ;;  %v5272_v24 = vmul.f32 0.01, %v4742_v19 }
 0x38f   :  { %vm5175_vm4 = vcmp.ge.f32.partialorder %v4737_v22, 0.0  ;;  %v5271_v25 = vmul.f32 0.01, %v4737_v22  ;;  %v7751_v26 = vpop.f32.mrb[156].mxu0 }
 0x390   :  { %v9729_v28 = vsel %vm5176_vm3, %v4742_v19, %v5272_v24  ;;  %v4752_v29 = vadd.f32 %v7751_v26, %v9685_v39  ;;  %v4746_v31 = vpop.f32.mrb[157].mxu0 }
 0x391   :  { %v9732_v32 = vsel %vm5175_vm4, %v4737_v22, %v5271_v25  ;;  %v4747_v33 = vadd.f32 %v9685_v39, %v4746_v31 }
 0x392   :  { %v8320_v27 = vpack.c.bf16 %v9729_v28, %v9732_v32  ;;  %vm5178_vm5 = vcmp.ge.f32.partialorder %v4752_v29, 0.0  ;;  %v5274_v30 = vmul.f32 0.01, %v4752_v29 }
 0x393   :  { %vm5177_vm6 = vcmp.ge.f32.partialorder %v4747_v33, 0.0  ;;  %v5273_v36 = vmul.f32 0.01, %v4747_v33  ;;  %v7754_v35 = vpop.f32.mrb[158].mxu0 }
 0x394   :  { %v9737_v37 = vsel %vm5178_vm5, %v4752_v29, %v5274_v30  ;;  %v4762_v38 = vadd.f32 %v7754_v35, %v9685_v39  ;;  %v4756_v43 = vpop.f32.mrb[159].mxu0 }
 0x395   :  { %v9740_v40 = vsel %vm5177_vm6, %v4747_v33, %v5273_v36  ;;  %v4757_v52 = vadd.f32 %v9685_v39, %v4756_v43 }
 0x396   :  { %v8324_v41 = vpack.c.bf16 %v9737_v37, %v9740_v40  ;;  %vm5180_vm7 = vcmp.ge.f32.partialorder %v4762_v38, 0.0  ;;  %v5276_v55 = vmul.f32 0.01, %v4762_v38  ;;  %v5453_v37 = vld [vmem:[%s10081_s1] sm:$0xff] }
 0x397   :  { %vm5179_vm0 = vcmp.ge.f32.partialorder %v4757_v52, 0.0  ;;  %v5275_v8 = vmul.f32 0.01, %v4757_v52  ;;  %v7757_v42 = vpop.f32.mrb[160].mxu0 }
 0x398   :  { %v9745_v45 = vsel %vm5180_vm7, %v4762_v38, %v5276_v55  ;;  %v4772_v46 = vadd.f32 %v7757_v42, %v9685_v39  ;;  %v4766_v63 = vpop.f32.mrb[161].mxu0 }
 0x399   :  { %v9748_v3 = vsel %vm5179_vm0, %v4757_v52, %v5275_v8  ;;  %v4767_v49 = vadd.f32 %v9685_v39, %v4766_v63 }
 0x39a   :  { %v8328_v51 = vpack.c.bf16 %v9745_v45, %v9748_v3  ;;  %vm5182_vm9 = vcmp.ge.f32.partialorder %v4772_v46, 0.0  ;;  %v5278_v6 = vmul.f32 0.01, %v4772_v46 }
 0x39b   :  { %vm5181_vm10 = vcmp.ge.f32.partialorder %v4767_v49, 0.0  ;;  %v5277_v54 = vmul.f32 0.01, %v4767_v49  ;;  %v7760_v17 = vpop.f32.mrb[162].mxu0 }
 0x39c   :  { %v4782_v60 = vadd.f32 %v7760_v17, %v9685_v39  ;;  %v4776_v61 = vpop.f32.mrb[163].mxu0  ;;  %v5374_v62 = vsel %vm5182_vm9, %v4772_v46, %v5278_v6 }
 0x39d   :  { %v4777_v1 = vadd.f32 %v9685_v39, %v4776_v61  ;;  %v5373_v4 = vsel %vm5181_vm10, %v4767_v49, %v5277_v54 }
 0x39e   :  { %vm5184_vm11 = vcmp.ge.f32.partialorder %v4782_v60, 0.0  ;;  %v5280_v7 = vmul.f32 0.01, %v4782_v60  ;;  %v8298_v14 = vpack.c.bf16 %v5374_v62, %v5373_v4 }
 0x39f   :  { %vm5183_vm12 = vcmp.ge.f32.partialorder %v4777_v1, 0.0  ;;  %v5279_v59 = vmul.f32 0.01, %v4777_v1  ;;  %v7763_v5 = vpop.f32.mrb[164].mxu0 }
 0x3a0   :  { %v4792_v10 = vadd.f32 %v7763_v5, %v9685_v39  ;;  %v4786_v56 = vpop.f32.mrb[165].mxu0  ;;  %8299 = vmatprep.subr.bf16.mxu1 %v8298_v14  ;;  %v5376_v11 = vsel %vm5184_vm11, %v4782_v60, %v5280_v7 }
 0x3a1   :  { %v4787_v13 = vadd.f32 %v9685_v39, %v4786_v56  ;;  %8301 = vmatpush3.bf16.msra.mxu1 %v8300_v48  ;;  %v5375_v15 = vsel %vm5183_vm12, %v4777_v1, %v5279_v59 }
 0x3a2   :  { %vm5186_vm13 = vcmp.ge.f32.partialorder %v4792_v10, 0.0  ;;  %v5282_v16 = vmul.f32 0.01, %v4792_v10  ;;  %v8302_v19 = vpack.c.bf16 %v5376_v11, %v5375_v15 }
 0x3a3   :  { %vm5185_vm14 = vcmp.ge.f32.partialorder %v4787_v13, 0.0  ;;  %v5281_v20 = vmul.f32 0.01, %v4787_v13  ;;  %v7766_v22 = vpop.f32.mrb[166].mxu0 }
 0x3a4   :  { %v4802_v24 = vadd.f32 %v7766_v22, %v9685_v39  ;;  %v4796_v25 = vpop.f32.mrb[167].mxu0  ;;  %8303 = vmatprep.subr.bf16.mxu1 %v8302_v19  ;;  %v5378_v26 = vsel %vm5186_vm13, %v4792_v10, %v5282_v16 }
 0x3a5   :  { %v4797_v29 = vadd.f32 %v9685_v39, %v4796_v25  ;;  %8305 = vmatpush3.bf16.msra.mxu1 %v8304_v58  ;;  %v5377_v44 = vsel %vm5185_vm14, %v4787_v13, %v5281_v20 }
 0x3a6   :  { %vm5188_vm15 = vcmp.ge.f32.partialorder %v4802_v24, 0.0  ;;  %v5284_v47 = vmul.f32 0.01, %v4802_v24  ;;  %v8306_v48 = vpack.c.bf16 %v5378_v26, %v5377_v44  ;;  %v5460_v26 = vld [vmem:[%s10081_s1 + $0x38] sm:$0xff] }
 0x3a7   :  { %vm5187_vm1 = vcmp.ge.f32.partialorder %v4797_v29, 0.0  ;;  %v5283_v31 = vmul.f32 0.01, %v4797_v29  ;;  %v7769_v33 = vpop.f32.mrb[168].mxu0 }
 0x3a8   :  { %v4812_v30 = vadd.f32 %v7769_v33, %v9685_v39  ;;  %v4806_v36 = vpop.f32.mrb[169].mxu0  ;;  %8307 = vmatprep.subr.bf16.mxu1 %v8306_v48  ;;  %v5380_v35 = vsel %vm5188_vm15, %v4802_v24, %v5284_v47 }
 0x3a9   :  { %v4807_v38 = vadd.f32 %v9685_v39, %v4806_v36  ;;  %8309 = vmatpush3.bf16.msra.mxu1 %v8308_v2  ;;  %v5379_v53 = vsel %vm5187_vm1, %v4797_v29, %v5283_v31  ;;  %v5459_v31 = vld [vmem:[%s10081_s1 + $0x30] sm:$0xff]  ;;  %v5456_v36 = vld [vmem:[%s10081_s1 + $0x18] sm:$0xff] }
 0x3aa   :  { %vm5190_vm2 = vcmp.ge.f32.partialorder %v4812_v30, 0.0  ;;  %v5286_v57 = vmul.f32 0.01, %v4812_v30  ;;  %v8310_v58 = vpack.c.bf16 %v5380_v35, %v5379_v53 }
 0x3ab   :  { %vm5189_vm3 = vcmp.ge.f32.partialorder %v4807_v38, 0.0  ;;  %v5285_v43 = vmul.f32 0.01, %v4807_v38  ;;  %v7772_v52 = vpop.f32.mrb[170].mxu0 }
 0x3ac   :  { %v4822_v55 = vadd.f32 %v7772_v52, %v9685_v39  ;;  %v4816_v8 = vpop.f32.mrb[171].mxu0  ;;  %8311 = vmatprep.subr.bf16.mxu1 %v8310_v58  ;;  %v5382_v42 = vsel %vm5190_vm2, %v4812_v30, %v5286_v57 }
 0x3ad   :  { %v4817_v46 = vadd.f32 %v9685_v39, %v4816_v8  ;;  %8313 = vmatpush3.bf16.msra.mxu1 %v8312_v12  ;;  %v5381_v0 = vsel %vm5189_vm3, %v4807_v38, %v5285_v43 }
 0x3ae   :  { %vm5192_vm4 = vcmp.ge.f32.partialorder %v4822_v55, 0.0  ;;  %v5288_v50 = vmul.f32 0.01, %v4822_v55  ;;  %v8314_v2 = vpack.c.bf16 %v5382_v42, %v5381_v0 }
 0x3af   :  { %vm5191_vm5 = vcmp.ge.f32.partialorder %v4817_v46, 0.0  ;;  %v5287_v63 = vmul.f32 0.01, %v4817_v46  ;;  %v7775_v49 = vpop.f32.mrb[172].mxu0 }
 0x3b0   :  { %v4832_v6 = vadd.f32 %v7775_v49, %v9685_v39  ;;  %v4826_v54 = vpop.f32.mrb[173].mxu0  ;;  %8315 = vmatprep.subr.bf16.mxu1 %v8314_v2  ;;  %v5384_v17 = vsel %vm5192_vm4, %v4822_v55, %v5288_v50 }
 0x3b1   :  { %v4827_v60 = vadd.f32 %v9685_v39, %v4826_v54  ;;  %8317 = vmatpush3.bf16.msra.mxu1 %v8316_v23  ;;  %v5383_v9 = vsel %vm5191_vm5, %v4817_v46, %v5287_v63 }
 0x3b2   :  { %vm5194_vm6 = vcmp.ge.f32.partialorder %v4832_v6, 0.0  ;;  %v5290_v34 = vmul.f32 0.01, %v4832_v6  ;;  %v8318_v12 = vpack.c.bf16 %v5384_v17, %v5383_v9 }
 0x3b3   :  { %vm5193_vm7 = vcmp.ge.f32.partialorder %v4827_v60, 0.0  ;;  %v5289_v61 = vmul.f32 0.01, %v4827_v60  ;;  %v7778_v62 = vpop.f32.mrb[174].mxu0 }
 0x3b4   :  { %v4842_v1 = vadd.f32 %v7778_v62, %v9685_v39  ;;  %v4836_v4 = vpop.f32.mrb[175].mxu0  ;;  %8319 = vmatprep.subr.bf16.mxu1 %v8318_v12  ;;  %v5386_v7 = vsel %vm5194_vm6, %v4832_v6, %v5290_v34 }
 0x3b5   :  { %v4837_v14 = vadd.f32 %v9685_v39, %v4836_v4  ;;  %8321 = vmatpush3.bf16.msra.mxu1 %v8320_v27  ;;  %v5385_v18 = vsel %vm5193_vm7, %v4827_v60, %v5289_v61 }
 0x3b6   :  { %vm5196_vm0 = vcmp.ge.f32.partialorder %v4842_v1, 0.0  ;;  %v5292_v21 = vmul.f32 0.01, %v4842_v1  ;;  %v8322_v23 = vpack.c.bf16 %v5386_v7, %v5385_v18 }
 0x3b7   :  { %vm5195_vm9 = vcmp.ge.f32.partialorder %v4837_v14, 0.0  ;;  %v5291_v59 = vmul.f32 0.01, %v4837_v14  ;;  %v7781_v5 = vpop.f32.mrb[176].mxu0 }
 0x3b8   :  { %v4852_v10 = vadd.f32 %v7781_v5, %v9685_v39  ;;  %v4846_v56 = vpop.f32.mrb[177].mxu0  ;;  %8323 = vmatprep.subr.bf16.mxu1 %v8322_v23  ;;  %v5388_v11 = vsel %vm5196_vm0, %v4842_v1, %v5292_v21 }
 0x3b9   :  { %v4847_v13 = vadd.f32 %v9685_v39, %v4846_v56  ;;  %8325 = vmatpush3.bf16.msra.mxu1 %v8324_v41  ;;  %v5387_v28 = vsel %vm5195_vm9, %v4837_v14, %v5291_v59 }
 0x3ba   :  { %vm5198_vm10 = vcmp.ge.f32.partialorder %v4852_v10, 0.0  ;;  %v5294_v32 = vmul.f32 0.01, %v4852_v10  ;;  %v8326_v27 = vpack.c.bf16 %v5388_v11, %v5387_v28 }
 0x3bb   :  { %vm5197_vm11 = vcmp.ge.f32.partialorder %v4847_v13, 0.0  ;;  %v5293_v15 = vmul.f32 0.01, %v4847_v13  ;;  %v7784_v16 = vpop.f32.mrb[178].mxu0 }
 0x3bc   :  { %v9790_v19 = vsel %vm5198_vm10, %v4852_v10, %v5294_v32  ;;  %v4862_v20 = vadd.f32 %v7784_v16, %v9685_v39  ;;  %v4856_v22 = vpop.f32.mrb[179].mxu0  ;;  %8327 = vmatprep.subr.bf16.mxu1 %v8326_v27 }
 0x3bd   :  { %v9793_v24 = vsel %vm5197_vm11, %v4847_v13, %v5293_v15  ;;  %v4857_v25 = vadd.f32 %v9685_v39, %v4856_v22  ;;  %8329 = vmatpush3.bf16.msra.mxu1 %v8328_v51 }
 0x3be   :  { %v8332_v40 = vpack.c.bf16 %v9790_v19, %v9793_v24  ;;  %vm5200_vm12 = vcmp.ge.f32.partialorder %v4862_v20, 0.0  ;;  %v5296_v41 = vmul.f32 0.01, %v4862_v20 }
 0x3bf   :  { %vm5199_vm13 = vcmp.ge.f32.partialorder %v4857_v25, 0.0  ;;  %v5295_v29 = vmul.f32 0.01, %v4857_v25  ;;  %v7787_v44 = vpop.f32.mrb[180].mxu0 }
 0x3c0   :  { %v9807_v47 = vsel %vm5200_vm12, %v4862_v20, %v5296_v41  ;;  %v4872_v45 = vadd.f32 %v7787_v44, %v9685_v39  ;;  %v4866_v3 = vpop.f32.mrb[181].mxu0  ;;  %5530 = vmatmul.mubr.f32.vlgmr.msra.gmra.mrb[170].mxu1 %v5453_v37 }
 0x3c1   :  { %v9810_v51 = vsel %vm5199_vm13, %v4857_v25, %v5295_v29  ;;  %v4867_v48 = vadd.f32 %v9685_v39, %v4866_v3  ;;  %5534 = vmatprep.mubr.f32.mxu1 %v5460_v26 }
 0x3c2   :  { %v8336_v33 = vpack.c.bf16 %v9807_v47, %v9810_v51  ;;  %vm5202_vm14 = vcmp.ge.f32.partialorder %v4872_v45, 0.0  ;;  %v5298_v30 = vmul.f32 0.01, %v4872_v45 }
 0x3c3   :  { %vm5201_vm15 = vcmp.ge.f32.partialorder %v4867_v48, 0.0  ;;  %v5297_v35 = vmul.f32 0.01, %v4867_v48  ;;  %v7790_v38 = vpop.f32.mrb[182].mxu0 }
 0x3c4   :  { %v9821_v53 = vsel %vm5202_vm14, %v4872_v45, %v5298_v30  ;;  %v4882_v57 = vadd.f32 %v7790_v38, %v9685_v39  ;;  %v4876_v58 = vpop.f32.mrb[183].mxu0  ;;  %5535 = vmatmul.mubr.f32.gmra.mrb[172].mxu1 %v5459_v31 }
 0x3c5   :  { %v9824_v43 = vsel %vm5201_vm15, %v4867_v48, %v5297_v35  ;;  %v4877_v52 = vadd.f32 %v9685_v39, %v4876_v58  ;;  %5604 = vmatprep.mubr.f32.mxu1 %v5456_v36 }
 0x3c6   :  { %v8340_v55 = vpack.c.bf16 %v9821_v53, %v9824_v43  ;;  %vm5204_vm1 = vcmp.ge.f32.partialorder %v4882_v57, 0.0  ;;  %v5300_v8 = vmul.f32 0.01, %v4882_v57 }
 0x3c7   :  { %vm5203_vm2 = vcmp.ge.f32.partialorder %v4877_v52, 0.0  ;;  %v5299_v42 = vmul.f32 0.01, %v4877_v52  ;;  %v7793_v46 = vpop.f32.mrb[184].mxu0 }
 0x3c8   :  { %v9829_v0 = vsel %vm5204_vm1, %v4882_v57, %v5300_v8  ;;  %v4892_v50 = vadd.f32 %v7793_v46, %v9685_v39  ;;  %v4886_v2 = vpop.f32.mrb[185].mxu0 }
 0x3c9   :  { %v9832_v63 = vsel %vm5203_vm2, %v4877_v52, %v5299_v42  ;;  %v4887_v49 = vadd.f32 %v9685_v39, %v4886_v2 }
 0x3ca   :  { %v8344_v6 = vpack.c.bf16 %v9829_v0, %v9832_v63  ;;  %vm5206_vm3 = vcmp.ge.f32.partialorder %v4892_v50, 0.0  ;;  %v5302_v54 = vmul.f32 0.01, %v4892_v50 }
 0x3cb   :  { %vm5205_vm4 = vcmp.ge.f32.partialorder %v4887_v49, 0.0  ;;  %v5301_v17 = vmul.f32 0.01, %v4887_v49  ;;  %v7796_v60 = vpop.f32.mrb[186].mxu0 }
 0x3cc   :  { %v9837_v9 = vsel %vm5206_vm3, %v4892_v50, %v5302_v54  ;;  %v4902_v34 = vadd.f32 %v7796_v60, %v9685_v39  ;;  %v4896_v12 = vpop.f32.mrb[187].mxu0 }
 0x3cd   :  { %v9840_v61 = vsel %vm5205_vm4, %v4887_v49, %v5301_v17  ;;  %v4897_v62 = vadd.f32 %v9685_v39, %v4896_v12 }
 0x3ce   :  { %v8348_v1 = vpack.c.bf16 %v9837_v9, %v9840_v61  ;;  %vm5208_vm5 = vcmp.ge.f32.partialorder %v4902_v34, 0.0  ;;  %v5304_v4 = vmul.f32 0.01, %v4902_v34 }
 0x3cf   :  { %vm5207_vm6 = vcmp.ge.f32.partialorder %v4897_v62, 0.0  ;;  %v5303_v7 = vmul.f32 0.01, %v4897_v62  ;;  %v7799_v14 = vpop.f32.mrb[188].mxu0 }
 0x3d0   :  { %v9845_v18 = vsel %vm5208_vm5, %v4902_v34, %v5304_v4  ;;  %v4912_v21 = vadd.f32 %v7799_v14, %v9685_v39  ;;  %v4906_v23 = vpop.f32.mrb[189].mxu0 }
 0x3d1   :  { %v9848_v59 = vsel %vm5207_vm6, %v4897_v62, %v5303_v7  ;;  %v4907_v5 = vadd.f32 %v9685_v39, %v4906_v23 }
 0x3d2   :  { %v8352_v10 = vpack.c.bf16 %v9845_v18, %v9848_v59  ;;  %vm5210_vm7 = vcmp.ge.f32.partialorder %v4912_v21, 0.0  ;;  %v5306_v56 = vmul.f32 0.01, %v4912_v21 }
 0x3d3   :  { %vm5209_vm0 = vcmp.ge.f32.partialorder %v4907_v5, 0.0  ;;  %v5305_v11 = vmul.f32 0.01, %v4907_v5  ;;  %v7802_v13 = vpop.f32.mrb[190].mxu0 }
 0x3d4   :  { %v9853_v28 = vsel %vm5210_vm7, %v4912_v21, %v5306_v56  ;;  %v4922_v32 = vadd.f32 %v7802_v13, %v9685_v39  ;;  %v4916_v27 = vpop.f32.mrb[191].mxu0 }
 0x3d5   :  { %v9856_v15 = vsel %vm5209_vm0, %v4907_v5, %v5305_v11  ;;  %v4917_v16 = vadd.f32 %v9685_v39, %v4916_v27 }
 0x3d6   :  { %v8356_v20 = vpack.c.bf16 %v9853_v28, %v9856_v15  ;;  %vm5212_vm9 = vcmp.ge.f32.partialorder %v4922_v32, 0.0  ;;  %v5308_v22 = vmul.f32 0.01, %v4922_v32  ;;  %v5455_v28 = vld [vmem:[%s10081_s1 + $0x10] sm:$0xff] }
 0x3d7   :  { %vm5211_vm10 = vcmp.ge.f32.partialorder %v4917_v16, 0.0  ;;  %v5307_v25 = vmul.f32 0.01, %v4917_v16  ;;  %v7805_v37 = vpop.f32.mrb[192].mxu0 }
 0x3d8   :  { %v9861_v41 = vsel %vm5212_vm9, %v4922_v32, %v5308_v22  ;;  %v4932_v26 = vadd.f32 %v7805_v37, %v9685_v39  ;;  %v4926_v29 = vpop.f32.mrb[193].mxu0 }
 0x3d9   :  { %v9864_v44 = vsel %vm5211_vm10, %v4917_v16, %v5307_v25  ;;  %v4927_v45 = vadd.f32 %v9685_v39, %v4926_v29 }
 0x3da   :  { %v8360_v3 = vpack.c.bf16 %v9861_v41, %v9864_v44  ;;  %vm5214_vm11 = vcmp.ge.f32.partialorder %v4932_v26, 0.0  ;;  %v5310_v48 = vmul.f32 0.01, %v4932_v26 }
 0x3db   :  { %vm5213_vm12 = vcmp.ge.f32.partialorder %v4927_v45, 0.0  ;;  %v5309_v31 = vmul.f32 0.01, %v4927_v45  ;;  %v7808_v30 = vpop.f32.mrb[194].mxu0 }
 0x3dc   :  { %v4942_v36 = vadd.f32 %v7808_v30, %v9685_v39  ;;  %v4936_v35 = vpop.f32.mrb[195].mxu0  ;;  %v5406_v38 = vsel %vm5214_vm11, %v4932_v26, %v5310_v48 }
 0x3dd   :  { %v4937_v57 = vadd.f32 %v9685_v39, %v4936_v35  ;;  %v5405_v58 = vsel %vm5213_vm12, %v4927_v45, %v5309_v31 }
 0x3de   :  { %vm5216_vm13 = vcmp.ge.f32.partialorder %v4942_v36, 0.0  ;;  %v5312_v52 = vmul.f32 0.01, %v4942_v36  ;;  %v8330_v8 = vpack.c.bf16 %v5406_v38, %v5405_v58 }
 0x3df   :  { %vm5215_vm14 = vcmp.ge.f32.partialorder %v4937_v57, 0.0  ;;  %v5311_v42 = vmul.f32 0.01, %v4937_v57  ;;  %v7811_v46 = vpop.f32.mrb[196].mxu0 }
 0x3e0   :  { %v4952_v50 = vadd.f32 %v7811_v46, %v9685_v39  ;;  %v4946_v2 = vpop.f32.mrb[197].mxu0  ;;  %8331 = vmatprep.subr.bf16.mxu1 %v8330_v8  ;;  %v5408_v49 = vsel %vm5216_vm13, %v4942_v36, %v5312_v52 }
 0x3e1   :  { %v4947_v54 = vadd.f32 %v9685_v39, %v4946_v2  ;;  %8333 = vmatpush3.bf16.msra.mxu1 %v8332_v40  ;;  %v5407_v17 = vsel %vm5215_vm14, %v4937_v57, %v5311_v42 }
 0x3e2   :  { %vm5218_vm15 = vcmp.ge.f32.partialorder %v4952_v50, 0.0  ;;  %v5314_v60 = vmul.f32 0.01, %v4952_v50  ;;  %v8334_v34 = vpack.c.bf16 %v5408_v49, %v5407_v17 }
 0x3e3   :  { %vm5217_vm1 = vcmp.ge.f32.partialorder %v4947_v54, 0.0  ;;  %v5313_v12 = vmul.f32 0.01, %v4947_v54  ;;  %v7814_v62 = vpop.f32.mrb[198].mxu0 }
 0x3e4   :  { %v4962_v4 = vadd.f32 %v7814_v62, %v9685_v39  ;;  %v4956_v7 = vpop.f32.mrb[199].mxu0  ;;  %8335 = vmatprep.subr.bf16.mxu1 %v8334_v34  ;;  %v5410_v14 = vsel %vm5218_vm15, %v4952_v50, %v5314_v60 }
 0x3e5   :  { %v4957_v21 = vadd.f32 %v9685_v39, %v4956_v7  ;;  %8337 = vmatpush3.bf16.msra.mxu1 %v8336_v33  ;;  %v5409_v19 = vsel %vm5217_vm1, %v4947_v54, %v5313_v12 }
 0x3e6   :  { %vm5220_vm2 = vcmp.ge.f32.partialorder %v4962_v4, 0.0  ;;  %v5316_v24 = vmul.f32 0.01, %v4962_v4  ;;  %v8338_v40 = vpack.c.bf16 %v5410_v14, %v5409_v19  ;;  %v5462_v14 = vld [vmem:[%s10081_s1 + $0x48] sm:$0xff] }
 0x3e7   :  { %vm5219_vm3 = vcmp.ge.f32.partialorder %v4957_v21, 0.0  ;;  %v5315_v23 = vmul.f32 0.01, %v4957_v21  ;;  %v7817_v5 = vpop.f32.mrb[200].mxu0 }
 0x3e8   :  { %v4972_v56 = vadd.f32 %v7817_v5, %v9685_v39  ;;  %v4966_v11 = vpop.f32.mrb[201].mxu0  ;;  %8339 = vmatprep.subr.bf16.mxu1 %v8338_v40  ;;  %v5412_v13 = vsel %vm5220_vm2, %v4962_v4, %v5316_v24 }
 0x3e9   :  { %v4967_v32 = vadd.f32 %v9685_v39, %v4966_v11  ;;  %8341 = vmatpush3.bf16.msra.mxu1 %v8340_v55  ;;  %v5411_v47 = vsel %vm5219_vm3, %v4957_v21, %v5315_v23  ;;  %v5461_v23 = vld [vmem:[%s10081_s1 + $0x40] sm:$0xff]  ;;  %v5458_v11 = vld [vmem:[%s10081_s1 + $0x28] sm:$0xff] }
 0x3ea   :  { %vm5222_vm4 = vcmp.ge.f32.partialorder %v4972_v56, 0.0  ;;  %v5318_v51 = vmul.f32 0.01, %v4972_v56  ;;  %v8342_v33 = vpack.c.bf16 %v5412_v13, %v5411_v47 }
 0x3eb   :  { %vm5221_vm5 = vcmp.ge.f32.partialorder %v4967_v32, 0.0  ;;  %v5317_v27 = vmul.f32 0.01, %v4967_v32  ;;  %v7820_v16 = vpop.f32.mrb[202].mxu0 }
 0x3ec   :  { %v4982_v22 = vadd.f32 %v7820_v16, %v9685_v39  ;;  %v4976_v25 = vpop.f32.mrb[203].mxu0  ;;  %8343 = vmatprep.subr.bf16.mxu1 %v8342_v33  ;;  %v5414_v37 = vsel %vm5222_vm4, %v4972_v56, %v5318_v51 }
 0x3ed   :  { %v4977_v26 = vadd.f32 %v9685_v39, %v4976_v25  ;;  %8345 = vmatpush3.bf16.msra.mxu1 %v8344_v6  ;;  %v5413_v53 = vsel %vm5221_vm5, %v4967_v32, %v5317_v27 }
 0x3ee   :  { %vm5224_vm6 = vcmp.ge.f32.partialorder %v4982_v22, 0.0  ;;  %v5320_v43 = vmul.f32 0.01, %v4982_v22  ;;  %v8346_v55 = vpack.c.bf16 %v5414_v37, %v5413_v53 }
 0x3ef   :  { %vm5223_vm7 = vcmp.ge.f32.partialorder %v4977_v26, 0.0  ;;  %v5319_v29 = vmul.f32 0.01, %v4977_v26  ;;  %v7823_v45 = vpop.f32.mrb[204].mxu0 }
 0x3f0   :  { %v4992_v48 = vadd.f32 %v7823_v45, %v9685_v39  ;;  %v4986_v31 = vpop.f32.mrb[205].mxu0  ;;  %8347 = vmatprep.subr.bf16.mxu1 %v8346_v55  ;;  %v5416_v30 = vsel %vm5224_vm6, %v4982_v22, %v5320_v43 }
 0x3f1   :  { %v4987_v36 = vadd.f32 %v9685_v39, %v4986_v31  ;;  %8349 = vmatpush3.bf16.msra.mxu1 %v8348_v1  ;;  %v5415_v0 = vsel %vm5223_vm7, %v4977_v26, %v5319_v29 }
 0x3f2   :  { %vm5226_vm0 = vcmp.ge.f32.partialorder %v4992_v48, 0.0  ;;  %v5322_v63 = vmul.f32 0.01, %v4992_v48  ;;  %v8350_v6 = vpack.c.bf16 %v5416_v30, %v5415_v0 }
 0x3f3   :  { %vm5225_vm9 = vcmp.ge.f32.partialorder %v4987_v36, 0.0  ;;  %v5321_v35 = vmul.f32 0.01, %v4987_v36  ;;  %v7826_v38 = vpop.f32.mrb[206].mxu0 }
 0x3f4   :  { %v5002_v57 = vadd.f32 %v7826_v38, %v9685_v39  ;;  %v4996_v58 = vpop.f32.mrb[207].mxu0  ;;  %8351 = vmatprep.subr.bf16.mxu1 %v8350_v6  ;;  %v5418_v52 = vsel %vm5226_vm0, %v4992_v48, %v5322_v63 }
 0x3f5   :  { %v4997_v8 = vadd.f32 %v9685_v39, %v4996_v58  ;;  %8353 = vmatpush3.bf16.msra.mxu1 %v8352_v10  ;;  %v5417_v9 = vsel %vm5225_vm9, %v4987_v36, %v5321_v35 }
 0x3f6   :  { %vm5228_vm10 = vcmp.ge.f32.partialorder %v5002_v57, 0.0  ;;  %v5324_v61 = vmul.f32 0.01, %v5002_v57  ;;  %v8354_v1 = vpack.c.bf16 %v5418_v52, %v5417_v9 }
 0x3f7   :  { %vm5227_vm11 = vcmp.ge.f32.partialorder %v4997_v8, 0.0  ;;  %v5323_v42 = vmul.f32 0.01, %v4997_v8  ;;  %v7829_v46 = vpop.f32.mrb[208].mxu0 }
 0x3f8   :  { %v5012_v50 = vadd.f32 %v7829_v46, %v9685_v39  ;;  %v5006_v2 = vpop.f32.mrb[209].mxu0  ;;  %8355 = vmatprep.subr.bf16.mxu1 %v8354_v1  ;;  %v5420_v49 = vsel %vm5228_vm10, %v5002_v57, %v5324_v61 }
 0x3f9   :  { %v5007_v54 = vadd.f32 %v9685_v39, %v5006_v2  ;;  %8357 = vmatpush3.bf16.msra.mxu1 %v8356_v20  ;;  %v5419_v18 = vsel %vm5227_vm11, %v4997_v8, %v5323_v42 }
 0x3fa   :  { %vm5230_vm12 = vcmp.ge.f32.partialorder %v5012_v50, 0.0  ;;  %v5326_v59 = vmul.f32 0.01, %v5012_v50  ;;  %v8358_v10 = vpack.c.bf16 %v5420_v49, %v5419_v18 }
 0x3fb   :  { %vm5229_vm13 = vcmp.ge.f32.partialorder %v5007_v54, 0.0  ;;  %v5325_v17 = vmul.f32 0.01, %v5007_v54  ;;  %v7832_v60 = vpop.f32.mrb[210].mxu0 }
 0x3fc   :  { %v9906_v34 = vsel %vm5230_vm12, %v5012_v50, %v5326_v59  ;;  %v5022_v12 = vadd.f32 %v7832_v60, %v9685_v39  ;;  %v5016_v62 = vpop.f32.mrb[211].mxu0  ;;  %8359 = vmatprep.subr.bf16.mxu1 %v8358_v10 }
 0x3fd   :  { %v9909_v4 = vsel %vm5229_vm13, %v5007_v54, %v5325_v17  ;;  %v5017_v7 = vadd.f32 %v9685_v39, %v5016_v62  ;;  %8361 = vmatpush3.bf16.msra.mxu1 %v8360_v3 }
 0x3fe   :  { %v8364_v15 = vpack.c.bf16 %v9906_v34, %v9909_v4  ;;  %vm5232_vm14 = vcmp.ge.f32.partialorder %v5022_v12, 0.0  ;;  %v5328_v20 = vmul.f32 0.01, %v5022_v12 }
 0x3ff   :  { %vm5231_vm15 = vcmp.ge.f32.partialorder %v5017_v7, 0.0  ;;  %v5327_v21 = vmul.f32 0.01, %v5017_v7  ;;  %v7835_v19 = vpop.f32.mrb[212].mxu0 }
 0x400   :  { %v9923_v24 = vsel %vm5232_vm14, %v5022_v12, %v5328_v20  ;;  %v5032_v41 = vadd.f32 %v7835_v19, %v9685_v39  ;;  %v5026_v44 = vpop.f32.mrb[213].mxu0  ;;  %5605 = vmatmul.mubr.f32.vlgmr.msra.gmra.mrb[174].mxu1 %v5455_v28 }
 0x401   :  { %v9926_v3 = vsel %vm5231_vm15, %v5017_v7, %v5327_v21  ;;  %v5027_v40 = vadd.f32 %v9685_v39, %v5026_v44  ;;  %5609 = vmatprep.mubr.f32.mxu1 %v5462_v14 }
 0x402   :  { %v8368_v5 = vpack.c.bf16 %v9923_v24, %v9926_v3  ;;  %vm5234_vm1 = vcmp.ge.f32.partialorder %v5032_v41, 0.0  ;;  %v5330_v56 = vmul.f32 0.01, %v5032_v41 }
 0x403   :  { %vm5233_vm2 = vcmp.ge.f32.partialorder %v5027_v40, 0.0  ;;  %v5329_v13 = vmul.f32 0.01, %v5027_v40  ;;  %v7838_v32 = vpop.f32.mrb[144].mxu1 }
 0x404   :  { %v9937_v47 = vsel %vm5234_vm1, %v5032_v41, %v5330_v56  ;;  %v5042_v51 = vadd.f32 %v7838_v32, %v9685_v39  ;;  %v5036_v33 = vpop.f32.mrb[145].mxu1  ;;  %5610 = vmatmul.mubr.f32.gmra.mrb[176].mxu1 %v5461_v23 }
 0x405   :  { %v9940_v27 = vsel %vm5233_vm2, %v5027_v40, %v5329_v13  ;;  %v5037_v16 = vadd.f32 %v9685_v39, %v5036_v33  ;;  %5679 = vmatprep.mubr.f32.mxu1 %v5458_v11 }
 0x406   :  { %v8372_v22 = vpack.c.bf16 %v9937_v47, %v9940_v27  ;;  %vm5236_vm3 = vcmp.ge.f32.partialorder %v5042_v51, 0.0  ;;  %v5332_v25 = vmul.f32 0.01, %v5042_v51 }
 0x407   :  { %vm5235_vm4 = vcmp.ge.f32.partialorder %v5037_v16, 0.0  ;;  %v5331_v37 = vmul.f32 0.01, %v5037_v16  ;;  %v7841_v26 = vpop.f32.mrb[146].mxu1 }
 0x408   :  { %v9945_v53 = vsel %vm5236_vm3, %v5042_v51, %v5332_v25  ;;  %v5052_v43 = vadd.f32 %v7841_v26, %v9685_v39  ;;  %v5046_v55 = vpop.f32.mrb[147].mxu1 }
 0x409   :  { %v9948_v29 = vsel %vm5235_vm4, %v5037_v16, %v5331_v37  ;;  %v5047_v45 = vadd.f32 %v9685_v39, %v5046_v55 }
 0x40a   :  { %v8376_v48 = vpack.c.bf16 %v9945_v53, %v9948_v29  ;;  %vm5238_vm5 = vcmp.ge.f32.partialorder %v5052_v43, 0.0  ;;  %v5334_v31 = vmul.f32 0.01, %v5052_v43 }
 0x40b   :  { %vm5237_vm6 = vcmp.ge.f32.partialorder %v5047_v45, 0.0  ;;  %v5333_v30 = vmul.f32 0.01, %v5047_v45  ;;  %v7844_v36 = vpop.f32.mrb[148].mxu1 }
 0x40c   :  { %v9953_v0 = vsel %vm5238_vm5, %v5052_v43, %v5334_v31  ;;  %v5062_v63 = vadd.f32 %v7844_v36, %v9685_v39  ;;  %v5056_v6 = vpop.f32.mrb[149].mxu1  ;;  %v9991_v31 = vld [vmem:[%s10083_s3 + $0x60] ss:$0 sm:$0xff] }
 0x40d   :  { %v9956_v35 = vsel %vm5237_vm6, %v5047_v45, %v5333_v30  ;;  %v5057_v38 = vadd.f32 %v9685_v39, %v5056_v6 }
 0x40e   :  { %v8380_v57 = vpack.c.bf16 %v9953_v0, %v9956_v35  ;;  %vm5240_vm7 = vcmp.ge.f32.partialorder %v5062_v63, 0.0  ;;  %v5336_v58 = vmul.f32 0.01, %v5062_v63 }
 0x40f   :  { %vm5239_vm0 = vcmp.ge.f32.partialorder %v5057_v38, 0.0  ;;  %v5335_v52 = vmul.f32 0.01, %v5057_v38  ;;  %v7847_v8 = vpop.f32.mrb[150].mxu1 }
 0x410   :  { %v9961_v9 = vsel %vm5240_vm7, %v5062_v63, %v5336_v58  ;;  %v5072_v61 = vadd.f32 %v7847_v8, %v9685_v39  ;;  %v5066_v1 = vpop.f32.mrb[151].mxu1 }
 0x411   :  { %v9964_v42 = vsel %vm5239_vm0, %v5057_v38, %v5335_v52  ;;  %v5067_v46 = vadd.f32 %v9685_v39, %v5066_v1 }
 0x412   :  { %v8384_v50 = vpack.c.bf16 %v9961_v9, %v9964_v42  ;;  %vm5242_vm9 = vcmp.ge.f32.partialorder %v5072_v61, 0.0  ;;  %v5338_v2 = vmul.f32 0.01, %v5072_v61  ;;  %v5457_v9 = vld [vmem:[%s10081_s1 + $0x20] sm:$0xff]  ;;  %v5464_v42 = vld [vmem:[%s10081_s1 + $0x58] sm:$0xff] }
 0x413   :  { %vm5241_vm10 = vcmp.ge.f32.partialorder %v5067_v46, 0.0  ;;  %v5337_v49 = vmul.f32 0.01, %v5067_v46  ;;  %v7850_v54 = vpop.f32.mrb[152].mxu1 }
 0x414   :  { %v9969_v18 = vsel %vm5242_vm9, %v5072_v61, %v5338_v2  ;;  %v5082_v59 = vadd.f32 %v7850_v54, %v9685_v39  ;;  %v5076_v10 = vpop.f32.mrb[153].mxu1 }
 0x415   :  { %v9972_v17 = vsel %vm5241_vm10, %v5067_v46, %v5337_v49  ;;  %v5077_v60 = vadd.f32 %v9685_v39, %v5076_v10 }
 0x416   :  { %v8388_v12 = vpack.c.bf16 %v9969_v18, %v9972_v17  ;;  %vm5244_vm11 = vcmp.ge.f32.partialorder %v5082_v59, 0.0  ;;  %v5340_v62 = vmul.f32 0.01, %v5082_v59  ;;  %v31_v18 = vld [vmem:[%s10083_s3 + $0x68] sm:$0xff]  ;;  %v32_v17 = vld [vmem:[%s10083_s3 + $0x70] sm:$0xff] }
 0x417   :  { %vm5243_vm12 = vcmp.ge.f32.partialorder %v5077_v60, 0.0  ;;  %v5339_v7 = vmul.f32 0.01, %v5077_v60  ;;  %v7853_v28 = vpop.f32.mrb[154].mxu1 }
 0x418   :  { %v9977_v20 = vsel %vm5244_vm11, %v5082_v59, %v5340_v62  ;;  %v5092_v14 = vadd.f32 %v7853_v28, %v9685_v39  ;;  %v5086_v21 = vpop.f32.mrb[155].mxu1 }
 0x419   :  { %v9980_v19 = vsel %vm5243_vm12, %v5077_v60, %v5339_v7  ;;  %v5087_v41 = vadd.f32 %v9685_v39, %v5086_v21 }
 0x41a   :  { %v8392_v44 = vpack.c.bf16 %v9977_v20, %v9980_v19  ;;  %vm5246_vm13 = vcmp.ge.f32.partialorder %v5092_v14, 0.0  ;;  %v5342_v40 = vmul.f32 0.01, %v5092_v14  ;;  %v8394_v20 = vpack.c.bf16 %v32_v17, %v31_v18  ;;  %v34_v19 = vld [vmem:[%s10083_s3 + $0x80] sm:$0xff] }
 0x41b   :  { %vm5245_vm14 = vcmp.ge.f32.partialorder %v5087_v41, 0.0  ;;  %v5341_v23 = vmul.f32 0.01, %v5087_v41  ;;  %v7856_v56 = vpop.f32.mrb[156].mxu1 }
 0x41c   :  { %v5102_v11 = vadd.f32 %v7856_v56, %v9685_v39  ;;  %v5096_v13 = vpop.f32.mrb[157].mxu1  ;;  %v5438_v32 = vsel %vm5246_vm13, %v5092_v14, %v5342_v40 }
 0x41d   :  { %v5097_v51 = vadd.f32 %v9685_v39, %v5096_v13  ;;  %v5437_v33 = vsel %vm5245_vm14, %v5087_v41, %v5341_v23 }
 0x41e   :  { %vm5248_vm15 = vcmp.ge.f32.partialorder %v5102_v11, 0.0  ;;  %v5344_v16 = vmul.f32 0.01, %v5102_v11  ;;  %v8362_v25 = vpack.c.bf16 %v5438_v32, %v5437_v33 }
 0x41f   :  { %vm5247_vm1 = vcmp.ge.f32.partialorder %v5097_v51, 0.0  ;;  %v5343_v37 = vmul.f32 0.01, %v5097_v51  ;;  %v7859_v26 = vpop.f32.mrb[158].mxu1 }
 0x420   :  { %v5112_v43 = vadd.f32 %v7859_v26, %v9685_v39  ;;  %v5106_v55 = vpop.f32.mrb[159].mxu1  ;;  %8363 = vmatprep.subr.bf16.mxu1 %v8362_v25  ;;  %v5440_v45 = vsel %vm5248_vm15, %v5102_v11, %v5344_v16 }
 0x421   :  { %v5107_v30 = vadd.f32 %v9991_v31, %v5106_v55  ;;  %8365 = vmatpush3.bf16.msra.mxu1 %v8364_v15  ;;  %v5439_v36 = vsel %vm5247_vm1, %v5097_v51, %v5343_v37 }
 0x422   :  { %vm5250_vm2 = vcmp.ge.f32.partialorder %v5112_v43, 0.0  ;;  %v5346_v63 = vmul.f32 0.01, %v5112_v43  ;;  %v8366_v6 = vpack.c.bf16 %v5440_v45, %v5439_v36  ;;  %v35_v45 = vld [vmem:[%s10083_s3 + $0x88] sm:$0xff] }
 0x423   :  { %vm5249_vm3 = vcmp.ge.f32.partialorder %v5107_v30, 0.0  ;;  %v5345_v39 = vmul.f32 0.01, %v5107_v30  ;;  %v7862_v38 = vpop.f32.mrb[160].mxu1 }
 0x424   :  { %v5122_v58 = vadd.f32 %v9991_v31, %v7862_v38  ;;  %v5116_v52 = vpop.f32.mrb[161].mxu1  ;;  %8367 = vmatprep.subr.bf16.mxu1 %v8366_v6  ;;  %v5442_v8 = vsel %vm5250_vm2, %v5112_v43, %v5346_v63  ;;  %v38_v38 = vld [vmem:[%s10083_s3 + $0xa0] sm:$0xff] }
 0x425   :  { %v5117_v61 = vadd.f32 %v9991_v31, %v5116_v52  ;;  %8369 = vmatpush3.bf16.msra.mxu1 %v8368_v5  ;;  %v5441_v34 = vsel %vm5249_vm3, %v5107_v30, %v5345_v39  ;;  %v37_v39 = vld [vmem:[%s10083_s3 + $0x98] sm:$0xff] }
 0x426   :  { %vm5252_vm4 = vcmp.ge.f32.partialorder %v5122_v58, 0.0  ;;  %v5348_v4 = vmul.f32 0.01, %v5122_v58  ;;  %v8370_v15 = vpack.c.bf16 %v5442_v8, %v5441_v34  ;;  %v8406_v52 = vpack.c.bf16 %v38_v38, %v37_v39 }
 0x427   :  { %vm5251_vm5 = vcmp.ge.f32.partialorder %v5117_v61, 0.0  ;;  %v5347_v1 = vmul.f32 0.01, %v5117_v61  ;;  %v7865_v46 = vpop.f32.mrb[162].mxu1 }
 0x428   :  { %v5132_v2 = vadd.f32 %v9991_v31, %v7865_v46  ;;  %v5126_v49 = vpop.f32.mrb[163].mxu1  ;;  %8371 = vmatprep.subr.bf16.mxu1 %v8370_v15  ;;  %v5444_v54 = vsel %vm5252_vm4, %v5122_v58, %v5348_v4 }
 0x429   :  { %v5127_v59 = vadd.f32 %v9991_v31, %v5126_v49  ;;  %8373 = vmatpush3.bf16.msra.mxu1 %v8372_v22  ;;  %v5443_v24 = vsel %vm5251_vm5, %v5117_v61, %v5347_v1 }
 0x42a   :  { %vm5254_vm6 = vcmp.ge.f32.partialorder %v5132_v2, 0.0  ;;  %v5350_v3 = vmul.f32 0.01, %v5132_v2  ;;  %v8374_v5 = vpack.c.bf16 %v5444_v54, %v5443_v24 }
 0x42b   :  { %vm5253_vm7 = vcmp.ge.f32.partialorder %v5127_v59, 0.0  ;;  %v5349_v10 = vmul.f32 0.01, %v5127_v59  ;;  %v7868_v60 = vpop.f32.mrb[164].mxu1 }
 0x42c   :  { %v5142_v62 = vadd.f32 %v9991_v31, %v7868_v60  ;;  %v5136_v7 = vpop.f32.mrb[165].mxu1  ;;  %8375 = vmatprep.subr.bf16.mxu1 %v8374_v5  ;;  %v5446_v28 = vsel %vm5254_vm6, %v5132_v2, %v5350_v3 }
 0x42d   :  { %v5137_v14 = vadd.f32 %v9991_v31, %v5136_v7  ;;  %8377 = vmatpush3.bf16.msra.mxu1 %v8376_v48  ;;  %v5445_v47 = vsel %vm5253_vm7, %v5127_v59, %v5349_v10 }
 0x42e   :  { %vm5256_vm0 = vcmp.ge.f32.partialorder %v5142_v62, 0.0  ;;  %v5352_v27 = vmul.f32 0.01, %v5142_v62  ;;  %v8378_v22 = vpack.c.bf16 %v5446_v28, %v5445_v47  ;;  %v6179_v28 = vld [vmem:[%s10083_s3 + $0xa8] ss:$0 sm:$0xff] }
 0x42f   :  { %vm5255_vm9 = vcmp.ge.f32.partialorder %v5137_v14, 0.0  ;;  %v5351_v21 = vmul.f32 0.01, %v5137_v14  ;;  %v7871_v41 = vpop.f32.mrb[166].mxu1 }
 0x430   :  { %v5152_v40 = vadd.f32 %v9991_v31, %v7871_v41  ;;  %v5146_v23 = vpop.f32.mrb[167].mxu1  ;;  %8379 = vmatprep.subr.bf16.mxu1 %v8378_v22  ;;  %v5448_v56 = vsel %vm5256_vm0, %v5142_v62, %v5352_v27 }
 0x431   :  { %v5147_v11 = vadd.f32 %v9991_v31, %v5146_v23  ;;  %8381 = vmatpush3.bf16.msra.mxu1 %v8380_v57  ;;  %v5447_v53 = vsel %vm5255_vm9, %v5137_v14, %v5351_v21 }
 0x432   :  { %vm5258_vm10 = vcmp.ge.f32.partialorder %v5152_v40, 0.0  ;;  %v5354_v29 = vmul.f32 0.01, %v5152_v40  ;;  %v8382_v48 = vpack.c.bf16 %v5448_v56, %v5447_v53 }
 0x433   :  { %vm5257_vm11 = vcmp.ge.f32.partialorder %v5147_v11, 0.0  ;;  %v5353_v13 = vmul.f32 0.01, %v5147_v11  ;;  %v7874_v32 = vpop.f32.mrb[168].mxu1 }
 0x434   :  { %v5162_v51 = vadd.f32 %v9991_v31, %v7874_v32  ;;  %v5156_v33 = vpop.f32.mrb[169].mxu1  ;;  %8383 = vmatprep.subr.bf16.mxu1 %v8382_v48  ;;  %v5450_v16 = vsel %vm5258_vm10, %v5152_v40, %v5354_v29 }
 0x435   :  { %v5157_v25 = vadd.f32 %v9991_v31, %v5156_v33  ;;  %8385 = vmatpush3.bf16.msra.mxu1 %v8384_v50  ;;  %v5449_v0 = vsel %vm5257_vm11, %v5147_v11, %v5353_v13  ;;  %v5463_v50 = vld [vmem:[%s10081_s1 + $0x50] sm:$0xff] }
 0x436   :  { %vm5260_vm12 = vcmp.ge.f32.partialorder %v5162_v51, 0.0  ;;  %v5356_v35 = vmul.f32 0.01, %v5162_v51  ;;  %v8386_v57 = vpack.c.bf16 %v5450_v16, %v5449_v0  ;;  %v36_v31 = vld [vmem:[%s10083_s3 + $0x90] sm:$0xff] }
 0x437   :  { %vm5259_vm13 = vcmp.ge.f32.partialorder %v5157_v25, 0.0  ;;  %v5355_v37 = vmul.f32 0.01, %v5157_v25  ;;  %v8402_v36 = vpack.c.bf16 %v36_v31, %v35_v45 }
 0x438   :  { %8387 = vmatprep.subr.bf16.mxu1 %v8386_v57  ;;  %v5452_v26 = vsel %vm5260_vm12, %v5162_v51, %v5356_v35 }
 0x439   :  { %8389 = vmatpush3.bf16.msra.mxu1 %v8388_v12  ;;  %v5451_v43 = vsel %vm5259_vm13, %v5157_v25, %v5355_v37  ;;  %v33_v12 = vld [vmem:[%s10083_s3 + $0x78] sm:$0xff] }
 0x43a   :  { %v8390_v55 = vpack.c.bf16 %v5452_v26, %v5451_v43 }
 0x43c   :  { %8391 = vmatprep.subr.bf16.mxu1 %v8390_v55 }
 0x43d   :  { %8393 = vmatpush3.bf16.msra.mxu1 %v8392_v44  ;;  %v8398_v44 = vpack.c.bf16 %v34_v19, %v33_v12 }
 0x43e   :  { %8395 = vmatprep.subr.bf16.mxu1 %v8394_v20 }
 0x440   :  { %5680 = vmatmul.mubr.f32.vlgmr.msra.gmra.mrb[178].mxu1 %v5457_v9 }
 0x441   :  { %5684 = vmatprep.mubr.f32.mxu1 %v5464_v42  ;;  %8397 = vmatpush3.bf16.msra.mxu1 %v8394_v20 }
 0x442   :  { %8399 = vmatprep.subr.bf16.mxu1 %v8398_v44 }
 0x444   :  { %5685 = vmatmul.mubr.f32.gmra.mrb[180].mxu1 %v5463_v50 }
 0x445   :  { %8401 = vmatpush3.bf16.msra.mxu1 %v8398_v44 }
 0x446   :  { %8403 = vmatprep.subr.bf16.mxu1 %v8402_v36 }
 0x449   :  { %8405 = vmatpush3.bf16.msra.mxu1 %v8402_v36 }
 0x44a   :  { %8407 = vmatprep.subr.bf16.mxu1 %v8406_v52 }
 0x44d   :  { %8409 = vmatpush3.bf16.msra.mxu1 %v8406_v52 }
 0x493   :  { %v6801_v30 = vpop.f32.mrb[170].mxu1 }
 0x494   :  { %v6802_v63 = vpop.f32.mrb[171].mxu1 }
 0x495   :  { %v6803_v6 = vadd.f32 %v6802_v63, %v6801_v30 }
 0x497   :  { %v6804_v58 = vpop.f32.mrb[172].mxu1 }
 0x498   :  { %v6805_v8 = vpop.f32.mrb[173].mxu1 }
 0x499   :  { %v6806_v61 = vadd.f32 %v6805_v8, %v6804_v58 }
 0x4d3   :  { %v6839_v34 = vpop.f32.mrb[174].mxu1 }
 0x4d4   :  { %v6840_v4 = vpop.f32.mrb[175].mxu1 }
 0x4d5   :  { %v6841_v15 = vadd.f32 %v6840_v4, %v6839_v34 }
 0x4d7   :  { %v5607_v1 = vadd.f32 %v6841_v15, %v6803_v6  ;;  %v6842_v46 = vpop.f32.mrb[176].mxu1 }
 0x4d8   :  { %v6843_v2 = vpop.f32.mrb[177].mxu1 }
 0x4d9   :  { %v6844_v49 = vadd.f32 %v6843_v2, %v6842_v46 }
 0x4db   :  { %v5612_v54 = vadd.f32 %v6844_v49, %v6806_v61 }
 0x513   :  { %v6877_v59 = vpop.f32.mrb[178].mxu1 }
 0x514   :  { %v6878_v24 = vpop.f32.mrb[179].mxu1 }
 0x515   :  { %v6879_v3 = vadd.f32 %v6878_v24, %v6877_v59 }
 0x517   :  { %v5682_v5 = vadd.f32 %v6879_v3, %v5607_v1  ;;  %v6880_v10 = vpop.f32.mrb[180].mxu1 }
 0x518   :  { %v6881_v60 = vpop.f32.mrb[181].mxu1 }
 0x519   :  { %v6882_v62 = vadd.f32 %v6881_v60, %v6880_v10  ;;  %7891 = vmatprep.mubr.msk.f32.mxu1 %vm4331_vm8, %v5682_v5 }
 0x51b   :  { %v5687_v7 = vadd.f32 %v6882_v62, %v5612_v54 }
 0x51d   :  { %7892 = vmatmul.mubr.msk.f32.vlgmr.msra.gmra.mrb[182].mxu1 %vm4331_vm8, %v5687_v7 }
 0x5f0   :  { %v7893_v14 = vpop.f32.mrb[182].mxu1 }
 0x5f1   :  { %v5772_v47 = vadd.f32 %v7893_v14, %v6179_v28  ;;  %v5766_v27 = vpop.f32.mrb[183].mxu1 }
 0x5f2   :  { %v5767_v22 = vadd.f32 %v6179_v28, %v5766_v27 }
 0x5f3   :  { %5776 = vst.msk [vmem:[#allocation2 + $0x8] sm:$0xff] %vm4331_vm8, %v5772_v47 }
 0x5f4   :  { %5775 = vst.msk [vmem:[#allocation2] sm:$0xff] %vm4331_vm8, %v5767_v22 }
 0x5f5   :  { %8446 = shalt.err (!%p8443_p4)
}
 0x5f6   :  { %s8447_s26 = scalar_lea.hbm %s10084_s4, 256 }
 0x5f7   :  { %p8448_p5 = scmp.ne.s32.totalorder %s10084_s4, %s8447_s26  ;;  %p8451_p6 = scmp.lt.u32.totalorder %s8447_s26, %s10084_s4 }
 0x5f9   :  { %p8453_p7 = pnand %p8451_p6, %p8448_p5 }
 0x5fb   :  { %8456 = shalt.err (!%p8453_p7)
}
 0x5fc   :  { %s8460_s5 = smov 128   ;;  %s8461_s6 = smov 8  }
 0x5fd   :  { %5788 = dma.vmem_to_hbm [thread:$0]  %s5783_s23, 256, %s10084_s4, [#allocation3], %s8460_s5, %s8460_s5, %s8461_s6  }
 0x5fe   :  { %8457 = dma.done.wait [#allocation3], 256  }
 0x5ff   :  { %8458 = vsyncadd [#allocation3], 4294967040 }
 0x600   :  { %5792 = vsyncpa [#allocation3], 1 }

</bundles_post_ra>
